<compile_context>
chip_gen: v7x
topology: tpu7x:2x2x1
jax: 0.10.0
libtpu: 0.0.40
codegen_flags: <defaults>
</compile_context>

<pallas_src>
import functools
import numpy as np
import jax
import jax.numpy as jnp
from jax.experimental import pallas as pl
from jax.experimental.pallas import tpu as pltpu

UNROLL_T = 32   # sequences up to this length: fully-unrolled value path (no scratch)
CHUNK_T = 64    # gx chunk length for long sequences (bounds VMEM on v7x)


# -----------------------------------------------------------------------------
# Fused kernel: encoder LSTM stack -> decoder LSTM stack -> fused mean/std head
# -----------------------------------------------------------------------------
def _seq2seq_kernel(*refs, Bp, Tc, Tt, H, L, O, lo, hi, use_scratch):
    n_in = 4 + 6 * L
    xe_ref, xd_ref = refs[0], refs[1]                     # (Tc*Bp, Ie), (Tt*Bp, Id)
    enc_refs = refs[2:2 + 3 * L]                          # [wih, whh, b] * L
    dec_refs = refs[2 + 3 * L:2 + 6 * L]                  # [wih, whh, b] * L
    wh_ref, bh_ref = refs[n_in - 2], refs[n_in - 1]       # (H, OP), (1, OP)
    out_ref = refs[n_in]                                  # (Tt*Bp, OP)
    gx_sc = refs[n_in + 1] if use_scratch else None
    hseq_sc = refs[n_in + 2] if use_scratch else None

    f32 = jnp.float32

    def lstm_cell(g, h, c):
        # Gate columns pre-permuted to (f, i, g, o): the forget gate sits in lanes
        # 0..H-1 so f*c is lane-aligned with the carried (Bp, H) state.  One full-width
        # sigmoid/tanh blend (lane-iota select) avoids per-gate activation relayouts.
        lane = jax.lax.broadcasted_iota(jnp.int32, g.shape, 1)
        is_tanh = (lane >= 2 * H) & (lane < 3 * H)
        act = jnp.where(is_tanh, jnp.tanh(g), jax.nn.sigmoid(g))
        f_g = act[:, 0:H]
        i_g = act[:, H:2 * H]
        g_g = act[:, 2 * H:3 * H]
        o_g = act[:, 3 * H:4 * H]
        c_new = f_g * c + i_g * g_g
        h_new = o_g * jnp.tanh(c_new)
        return h_new, c_new

    def layer_unrolled(T, x_flat, wih_ref, whh_ref, b_ref, h0, c0, need_seq):
        # Hoisted input projection kept as a VALUE (no gx scratch round trip); every
        # per-step slice start t*Bp is static and vreg-aligned (Bp is a multiple of 8).
        w_ih, w_hh = wih_ref[...], whh_ref[...]
        gx = jnp.dot(x_flat.astype(w_ih.dtype), w_ih,
                     preferred_element_type=f32) + b_ref[...].astype(f32)
        h, c = h0, c0
        hs = []
        for t in range(T):                                # static unroll
            g = gx[t * Bp:(t + 1) * Bp, :] + jnp.dot(
                h.astype(w_hh.dtype), w_hh, preferred_element_type=f32)
            h, c = lstm_cell(g, h, c)
            if need_seq:
                hs.append(h)
        seq = jnp.concatenate(hs, axis=0) if need_seq else None
        return h, c, seq

    def layer_rolled(T, x_rows, wih_ref, whh_ref, b_ref, h0, c0, need_seq):
        # Long-sequence path: the hoisted projection is computed in CHUNK_T-step chunks
        # that reuse one gx buffer; the recurrence is a fori_loop with partial unroll.
        w_ih, w_hh = wih_ref[...], whh_ref[...]
        b = b_ref[...].astype(f32)
        h, c = h0, c0
        n_chunks = (T + CHUNK_T - 1) // CHUNK_T
        for ch in range(n_chunks):                        # static chunk loop
            t0 = ch * CHUNK_T
            tn = min(CHUNK_T, T - t0)
            xc = x_rows(t0 * Bp, tn * Bp)                 # read BEFORE any same-row write
            gx_sc[pl.ds(0, tn * Bp), :] = jnp.dot(
                xc.astype(w_ih.dtype), w_ih, preferred_element_type=f32) + b

            def step(t, carry):
                h, c = carry
                row = pl.multiple_of(t * Bp, Bp)          # 8-aligned dynamic slice start
                g = gx_sc[pl.ds(row, Bp), :] + jnp.dot(
                    h.astype(w_hh.dtype), w_hh, preferred_element_type=f32)
                h, c = lstm_cell(g, h, c)
                if need_seq:
                    hseq_sc[pl.ds(pl.multiple_of(t0 * Bp + row, Bp), Bp), :] = h
                return h, c

            h, c = jax.lax.fori_loop(0, tn, step, (h, c), unroll=8)
        return h, c

    def run_stack(T, x_ref, w_refs, init, need_top_seq):
        unrolled = T <= UNROLL_T
        h_fin, c_fin, top_seq = [], [], None
        if unrolled:
            x_cur = x_ref[...].astype(f32)
        else:
            x_get = lambda r0, n: x_ref[pl.ds(r0, n), :].astype(f32)
        for l in range(L):
            wih_ref, whh_ref, b_ref = w_refs[3 * l:3 * l + 3]
            h0, c0 = init[l]
            # Skip storing the top layer's sequence unless it is actually consumed.
            need_seq = (l + 1 < L) or need_top_seq
            if unrolled:
                hT, cT, seq = layer_unrolled(T, x_cur, wih_ref, whh_ref, b_ref,
                                             h0, c0, need_seq)
                if l + 1 < L:
                    x_cur = seq
                top_seq = seq
            else:
                hT, cT = layer_rolled(T, x_get, wih_ref, whh_ref, b_ref,
                                      h0, c0, need_seq)
                if l + 1 < L:
                    x_get = lambda r0, n: hseq_sc[pl.ds(r0, n), :]
                if need_top_seq and l + 1 == L:
                    top_seq = hseq_sc[pl.ds(0, T * Bp), :]
            h_fin.append(hT)
            c_fin.append(cT)
        return h_fin, c_fin, top_seq

    zeros = jnp.zeros((Bp, H), f32)

    # -------- encoder stack (only final h/c are consumed; top sequence is skipped) ----
    enc_h, enc_c, _ = run_stack(Tc, xe_ref, enc_refs, [(zeros, zeros)] * L, False)

    # -------- decoder stack, initialized from the encoder's final state ---------------
    _, _, dec_seq = run_stack(Tt, xd_ref, dec_refs, list(zip(enc_h, enc_c)), True)

    # -------- fused mean/std head: one lane-dense matmul + ONE full-width store -------
    w_h = wh_ref[...]
    out = jnp.dot(dec_seq.astype(w_h.dtype), w_h,
                  preferred_element_type=f32) + bh_ref[...].astype(f32)
    lane = jax.lax.broadcasted_iota(jnp.int32, out.shape, 1)
    is_std = (lane >= O) & (lane < 2 * O)
    # Matches the reference clamp(log(min_std), -log(min_std)); like torch.clamp it
    # degenerates (lo > hi -> everything == hi) only if min_std >= 1.
    sigma = jnp.exp(jnp.clip(out, lo, hi))
    out_ref[...] = jnp.where(is_std, sigma, out)


# -----------------------------------------------------------------------------
# One-time weight preparation: transpose, gate reorder (i,f,g,o) -> (f,i,g,o),
# bias fusion, head fusion + lane padding, optional bf16 cast (recommended on
# v5e/v6e/v7x -- the MXU is bf16-native on all three; gate math stays float32).
# -----------------------------------------------------------------------------
def prepare_params(params, dtype=jnp.float32):
    H = params["hidden_size"]
    O = int(params["mean_w"].shape[0])
    perm = np.concatenate([np.arange(H, 2 * H),        # f -> lanes 0..H-1 (aligned with c)
                           np.arange(0, H),            # i
                           np.arange(2 * H, 3 * H),    # g (tanh)
                           np.arange(3 * H, 4 * H)])   # o

    def prep_layer(p):
        wih_t = jnp.asarray(p["w_ih"], jnp.float32).T[:, perm].astype(dtype)
        whh_t = jnp.asarray(p["w_hh"], jnp.float32).T[:, perm].astype(dtype)
        b = (jnp.asarray(p["b_ih"], jnp.float32)
             + jnp.asarray(p["b_hh"], jnp.float32))[perm].reshape(1, 4 * H)
        return wih_t, whh_t, b                          # bias stays f32

    OP = ((2 * O + 127) // 128) * 128                   # pad head width to a lane multiple
    wh = np.zeros((H, OP), np.float32)
    wh[:, 0:O] = np.asarray(params["mean_w"], np.float32).T
    wh[:, O:2 * O] = np.asarray(params["std_w"], np.float32).T
    bh = np.zeros((1, OP), np.float32)
    bh[0, 0:O] = np.asarray(params["mean_b"], np.float32)
    bh[0, O:2 * O] = np.asarray(params["std_b"], np.float32)
    return {"enc": [prep_layer(p) for p in params["encoder"]],
            "dec": [prep_layer(p) for p in params["decoder"]],
            "wh": jnp.asarray(wh).astype(dtype),
            "bh": jnp.asarray(bh)}                      # bias stays f32


# -----------------------------------------------------------------------------
# Forward pass (single fused pallas_call)
# -----------------------------------------------------------------------------
@functools.partial(jax.jit, static_argnames=("min_std",))
def seq2seq_forward(prepared, context_x, context_y, target_x, min_std=0.05):
    B, Tc, _ = context_x.shape
    Tt = target_x.shape[1]
    O = context_y.shape[-1]                              # output size == y feature dim
    H = prepared["enc"][0][1].shape[0]
    L = len(prepared["enc"])
    OP = prepared["wh"].shape[1]
    Bp = ((B + 7) // 8) * 8                              # pad batch to sublane multiple

    def to_flat(x, T):
        # (B, T, F) -> time-major (T*Bp, F) with zero-padded batch (one tiny relayout)
        xt = jnp.transpose(x.astype(jnp.float32), (1, 0, 2))
        xt = jnp.pad(xt, ((0, 0), (0, Bp - B), (0, 0)))
        return xt.reshape(T * Bp, x.shape[-1])
    # TODO(synk): feed time-major inputs (or move this tiny pad/transpose into the
    # kernel) to drop the XLA relayout launches that bracket the fused call.

    xe = to_flat(jnp.concatenate([context_x, context_y], axis=-1), Tc)
    xd = to_flat(target_x, Tt)

    flat_weights = []
    for wih, whh, b in prepared["enc"] + prepared["dec"]:
        flat_weights += [wih, whh, b]

    use_scratch = (Tc > UNROLL_T) or (Tt > UNROLL_T)
    scratch_shapes = []
    scratch_bytes = 0
    if use_scratch:
        Tmax = max(Tc, Tt)
        gx_rows = min(CHUNK_T, Tmax) * Bp
        scratch_shapes = [pltpu.VMEM((gx_rows, 4 * H), jnp.float32),    # chunked gate pre-acts
                          pltpu.VMEM((Tmax * Bp, H), jnp.float32)]      # hidden sequence
        scratch_bytes = 4 * (gx_rows * 4 * H + Tmax * Bp * H)

    # Advisory cost estimate for the XLA scheduler.
    flops = 0
    for wih, whh, _b in prepared["enc"]:
        flops += 2 * Tc * Bp * (wih.shape[0] + whh.shape[0]) * 4 * H
    for wih, whh, _b in prepared["dec"]:
        flops += 2 * Tt * Bp * (wih.shape[0] + whh.shape[0]) * 4 * H
    flops += 2 * Tt * Bp * H * OP
    transcend = (Tc + Tt) * L * Bp * 9 * H + Tt * Bp * 2 * OP
    io_bytes = sum(int(np.prod(a.shape)) * a.dtype.itemsize
                   for a in [xe, xd] + flat_weights + [prepared["wh"], prepared["bh"]])
    io_bytes += Tt * Bp * OP * 4

    # Raise the scoped-VMEM limit only when the footprint needs it; cap with headroom
    # for v7x (64 MiB physical VMEM).
    temp_bytes = 4 * (max(Tc, Tt) * Bp * 5 * H + Tt * Bp * OP)
    vmem_needed = io_bytes + scratch_bytes + temp_bytes
    compiler_params = None
    if vmem_needed > 12 * 1024 * 1024:
        compiler_params = pltpu.CompilerParams(
            vmem_limit_bytes=int(min(vmem_needed * 2, 64 * 1024 * 1024)))
    # TODO(synk): on v7x, wavefront-pipeline the L layers across the two TensorCores
    # (core_map + CMEM + semaphores); a grid-less pallas_call uses a single core.

    kernel = functools.partial(
        _seq2seq_kernel, Bp=Bp, Tc=Tc, Tt=Tt, H=H, L=L, O=O,
        lo=float(np.log(min_std)), hi=float(-np.log(min_std)),
        use_scratch=use_scratch)

    out = pl.pallas_call(
        kernel,
        out_shape=jax.ShapeDtypeStruct((Tt * Bp, OP), jnp.float32),
        scratch_shapes=tuple(scratch_shapes),
        compiler_params=compiler_params,
        cost_estimate=pl.CostEstimate(flops=int(flops),
                                      transcendentals=int(transcend),
                                      bytes_accessed=int(io_bytes)),
    )(xe, xd, *flat_weights, prepared["wh"], prepared["bh"])

    out = out.reshape(Tt, Bp, OP)
    mean = jnp.transpose(out[:, :B, 0:O], (1, 0, 2))
    sigma = jnp.transpose(out[:, :B, O:2 * O], (1, 0, 2))
    return mean, sigma                                   # parameters of Normal(mean, sigma)


# -----------------------------------------------------------------------------
# Pure-JAX reference (correctness check) -- PyTorch-layout weights
# -----------------------------------------------------------------------------
def _lstm_layer_ref(x_tbi, w_ih, w_hh, b_ih, b_hh, h0, c0):
    def step(carry, x_t):
        h, c = carry
        gates = x_t @ w_ih.T + h @ w_hh.T + b_ih + b_hh
        i, f, g, o = jnp.split(gates, 4, axis=-1)
        i = jax.nn.sigmoid(i); f = jax.nn.sigmoid(f)
        g = jnp.tanh(g); o = jax.nn.sigmoid(o)
        c = f * c + i * g
        h = o * jnp.tanh(c)
        return (h, c), h
    (hT, cT), hseq = jax.lax.scan(step, (h0, c0), x_tbi)
    return hseq, hT, cT


def seq2seq_forward_ref(params, context_x, context_y, target_x, min_std=0.05):
    B = context_x.shape[0]
    H = params["hidden_size"]
    x_t = jnp.transpose(jnp.concatenate([context_x, context_y], -1), (1, 0, 2))
    zeros = jnp.zeros((B, H), jnp.float32)
    h_in, hs, cs = x_t, [], []
    for l in range(params["lstm_layers"]):
        p = params["encoder"][l]
        h_in, hT, cT = _lstm_layer_ref(h_in, p["w_ih"], p["w_hh"],
                                       p["b_ih"], p["b_hh"], zeros, zeros)
        hs.append(hT); cs.append(cT)
    d_in = jnp.transpose(target_x, (1, 0, 2))
    for l in range(params["lstm_layers"]):
        p = params["decoder"][l]
        d_in, _, _ = _lstm_layer_ref(d_in, p["w_ih"], p["w_hh"],
                                     p["b_ih"], p["b_hh"], hs[l], cs[l])
    mean = d_in @ params["mean_w"].T + params["mean_b"]
    log_sigma = d_in @ params["std_w"].T + params["std_b"]
    log_sigma = jnp.clip(log_sigma, np.log(min_std), -np.log(min_std))
    sigma = jnp.exp(log_sigma)
    return (jnp.transpose(mean, (1, 0, 2)), jnp.transpose(sigma, (1, 0, 2)))


# -----------------------------------------------------------------------------
# Deterministic parameter init (PyTorch-style uniform(-1/sqrt(H), 1/sqrt(H)))
# -----------------------------------------------------------------------------
def init_params(key, input_size, input_size_decoder, output_size,
                hidden_size=32, lstm_layers=2):
    H = hidden_size
    bound = 1.0 / np.sqrt(H)

    def uni(k, shape, b):
        return jax.random.uniform(k, shape, jnp.float32, -b, b)

    keys = iter(jax.random.split(key, 64))
    params = {"hidden_size": H, "lstm_layers": lstm_layers,
              "encoder": [], "decoder": []}
    enc_in = input_size + output_size
    for l in range(lstm_layers):
        isz = enc_in if l == 0 else H
        params["encoder"].append({
            "w_ih": uni(next(keys), (4 * H, isz), bound),
            "w_hh": uni(next(keys), (4 * H, H), bound),
            "b_ih": uni(next(keys), (4 * H,), bound),
            "b_hh": uni(next(keys), (4 * H,), bound)})
    for l in range(lstm_layers):
        isz = input_size_decoder if l == 0 else H
        params["decoder"].append({
            "w_ih": uni(next(keys), (4 * H, isz), bound),
            "w_hh": uni(next(keys), (4 * H, H), bound),
            "b_ih": uni(next(keys), (4 * H,), bound),
            "b_hh": uni(next(keys), (4 * H,), bound)})
    params["mean_w"] = uni(next(keys), (output_size, H), bound)
    params["mean_b"] = uni(next(keys), (output_size,), bound)
    params["std_w"] = uni(next(keys), (output_size, H), bound)
    params["std_b"] = uni(next(keys), (output_size,), bound)
    return params


if __name__ == "__main__":
    key = jax.random.PRNGKey(0)
    B, Tc, Tt = 2, 8, 8
    input_size, input_size_decoder, output_size, hidden_size = 4, 4, 2, 32

    kp, kx, ky, kt = jax.random.split(key, 4)
    params = init_params(kp, input_size, input_size_decoder, output_size,
                         hidden_size=hidden_size, lstm_layers=2)

    context_x = jax.random.normal(kx, (B, Tc, input_size), jnp.float32)
    context_y = jax.random.normal(ky, (B, Tc, output_size), jnp.float32)
    target_x = jax.random.normal(kt, (B, Tt, input_size_decoder), jnp.float32)

    mean_ref, sigma_ref = seq2seq_forward_ref(params, context_x, context_y, target_x)

    # float32 weights: tight check against the pure-JAX reference
    prepared = prepare_params(params, dtype=jnp.float32)
    mean, sigma = seq2seq_forward(prepared, context_x, context_y, target_x)
    jax.block_until_ready((mean, sigma))
    np.testing.assert_allclose(np.asarray(mean), np.asarray(mean_ref), rtol=2e-4, atol=2e-4)
    np.testing.assert_allclose(np.asarray(sigma), np.asarray(sigma_ref), rtol=2e-4, atol=2e-4)

    # bf16 weights (MXU-native on v5e/v6e/v7x; gate math stays f32): validated with an
    # explicit tolerance against the f32 reference, per the review.
    prepared_bf16 = prepare_params(params, dtype=jnp.bfloat16)
    mean16, sigma16 = seq2seq_forward(prepared_bf16, context_x, context_y, target_x)
    jax.block_until_ready((mean16, sigma16))
    np.testing.assert_allclose(np.asarray(mean16), np.asarray(mean_ref), rtol=1e-1, atol=1e-1)
    np.testing.assert_allclose(np.asarray(sigma16), np.asarray(sigma_ref), rtol=1e-1, atol=1e-1)

    print("KERNEL_OK")
</pallas_src>

<mosaic_0001>
module attributes {stable_mosaic.version = 11 : i64} {
  func.func @_seq2seq_kernel(%arg0: memref<64x6xf32, #tpu.memory_space<vmem>>, %arg1: memref<64x4xf32, #tpu.memory_space<vmem>>, %arg2: memref<6x128xf32, #tpu.memory_space<vmem>>, %arg3: memref<32x128xf32, #tpu.memory_space<vmem>>, %arg4: memref<1x128xf32, #tpu.memory_space<vmem>>, %arg5: memref<32x128xf32, #tpu.memory_space<vmem>>, %arg6: memref<32x128xf32, #tpu.memory_space<vmem>>, %arg7: memref<1x128xf32, #tpu.memory_space<vmem>>, %arg8: memref<4x128xf32, #tpu.memory_space<vmem>>, %arg9: memref<32x128xf32, #tpu.memory_space<vmem>>, %arg10: memref<1x128xf32, #tpu.memory_space<vmem>>, %arg11: memref<32x128xf32, #tpu.memory_space<vmem>>, %arg12: memref<32x128xf32, #tpu.memory_space<vmem>>, %arg13: memref<1x128xf32, #tpu.memory_space<vmem>>, %arg14: memref<32x128xf32, #tpu.memory_space<vmem>>, %arg15: memref<1x128xf32, #tpu.memory_space<vmem>>, %arg16: memref<64x128xf32, #tpu.memory_space<vmem>>) attributes {dimension_semantics = [], scalar_prefetch = 0 : i64, scratch_operands = 0 : i64, tpu.core_type = #tpu.core_type<tc>} {
    %cst = arith.constant 0.000000e+00 : f32
    %0 = vector.broadcast %cst : f32 to vector<8x32xf32>
    %c0 = arith.constant 0 : index
    %c0_0 = arith.constant 0 : index
    %1 = vector.load %arg0[%c0, %c0_0] : memref<64x6xf32, #tpu.memory_space<vmem>>, vector<64x6xf32>
    %c0_1 = arith.constant 0 : index
    %c0_2 = arith.constant 0 : index
    %2 = vector.load %arg2[%c0_1, %c0_2] : memref<6x128xf32, #tpu.memory_space<vmem>>, vector<6x128xf32>
    %c0_3 = arith.constant 0 : index
    %c0_4 = arith.constant 0 : index
    %3 = vector.load %arg3[%c0_3, %c0_4] : memref<32x128xf32, #tpu.memory_space<vmem>>, vector<32x128xf32>
    %cst_5 = arith.constant dense<0.000000e+00> : vector<64x128xf32>
    %4 = tpu.matmul %1, %2, %cst_5 {dimension_numbers = #tpu.dot_dimension_numbers<[1], [0], [0], [1], [0, 0, 1, 1], [], []>} : vector<64x6xf32>, vector<6x128xf32>, vector<64x128xf32> -> vector<64x128xf32>
    %c0_6 = arith.constant 0 : index
    %c0_7 = arith.constant 0 : index
    %5 = vector.load %arg4[%c0_6, %c0_7] : memref<1x128xf32, #tpu.memory_space<vmem>>, vector<1x128xf32>
    %6 = vector.broadcast %5 : vector<1x128xf32> to vector<64x128xf32>
    %7 = arith.addf %4, %6 : vector<64x128xf32>
    %8 = vector.extract_strided_slice %7 {offsets = [0, 0], sizes = [8, 128], strides = [1, 1]} : vector<64x128xf32> to vector<8x128xf32>
    %cst_8 = arith.constant dense<0.000000e+00> : vector<8x128xf32>
    %9 = tpu.matmul %0, %3, %cst_8 {dimension_numbers = #tpu.dot_dimension_numbers<[1], [0], [0], [1], [0, 0, 1, 1], [], []>} : vector<8x32xf32>, vector<32x128xf32>, vector<8x128xf32> -> vector<8x128xf32>
    %10 = arith.addf %8, %9 : vector<8x128xf32>
    %11 = tpu.iota {dimensions = array<i32: 1>} : vector<8x128xi32>
    %c64_i32 = arith.constant 64 : i32
    %12 = vector.broadcast %c64_i32 : i32 to vector<8x128xi32>
    %13 = arith.cmpi sge, %11, %12 : vector<8x128xi32>
    %c96_i32 = arith.constant 96 : i32
    %14 = vector.broadcast %c96_i32 : i32 to vector<8x128xi32>
    %15 = arith.cmpi slt, %11, %14 : vector<8x128xi32>
    %16 = arith.andi %13, %15 : vector<8x128xi1>
    %17 = math.tanh %10 : vector<8x128xf32>
    %18 = arith.negf %10 : vector<8x128xf32>
    %19 = math.exp %18 : vector<8x128xf32>
    %cst_9 = arith.constant 1.000000e+00 : f32
    %20 = vector.broadcast %cst_9 : f32 to vector<8x128xf32>
    %21 = arith.addf %20, %19 : vector<8x128xf32>
    %22 = arith.divf %20, %21 : vector<8x128xf32>
    %23 = arith.select %16, %17, %22 : vector<8x128xi1>, vector<8x128xf32>
    %24 = vector.extract_strided_slice %23 {offsets = [0, 0], sizes = [8, 32], strides = [1, 1]} : vector<8x128xf32> to vector<8x32xf32>
    %25 = vector.extract_strided_slice %23 {offsets = [0, 32], sizes = [8, 32], strides = [1, 1]} : vector<8x128xf32> to vector<8x32xf32>
    %26 = vector.extract_strided_slice %23 {offsets = [0, 64], sizes = [8, 32], strides = [1, 1]} : vector<8x128xf32> to vector<8x32xf32>
    %27 = vector.extract_strided_slice %23 {offsets = [0, 96], sizes = [8, 32], strides = [1, 1]} : vector<8x128xf32> to vector<8x32xf32>
    %28 = arith.mulf %24, %0 : vector<8x32xf32>
    %29 = arith.mulf %25, %26 : vector<8x32xf32>
    %30 = arith.addf %28, %29 : vector<8x32xf32>
    %31 = math.tanh %30 : vector<8x32xf32>
    %32 = arith.mulf %27, %31 : vector<8x32xf32>
    %33 = vector.extract_strided_slice %7 {offsets = [8, 0], sizes = [8, 128], strides = [1, 1]} : vector<64x128xf32> to vector<8x128xf32>
    %cst_10 = arith.constant dense<0.000000e+00> : vector<8x128xf32>
    %34 = tpu.matmul %32, %3, %cst_10 {dimension_numbers = #tpu.dot_dimension_numbers<[1], [0], [0], [1], [0, 0, 1, 1], [], []>} : vector<8x32xf32>, vector<32x128xf32>, vector<8x128xf32> -> vector<8x128xf32>
    %35 = arith.addf %33, %34 : vector<8x128xf32>
    %36 = tpu.iota {dimensions = array<i32: 1>} : vector<8x128xi32>
    %c64_i32_11 = arith.constant 64 : i32
    %37 = vector.broadcast %c64_i32_11 : i32 to vector<8x128xi32>
    %38 = arith.cmpi sge, %36, %37 : vector<8x128xi32>
    %c96_i32_12 = arith.constant 96 : i32
    %39 = vector.broadcast %c96_i32_12 : i32 to vector<8x128xi32>
    %40 = arith.cmpi slt, %36, %39 : vector<8x128xi32>
    %41 = arith.andi %38, %40 : vector<8x128xi1>
    %42 = math.tanh %35 : vector<8x128xf32>
    %43 = arith.negf %35 : vector<8x128xf32>
    %44 = math.exp %43 : vector<8x128xf32>
    %cst_13 = arith.constant 1.000000e+00 : f32
    %45 = vector.broadcast %cst_13 : f32 to vector<8x128xf32>
    %46 = arith.addf %45, %44 : vector<8x128xf32>
    %47 = arith.divf %45, %46 : vector<8x128xf32>
    %48 = arith.select %41, %42, %47 : vector<8x128xi1>, vector<8x128xf32>
    %49 = vector.extract_strided_slice %48 {offsets = [0, 0], sizes = [8, 32], strides = [1, 1]} : vector<8x128xf32> to vector<8x32xf32>
    %50 = vector.extract_strided_slice %48 {offsets = [0, 32], sizes = [8, 32], strides = [1, 1]} : vector<8x128xf32> to vector<8x32xf32>
    %51 = vector.extract_strided_slice %48 {offsets = [0, 64], sizes = [8, 32], strides = [1, 1]} : vector<8x128xf32> to vector<8x32xf32>
    %52 = vector.extract_strided_slice %48 {offsets = [0, 96], sizes = [8, 32], strides = [1, 1]} : vector<8x128xf32> to vector<8x32xf32>
    %53 = arith.mulf %49, %30 : vector<8x32xf32>
    %54 = arith.mulf %50, %51 : vector<8x32xf32>
    %55 = arith.addf %53, %54 : vector<8x32xf32>
    %56 = math.tanh %55 : vector<8x32xf32>
    %57 = arith.mulf %52, %56 : vector<8x32xf32>
    %58 = vector.extract_strided_slice %7 {offsets = [16, 0], sizes = [8, 128], strides = [1, 1]} : vector<64x128xf32> to vector<8x128xf32>
    %cst_14 = arith.constant dense<0.000000e+00> : vector<8x128xf32>
    %59 = tpu.matmul %57, %3, %cst_14 {dimension_numbers = #tpu.dot_dimension_numbers<[1], [0], [0], [1], [0, 0, 1, 1], [], []>} : vector<8x32xf32>, vector<32x128xf32>, vector<8x128xf32> -> vector<8x128xf32>
    %60 = arith.addf %58, %59 : vector<8x128xf32>
    %61 = tpu.iota {dimensions = array<i32: 1>} : vector<8x128xi32>
    %c64_i32_15 = arith.constant 64 : i32
    %62 = vector.broadcast %c64_i32_15 : i32 to vector<8x128xi32>
    %63 = arith.cmpi sge, %61, %62 : vector<8x128xi32>
    %c96_i32_16 = arith.constant 96 : i32
    %64 = vector.broadcast %c96_i32_16 : i32 to vector<8x128xi32>
    %65 = arith.cmpi slt, %61, %64 : vector<8x128xi32>
    %66 = arith.andi %63, %65 : vector<8x128xi1>
    %67 = math.tanh %60 : vector<8x128xf32>
    %68 = arith.negf %60 : vector<8x128xf32>
    %69 = math.exp %68 : vector<8x128xf32>
    %cst_17 = arith.constant 1.000000e+00 : f32
    %70 = vector.broadcast %cst_17 : f32 to vector<8x128xf32>
    %71 = arith.addf %70, %69 : vector<8x128xf32>
    %72 = arith.divf %70, %71 : vector<8x128xf32>
    %73 = arith.select %66, %67, %72 : vector<8x128xi1>, vector<8x128xf32>
    %74 = vector.extract_strided_slice %73 {offsets = [0, 0], sizes = [8, 32], strides = [1, 1]} : vector<8x128xf32> to vector<8x32xf32>
    %75 = vector.extract_strided_slice %73 {offsets = [0, 32], sizes = [8, 32], strides = [1, 1]} : vector<8x128xf32> to vector<8x32xf32>
    %76 = vector.extract_strided_slice %73 {offsets = [0, 64], sizes = [8, 32], strides = [1, 1]} : vector<8x128xf32> to vector<8x32xf32>
    %77 = vector.extract_strided_slice %73 {offsets = [0, 96], sizes = [8, 32], strides = [1, 1]} : vector<8x128xf32> to vector<8x32xf32>
    %78 = arith.mulf %74, %55 : vector<8x32xf32>
    %79 = arith.mulf %75, %76 : vector<8x32xf32>
    %80 = arith.addf %78, %79 : vector<8x32xf32>
    %81 = math.tanh %80 : vector<8x32xf32>
    %82 = arith.mulf %77, %81 : vector<8x32xf32>
    %83 = vector.extract_strided_slice %7 {offsets = [24, 0], sizes = [8, 128], strides = [1, 1]} : vector<64x128xf32> to vector<8x128xf32>
    %cst_18 = arith.constant dense<0.000000e+00> : vector<8x128xf32>
    %84 = tpu.matmul %82, %3, %cst_18 {dimension_numbers = #tpu.dot_dimension_numbers<[1], [0], [0], [1], [0, 0, 1, 1], [], []>} : vector<8x32xf32>, vector<32x128xf32>, vector<8x128xf32> -> vector<8x128xf32>
    %85 = arith.addf %83, %84 : vector<8x128xf32>
    %86 = tpu.iota {dimensions = array<i32: 1>} : vector<8x128xi32>
    %c64_i32_19 = arith.constant 64 : i32
    %87 = vector.broadcast %c64_i32_19 : i32 to vector<8x128xi32>
    %88 = arith.cmpi sge, %86, %87 : vector<8x128xi32>
    %c96_i32_20 = arith.constant 96 : i32
    %89 = vector.broadcast %c96_i32_20 : i32 to vector<8x128xi32>
    %90 = arith.cmpi slt, %86, %89 : vector<8x128xi32>
    %91 = arith.andi %88, %90 : vector<8x128xi1>
    %92 = math.tanh %85 : vector<8x128xf32>
    %93 = arith.negf %85 : vector<8x128xf32>
    %94 = math.exp %93 : vector<8x128xf32>
    %cst_21 = arith.constant 1.000000e+00 : f32
    %95 = vector.broadcast %cst_21 : f32 to vector<8x128xf32>
    %96 = arith.addf %95, %94 : vector<8x128xf32>
    %97 = arith.divf %95, %96 : vector<8x128xf32>
    %98 = arith.select %91, %92, %97 : vector<8x128xi1>, vector<8x128xf32>
    %99 = vector.extract_strided_slice %98 {offsets = [0, 0], sizes = [8, 32], strides = [1, 1]} : vector<8x128xf32> to vector<8x32xf32>
    %100 = vector.extract_strided_slice %98 {offsets = [0, 32], sizes = [8, 32], strides = [1, 1]} : vector<8x128xf32> to vector<8x32xf32>
    %101 = vector.extract_strided_slice %98 {offsets = [0, 64], sizes = [8, 32], strides = [1, 1]} : vector<8x128xf32> to vector<8x32xf32>
    %102 = vector.extract_strided_slice %98 {offsets = [0, 96], sizes = [8, 32], strides = [1, 1]} : vector<8x128xf32> to vector<8x32xf32>
    %103 = arith.mulf %99, %80 : vector<8x32xf32>
    %104 = arith.mulf %100, %101 : vector<8x32xf32>
    %105 = arith.addf %103, %104 : vector<8x32xf32>
    %106 = math.tanh %105 : vector<8x32xf32>
    %107 = arith.mulf %102, %106 : vector<8x32xf32>
    %108 = vector.extract_strided_slice %7 {offsets = [32, 0], sizes = [8, 128], strides = [1, 1]} : vector<64x128xf32> to vector<8x128xf32>
    %cst_22 = arith.constant dense<0.000000e+00> : vector<8x128xf32>
    %109 = tpu.matmul %107, %3, %cst_22 {dimension_numbers = #tpu.dot_dimension_numbers<[1], [0], [0], [1], [0, 0, 1, 1], [], []>} : vector<8x32xf32>, vector<32x128xf32>, vector<8x128xf32> -> vector<8x128xf32>
    %110 = arith.addf %108, %109 : vector<8x128xf32>
    %111 = tpu.iota {dimensions = array<i32: 1>} : vector<8x128xi32>
    %c64_i32_23 = arith.constant 64 : i32
    %112 = vector.broadcast %c64_i32_23 : i32 to vector<8x128xi32>
    %113 = arith.cmpi sge, %111, %112 : vector<8x128xi32>
    %c96_i32_24 = arith.constant 96 : i32
    %114 = vector.broadcast %c96_i32_24 : i32 to vector<8x128xi32>
    %115 = arith.cmpi slt, %111, %114 : vector<8x128xi32>
    %116 = arith.andi %113, %115 : vector<8x128xi1>
    %117 = math.tanh %110 : vector<8x128xf32>
    %118 = arith.negf %110 : vector<8x128xf32>
    %119 = math.exp %118 : vector<8x128xf32>
    %cst_25 = arith.constant 1.000000e+00 : f32
    %120 = vector.broadcast %cst_25 : f32 to vector<8x128xf32>
    %121 = arith.addf %120, %119 : vector<8x128xf32>
    %122 = arith.divf %120, %121 : vector<8x128xf32>
    %123 = arith.select %116, %117, %122 : vector<8x128xi1>, vector<8x128xf32>
    %124 = vector.extract_strided_slice %123 {offsets = [0, 0], sizes = [8, 32], strides = [1, 1]} : vector<8x128xf32> to vector<8x32xf32>
    %125 = vector.extract_strided_slice %123 {offsets = [0, 32], sizes = [8, 32], strides = [1, 1]} : vector<8x128xf32> to vector<8x32xf32>
    %126 = vector.extract_strided_slice %123 {offsets = [0, 64], sizes = [8, 32], strides = [1, 1]} : vector<8x128xf32> to vector<8x32xf32>
    %127 = vector.extract_strided_slice %123 {offsets = [0, 96], sizes = [8, 32], strides = [1, 1]} : vector<8x128xf32> to vector<8x32xf32>
    %128 = arith.mulf %124, %105 : vector<8x32xf32>
    %129 = arith.mulf %125, %126 : vector<8x32xf32>
    %130 = arith.addf %128, %129 : vector<8x32xf32>
    %131 = math.tanh %130 : vector<8x32xf32>
    %132 = arith.mulf %127, %131 : vector<8x32xf32>
    %133 = vector.extract_strided_slice %7 {offsets = [40, 0], sizes = [8, 128], strides = [1, 1]} : vector<64x128xf32> to vector<8x128xf32>
    %cst_26 = arith.constant dense<0.000000e+00> : vector<8x128xf32>
    %134 = tpu.matmul %132, %3, %cst_26 {dimension_numbers = #tpu.dot_dimension_numbers<[1], [0], [0], [1], [0, 0, 1, 1], [], []>} : vector<8x32xf32>, vector<32x128xf32>, vector<8x128xf32> -> vector<8x128xf32>
    %135 = arith.addf %133, %134 : vector<8x128xf32>
    %136 = tpu.iota {dimensions = array<i32: 1>} : vector<8x128xi32>
    %c64_i32_27 = arith.constant 64 : i32
    %137 = vector.broadcast %c64_i32_27 : i32 to vector<8x128xi32>
    %138 = arith.cmpi sge, %136, %137 : vector<8x128xi32>
    %c96_i32_28 = arith.constant 96 : i32
    %139 = vector.broadcast %c96_i32_28 : i32 to vector<8x128xi32>
    %140 = arith.cmpi slt, %136, %139 : vector<8x128xi32>
    %141 = arith.andi %138, %140 : vector<8x128xi1>
    %142 = math.tanh %135 : vector<8x128xf32>
    %143 = arith.negf %135 : vector<8x128xf32>
    %144 = math.exp %143 : vector<8x128xf32>
    %cst_29 = arith.constant 1.000000e+00 : f32
    %145 = vector.broadcast %cst_29 : f32 to vector<8x128xf32>
    %146 = arith.addf %145, %144 : vector<8x128xf32>
    %147 = arith.divf %145, %146 : vector<8x128xf32>
    %148 = arith.select %141, %142, %147 : vector<8x128xi1>, vector<8x128xf32>
    %149 = vector.extract_strided_slice %148 {offsets = [0, 0], sizes = [8, 32], strides = [1, 1]} : vector<8x128xf32> to vector<8x32xf32>
    %150 = vector.extract_strided_slice %148 {offsets = [0, 32], sizes = [8, 32], strides = [1, 1]} : vector<8x128xf32> to vector<8x32xf32>
    %151 = vector.extract_strided_slice %148 {offsets = [0, 64], sizes = [8, 32], strides = [1, 1]} : vector<8x128xf32> to vector<8x32xf32>
    %152 = vector.extract_strided_slice %148 {offsets = [0, 96], sizes = [8, 32], strides = [1, 1]} : vector<8x128xf32> to vector<8x32xf32>
    %153 = arith.mulf %149, %130 : vector<8x32xf32>
    %154 = arith.mulf %150, %151 : vector<8x32xf32>
    %155 = arith.addf %153, %154 : vector<8x32xf32>
    %156 = math.tanh %155 : vector<8x32xf32>
    %157 = arith.mulf %152, %156 : vector<8x32xf32>
    %158 = vector.extract_strided_slice %7 {offsets = [48, 0], sizes = [8, 128], strides = [1, 1]} : vector<64x128xf32> to vector<8x128xf32>
    %cst_30 = arith.constant dense<0.000000e+00> : vector<8x128xf32>
    %159 = tpu.matmul %157, %3, %cst_30 {dimension_numbers = #tpu.dot_dimension_numbers<[1], [0], [0], [1], [0, 0, 1, 1], [], []>} : vector<8x32xf32>, vector<32x128xf32>, vector<8x128xf32> -> vector<8x128xf32>
    %160 = arith.addf %158, %159 : vector<8x128xf32>
    %161 = tpu.iota {dimensions = array<i32: 1>} : vector<8x128xi32>
    %c64_i32_31 = arith.constant 64 : i32
    %162 = vector.broadcast %c64_i32_31 : i32 to vector<8x128xi32>
    %163 = arith.cmpi sge, %161, %162 : vector<8x128xi32>
    %c96_i32_32 = arith.constant 96 : i32
    %164 = vector.broadcast %c96_i32_32 : i32 to vector<8x128xi32>
    %165 = arith.cmpi slt, %161, %164 : vector<8x128xi32>
    %166 = arith.andi %163, %165 : vector<8x128xi1>
    %167 = math.tanh %160 : vector<8x128xf32>
    %168 = arith.negf %160 : vector<8x128xf32>
    %169 = math.exp %168 : vector<8x128xf32>
    %cst_33 = arith.constant 1.000000e+00 : f32
    %170 = vector.broadcast %cst_33 : f32 to vector<8x128xf32>
    %171 = arith.addf %170, %169 : vector<8x128xf32>
    %172 = arith.divf %170, %171 : vector<8x128xf32>
    %173 = arith.select %166, %167, %172 : vector<8x128xi1>, vector<8x128xf32>
    %174 = vector.extract_strided_slice %173 {offsets = [0, 0], sizes = [8, 32], strides = [1, 1]} : vector<8x128xf32> to vector<8x32xf32>
    %175 = vector.extract_strided_slice %173 {offsets = [0, 32], sizes = [8, 32], strides = [1, 1]} : vector<8x128xf32> to vector<8x32xf32>
    %176 = vector.extract_strided_slice %173 {offsets = [0, 64], sizes = [8, 32], strides = [1, 1]} : vector<8x128xf32> to vector<8x32xf32>
    %177 = vector.extract_strided_slice %173 {offsets = [0, 96], sizes = [8, 32], strides = [1, 1]} : vector<8x128xf32> to vector<8x32xf32>
    %178 = arith.mulf %174, %155 : vector<8x32xf32>
    %179 = arith.mulf %175, %176 : vector<8x32xf32>
    %180 = arith.addf %178, %179 : vector<8x32xf32>
    %181 = math.tanh %180 : vector<8x32xf32>
    %182 = arith.mulf %177, %181 : vector<8x32xf32>
    %183 = vector.extract_strided_slice %7 {offsets = [56, 0], sizes = [8, 128], strides = [1, 1]} : vector<64x128xf32> to vector<8x128xf32>
    %cst_34 = arith.constant dense<0.000000e+00> : vector<8x128xf32>
    %184 = tpu.matmul %182, %3, %cst_34 {dimension_numbers = #tpu.dot_dimension_numbers<[1], [0], [0], [1], [0, 0, 1, 1], [], []>} : vector<8x32xf32>, vector<32x128xf32>, vector<8x128xf32> -> vector<8x128xf32>
    %185 = arith.addf %183, %184 : vector<8x128xf32>
    %186 = tpu.iota {dimensions = array<i32: 1>} : vector<8x128xi32>
    %c64_i32_35 = arith.constant 64 : i32
    %187 = vector.broadcast %c64_i32_35 : i32 to vector<8x128xi32>
    %188 = arith.cmpi sge, %186, %187 : vector<8x128xi32>
    %c96_i32_36 = arith.constant 96 : i32
    %189 = vector.broadcast %c96_i32_36 : i32 to vector<8x128xi32>
    %190 = arith.cmpi slt, %186, %189 : vector<8x128xi32>
    %191 = arith.andi %188, %190 : vector<8x128xi1>
    %192 = math.tanh %185 : vector<8x128xf32>
    %193 = arith.negf %185 : vector<8x128xf32>
    %194 = math.exp %193 : vector<8x128xf32>
    %cst_37 = arith.constant 1.000000e+00 : f32
    %195 = vector.broadcast %cst_37 : f32 to vector<8x128xf32>
    %196 = arith.addf %195, %194 : vector<8x128xf32>
    %197 = arith.divf %195, %196 : vector<8x128xf32>
    %198 = arith.select %191, %192, %197 : vector<8x128xi1>, vector<8x128xf32>
    %199 = vector.extract_strided_slice %198 {offsets = [0, 0], sizes = [8, 32], strides = [1, 1]} : vector<8x128xf32> to vector<8x32xf32>
    %200 = vector.extract_strided_slice %198 {offsets = [0, 32], sizes = [8, 32], strides = [1, 1]} : vector<8x128xf32> to vector<8x32xf32>
    %201 = vector.extract_strided_slice %198 {offsets = [0, 64], sizes = [8, 32], strides = [1, 1]} : vector<8x128xf32> to vector<8x32xf32>
    %202 = vector.extract_strided_slice %198 {offsets = [0, 96], sizes = [8, 32], strides = [1, 1]} : vector<8x128xf32> to vector<8x32xf32>
    %203 = arith.mulf %199, %180 : vector<8x32xf32>
    %204 = arith.mulf %200, %201 : vector<8x32xf32>
    %205 = arith.addf %203, %204 : vector<8x32xf32>
    %206 = math.tanh %205 : vector<8x32xf32>
    %207 = arith.mulf %202, %206 : vector<8x32xf32>
    %208 = tpu.concatenate %32, %57, %82, %107, %132, %157, %182, %207 in 0 : vector<8x32xf32>, vector<8x32xf32>, vector<8x32xf32>, vector<8x32xf32>, vector<8x32xf32>, vector<8x32xf32>, vector<8x32xf32>, vector<8x32xf32> -> vector<64x32xf32>
    %c0_38 = arith.constant 0 : index
    %c0_39 = arith.constant 0 : index
    %209 = vector.load %arg5[%c0_38, %c0_39] : memref<32x128xf32, #tpu.memory_space<vmem>>, vector<32x128xf32>
    %c0_40 = arith.constant 0 : index
    %c0_41 = arith.constant 0 : index
    %210 = vector.load %arg6[%c0_40, %c0_41] : memref<32x128xf32, #tpu.memory_space<vmem>>, vector<32x128xf32>
    %cst_42 = arith.constant dense<0.000000e+00> : vector<64x128xf32>
    %211 = tpu.matmul %208, %209, %cst_42 {dimension_numbers = #tpu.dot_dimension_numbers<[1], [0], [0], [1], [0, 0, 1, 1], [], []>} : vector<64x32xf32>, vector<32x128xf32>, vector<64x128xf32> -> vector<64x128xf32>
    %c0_43 = arith.constant 0 : index
    %c0_44 = arith.constant 0 : index
    %212 = vector.load %arg7[%c0_43, %c0_44] : memref<1x128xf32, #tpu.memory_space<vmem>>, vector<1x128xf32>
    %213 = vector.broadcast %212 : vector<1x128xf32> to vector<64x128xf32>
    %214 = arith.addf %211, %213 : vector<64x128xf32>
    %215 = vector.extract_strided_slice %214 {offsets = [0, 0], sizes = [8, 128], strides = [1, 1]} : vector<64x128xf32> to vector<8x128xf32>
    %cst_45 = arith.constant dense<0.000000e+00> : vector<8x128xf32>
    %216 = tpu.matmul %0, %210, %cst_45 {dimension_numbers = #tpu.dot_dimension_numbers<[1], [0], [0], [1], [0, 0, 1, 1], [], []>} : vector<8x32xf32>, vector<32x128xf32>, vector<8x128xf32> -> vector<8x128xf32>
    %217 = arith.addf %215, %216 : vector<8x128xf32>
    %218 = tpu.iota {dimensions = array<i32: 1>} : vector<8x128xi32>
    %c64_i32_46 = arith.constant 64 : i32
    %219 = vector.broadcast %c64_i32_46 : i32 to vector<8x128xi32>
    %220 = arith.cmpi sge, %218, %219 : vector<8x128xi32>
    %c96_i32_47 = arith.constant 96 : i32
    %221 = vector.broadcast %c96_i32_47 : i32 to vector<8x128xi32>
    %222 = arith.cmpi slt, %218, %221 : vector<8x128xi32>
    %223 = arith.andi %220, %222 : vector<8x128xi1>
    %224 = math.tanh %217 : vector<8x128xf32>
    %225 = arith.negf %217 : vector<8x128xf32>
    %226 = math.exp %225 : vector<8x128xf32>
    %cst_48 = arith.constant 1.000000e+00 : f32
    %227 = vector.broadcast %cst_48 : f32 to vector<8x128xf32>
    %228 = arith.addf %227, %226 : vector<8x128xf32>
    %229 = arith.divf %227, %228 : vector<8x128xf32>
    %230 = arith.select %223, %224, %229 : vector<8x128xi1>, vector<8x128xf32>
    %231 = vector.extract_strided_slice %230 {offsets = [0, 0], sizes = [8, 32], strides = [1, 1]} : vector<8x128xf32> to vector<8x32xf32>
    %232 = vector.extract_strided_slice %230 {offsets = [0, 32], sizes = [8, 32], strides = [1, 1]} : vector<8x128xf32> to vector<8x32xf32>
    %233 = vector.extract_strided_slice %230 {offsets = [0, 64], sizes = [8, 32], strides = [1, 1]} : vector<8x128xf32> to vector<8x32xf32>
    %234 = vector.extract_strided_slice %230 {offsets = [0, 96], sizes = [8, 32], strides = [1, 1]} : vector<8x128xf32> to vector<8x32xf32>
    %235 = arith.mulf %231, %0 : vector<8x32xf32>
    %236 = arith.mulf %232, %233 : vector<8x32xf32>
    %237 = arith.addf %235, %236 : vector<8x32xf32>
    %238 = math.tanh %237 : vector<8x32xf32>
    %239 = arith.mulf %234, %238 : vector<8x32xf32>
    %240 = vector.extract_strided_slice %214 {offsets = [8, 0], sizes = [8, 128], strides = [1, 1]} : vector<64x128xf32> to vector<8x128xf32>
    %cst_49 = arith.constant dense<0.000000e+00> : vector<8x128xf32>
    %241 = tpu.matmul %239, %210, %cst_49 {dimension_numbers = #tpu.dot_dimension_numbers<[1], [0], [0], [1], [0, 0, 1, 1], [], []>} : vector<8x32xf32>, vector<32x128xf32>, vector<8x128xf32> -> vector<8x128xf32>
    %242 = arith.addf %240, %241 : vector<8x128xf32>
    %243 = tpu.iota {dimensions = array<i32: 1>} : vector<8x128xi32>
    %c64_i32_50 = arith.constant 64 : i32
    %244 = vector.broadcast %c64_i32_50 : i32 to vector<8x128xi32>
    %245 = arith.cmpi sge, %243, %244 : vector<8x128xi32>
    %c96_i32_51 = arith.constant 96 : i32
    %246 = vector.broadcast %c96_i32_51 : i32 to vector<8x128xi32>
    %247 = arith.cmpi slt, %243, %246 : vector<8x128xi32>
    %248 = arith.andi %245, %247 : vector<8x128xi1>
    %249 = math.tanh %242 : vector<8x128xf32>
    %250 = arith.negf %242 : vector<8x128xf32>
    %251 = math.exp %250 : vector<8x128xf32>
    %cst_52 = arith.constant 1.000000e+00 : f32
    %252 = vector.broadcast %cst_52 : f32 to vector<8x128xf32>
    %253 = arith.addf %252, %251 : vector<8x128xf32>
    %254 = arith.divf %252, %253 : vector<8x128xf32>
    %255 = arith.select %248, %249, %254 : vector<8x128xi1>, vector<8x128xf32>
    %256 = vector.extract_strided_slice %255 {offsets = [0, 0], sizes = [8, 32], strides = [1, 1]} : vector<8x128xf32> to vector<8x32xf32>
    %257 = vector.extract_strided_slice %255 {offsets = [0, 32], sizes = [8, 32], strides = [1, 1]} : vector<8x128xf32> to vector<8x32xf32>
    %258 = vector.extract_strided_slice %255 {offsets = [0, 64], sizes = [8, 32], strides = [1, 1]} : vector<8x128xf32> to vector<8x32xf32>
    %259 = vector.extract_strided_slice %255 {offsets = [0, 96], sizes = [8, 32], strides = [1, 1]} : vector<8x128xf32> to vector<8x32xf32>
    %260 = arith.mulf %256, %237 : vector<8x32xf32>
    %261 = arith.mulf %257, %258 : vector<8x32xf32>
    %262 = arith.addf %260, %261 : vector<8x32xf32>
    %263 = math.tanh %262 : vector<8x32xf32>
    %264 = arith.mulf %259, %263 : vector<8x32xf32>
    %265 = vector.extract_strided_slice %214 {offsets = [16, 0], sizes = [8, 128], strides = [1, 1]} : vector<64x128xf32> to vector<8x128xf32>
    %cst_53 = arith.constant dense<0.000000e+00> : vector<8x128xf32>
    %266 = tpu.matmul %264, %210, %cst_53 {dimension_numbers = #tpu.dot_dimension_numbers<[1], [0], [0], [1], [0, 0, 1, 1], [], []>} : vector<8x32xf32>, vector<32x128xf32>, vector<8x128xf32> -> vector<8x128xf32>
    %267 = arith.addf %265, %266 : vector<8x128xf32>
    %268 = tpu.iota {dimensions = array<i32: 1>} : vector<8x128xi32>
    %c64_i32_54 = arith.constant 64 : i32
    %269 = vector.broadcast %c64_i32_54 : i32 to vector<8x128xi32>
    %270 = arith.cmpi sge, %268, %269 : vector<8x128xi32>
    %c96_i32_55 = arith.constant 96 : i32
    %271 = vector.broadcast %c96_i32_55 : i32 to vector<8x128xi32>
    %272 = arith.cmpi slt, %268, %271 : vector<8x128xi32>
    %273 = arith.andi %270, %272 : vector<8x128xi1>
    %274 = math.tanh %267 : vector<8x128xf32>
    %275 = arith.negf %267 : vector<8x128xf32>
    %276 = math.exp %275 : vector<8x128xf32>
    %cst_56 = arith.constant 1.000000e+00 : f32
    %277 = vector.broadcast %cst_56 : f32 to vector<8x128xf32>
    %278 = arith.addf %277, %276 : vector<8x128xf32>
    %279 = arith.divf %277, %278 : vector<8x128xf32>
    %280 = arith.select %273, %274, %279 : vector<8x128xi1>, vector<8x128xf32>
    %281 = vector.extract_strided_slice %280 {offsets = [0, 0], sizes = [8, 32], strides = [1, 1]} : vector<8x128xf32> to vector<8x32xf32>
    %282 = vector.extract_strided_slice %280 {offsets = [0, 32], sizes = [8, 32], strides = [1, 1]} : vector<8x128xf32> to vector<8x32xf32>
    %283 = vector.extract_strided_slice %280 {offsets = [0, 64], sizes = [8, 32], strides = [1, 1]} : vector<8x128xf32> to vector<8x32xf32>
    %284 = vector.extract_strided_slice %280 {offsets = [0, 96], sizes = [8, 32], strides = [1, 1]} : vector<8x128xf32> to vector<8x32xf32>
    %285 = arith.mulf %281, %262 : vector<8x32xf32>
    %286 = arith.mulf %282, %283 : vector<8x32xf32>
    %287 = arith.addf %285, %286 : vector<8x32xf32>
    %288 = math.tanh %287 : vector<8x32xf32>
    %289 = arith.mulf %284, %288 : vector<8x32xf32>
    %290 = vector.extract_strided_slice %214 {offsets = [24, 0], sizes = [8, 128], strides = [1, 1]} : vector<64x128xf32> to vector<8x128xf32>
    %cst_57 = arith.constant dense<0.000000e+00> : vector<8x128xf32>
    %291 = tpu.matmul %289, %210, %cst_57 {dimension_numbers = #tpu.dot_dimension_numbers<[1], [0], [0], [1], [0, 0, 1, 1], [], []>} : vector<8x32xf32>, vector<32x128xf32>, vector<8x128xf32> -> vector<8x128xf32>
    %292 = arith.addf %290, %291 : vector<8x128xf32>
    %293 = tpu.iota {dimensions = array<i32: 1>} : vector<8x128xi32>
    %c64_i32_58 = arith.constant 64 : i32
    %294 = vector.broadcast %c64_i32_58 : i32 to vector<8x128xi32>
    %295 = arith.cmpi sge, %293, %294 : vector<8x128xi32>
    %c96_i32_59 = arith.constant 96 : i32
    %296 = vector.broadcast %c96_i32_59 : i32 to vector<8x128xi32>
    %297 = arith.cmpi slt, %293, %296 : vector<8x128xi32>
    %298 = arith.andi %295, %297 : vector<8x128xi1>
    %299 = math.tanh %292 : vector<8x128xf32>
    %300 = arith.negf %292 : vector<8x128xf32>
    %301 = math.exp %300 : vector<8x128xf32>
    %cst_60 = arith.constant 1.000000e+00 : f32
    %302 = vector.broadcast %cst_60 : f32 to vector<8x128xf32>
    %303 = arith.addf %302, %301 : vector<8x128xf32>
    %304 = arith.divf %302, %303 : vector<8x128xf32>
    %305 = arith.select %298, %299, %304 : vector<8x128xi1>, vector<8x128xf32>
    %306 = vector.extract_strided_slice %305 {offsets = [0, 0], sizes = [8, 32], strides = [1, 1]} : vector<8x128xf32> to vector<8x32xf32>
    %307 = vector.extract_strided_slice %305 {offsets = [0, 32], sizes = [8, 32], strides = [1, 1]} : vector<8x128xf32> to vector<8x32xf32>
    %308 = vector.extract_strided_slice %305 {offsets = [0, 64], sizes = [8, 32], strides = [1, 1]} : vector<8x128xf32> to vector<8x32xf32>
    %309 = vector.extract_strided_slice %305 {offsets = [0, 96], sizes = [8, 32], strides = [1, 1]} : vector<8x128xf32> to vector<8x32xf32>
    %310 = arith.mulf %306, %287 : vector<8x32xf32>
    %311 = arith.mulf %307, %308 : vector<8x32xf32>
    %312 = arith.addf %310, %311 : vector<8x32xf32>
    %313 = math.tanh %312 : vector<8x32xf32>
    %314 = arith.mulf %309, %313 : vector<8x32xf32>
    %315 = vector.extract_strided_slice %214 {offsets = [32, 0], sizes = [8, 128], strides = [1, 1]} : vector<64x128xf32> to vector<8x128xf32>
    %cst_61 = arith.constant dense<0.000000e+00> : vector<8x128xf32>
    %316 = tpu.matmul %314, %210, %cst_61 {dimension_numbers = #tpu.dot_dimension_numbers<[1], [0], [0], [1], [0, 0, 1, 1], [], []>} : vector<8x32xf32>, vector<32x128xf32>, vector<8x128xf32> -> vector<8x128xf32>
    %317 = arith.addf %315, %316 : vector<8x128xf32>
    %318 = tpu.iota {dimensions = array<i32: 1>} : vector<8x128xi32>
    %c64_i32_62 = arith.constant 64 : i32
    %319 = vector.broadcast %c64_i32_62 : i32 to vector<8x128xi32>
    %320 = arith.cmpi sge, %318, %319 : vector<8x128xi32>
    %c96_i32_63 = arith.constant 96 : i32
    %321 = vector.broadcast %c96_i32_63 : i32 to vector<8x128xi32>
    %322 = arith.cmpi slt, %318, %321 : vector<8x128xi32>
    %323 = arith.andi %320, %322 : vector<8x128xi1>
    %324 = math.tanh %317 : vector<8x128xf32>
    %325 = arith.negf %317 : vector<8x128xf32>
    %326 = math.exp %325 : vector<8x128xf32>
    %cst_64 = arith.constant 1.000000e+00 : f32
    %327 = vector.broadcast %cst_64 : f32 to vector<8x128xf32>
    %328 = arith.addf %327, %326 : vector<8x128xf32>
    %329 = arith.divf %327, %328 : vector<8x128xf32>
    %330 = arith.select %323, %324, %329 : vector<8x128xi1>, vector<8x128xf32>
    %331 = vector.extract_strided_slice %330 {offsets = [0, 0], sizes = [8, 32], strides = [1, 1]} : vector<8x128xf32> to vector<8x32xf32>
    %332 = vector.extract_strided_slice %330 {offsets = [0, 32], sizes = [8, 32], strides = [1, 1]} : vector<8x128xf32> to vector<8x32xf32>
    %333 = vector.extract_strided_slice %330 {offsets = [0, 64], sizes = [8, 32], strides = [1, 1]} : vector<8x128xf32> to vector<8x32xf32>
    %334 = vector.extract_strided_slice %330 {offsets = [0, 96], sizes = [8, 32], strides = [1, 1]} : vector<8x128xf32> to vector<8x32xf32>
    %335 = arith.mulf %331, %312 : vector<8x32xf32>
    %336 = arith.mulf %332, %333 : vector<8x32xf32>
    %337 = arith.addf %335, %336 : vector<8x32xf32>
    %338 = math.tanh %337 : vector<8x32xf32>
    %339 = arith.mulf %334, %338 : vector<8x32xf32>
    %340 = vector.extract_strided_slice %214 {offsets = [40, 0], sizes = [8, 128], strides = [1, 1]} : vector<64x128xf32> to vector<8x128xf32>
    %cst_65 = arith.constant dense<0.000000e+00> : vector<8x128xf32>
    %341 = tpu.matmul %339, %210, %cst_65 {dimension_numbers = #tpu.dot_dimension_numbers<[1], [0], [0], [1], [0, 0, 1, 1], [], []>} : vector<8x32xf32>, vector<32x128xf32>, vector<8x128xf32> -> vector<8x128xf32>
    %342 = arith.addf %340, %341 : vector<8x128xf32>
    %343 = tpu.iota {dimensions = array<i32: 1>} : vector<8x128xi32>
    %c64_i32_66 = arith.constant 64 : i32
    %344 = vector.broadcast %c64_i32_66 : i32 to vector<8x128xi32>
    %345 = arith.cmpi sge, %343, %344 : vector<8x128xi32>
    %c96_i32_67 = arith.constant 96 : i32
    %346 = vector.broadcast %c96_i32_67 : i32 to vector<8x128xi32>
    %347 = arith.cmpi slt, %343, %346 : vector<8x128xi32>
    %348 = arith.andi %345, %347 : vector<8x128xi1>
    %349 = math.tanh %342 : vector<8x128xf32>
    %350 = arith.negf %342 : vector<8x128xf32>
    %351 = math.exp %350 : vector<8x128xf32>
    %cst_68 = arith.constant 1.000000e+00 : f32
    %352 = vector.broadcast %cst_68 : f32 to vector<8x128xf32>
    %353 = arith.addf %352, %351 : vector<8x128xf32>
    %354 = arith.divf %352, %353 : vector<8x128xf32>
    %355 = arith.select %348, %349, %354 : vector<8x128xi1>, vector<8x128xf32>
    %356 = vector.extract_strided_slice %355 {offsets = [0, 0], sizes = [8, 32], strides = [1, 1]} : vector<8x128xf32> to vector<8x32xf32>
    %357 = vector.extract_strided_slice %355 {offsets = [0, 32], sizes = [8, 32], strides = [1, 1]} : vector<8x128xf32> to vector<8x32xf32>
    %358 = vector.extract_strided_slice %355 {offsets = [0, 64], sizes = [8, 32], strides = [1, 1]} : vector<8x128xf32> to vector<8x32xf32>
    %359 = vector.extract_strided_slice %355 {offsets = [0, 96], sizes = [8, 32], strides = [1, 1]} : vector<8x128xf32> to vector<8x32xf32>
    %360 = arith.mulf %356, %337 : vector<8x32xf32>
    %361 = arith.mulf %357, %358 : vector<8x32xf32>
    %362 = arith.addf %360, %361 : vector<8x32xf32>
    %363 = math.tanh %362 : vector<8x32xf32>
    %364 = arith.mulf %359, %363 : vector<8x32xf32>
    %365 = vector.extract_strided_slice %214 {offsets = [48, 0], sizes = [8, 128], strides = [1, 1]} : vector<64x128xf32> to vector<8x128xf32>
    %cst_69 = arith.constant dense<0.000000e+00> : vector<8x128xf32>
    %366 = tpu.matmul %364, %210, %cst_69 {dimension_numbers = #tpu.dot_dimension_numbers<[1], [0], [0], [1], [0, 0, 1, 1], [], []>} : vector<8x32xf32>, vector<32x128xf32>, vector<8x128xf32> -> vector<8x128xf32>
    %367 = arith.addf %365, %366 : vector<8x128xf32>
    %368 = tpu.iota {dimensions = array<i32: 1>} : vector<8x128xi32>
    %c64_i32_70 = arith.constant 64 : i32
    %369 = vector.broadcast %c64_i32_70 : i32 to vector<8x128xi32>
    %370 = arith.cmpi sge, %368, %369 : vector<8x128xi32>
    %c96_i32_71 = arith.constant 96 : i32
    %371 = vector.broadcast %c96_i32_71 : i32 to vector<8x128xi32>
    %372 = arith.cmpi slt, %368, %371 : vector<8x128xi32>
    %373 = arith.andi %370, %372 : vector<8x128xi1>
    %374 = math.tanh %367 : vector<8x128xf32>
    %375 = arith.negf %367 : vector<8x128xf32>
    %376 = math.exp %375 : vector<8x128xf32>
    %cst_72 = arith.constant 1.000000e+00 : f32
    %377 = vector.broadcast %cst_72 : f32 to vector<8x128xf32>
    %378 = arith.addf %377, %376 : vector<8x128xf32>
    %379 = arith.divf %377, %378 : vector<8x128xf32>
    %380 = arith.select %373, %374, %379 : vector<8x128xi1>, vector<8x128xf32>
    %381 = vector.extract_strided_slice %380 {offsets = [0, 0], sizes = [8, 32], strides = [1, 1]} : vector<8x128xf32> to vector<8x32xf32>
    %382 = vector.extract_strided_slice %380 {offsets = [0, 32], sizes = [8, 32], strides = [1, 1]} : vector<8x128xf32> to vector<8x32xf32>
    %383 = vector.extract_strided_slice %380 {offsets = [0, 64], sizes = [8, 32], strides = [1, 1]} : vector<8x128xf32> to vector<8x32xf32>
    %384 = vector.extract_strided_slice %380 {offsets = [0, 96], sizes = [8, 32], strides = [1, 1]} : vector<8x128xf32> to vector<8x32xf32>
    %385 = arith.mulf %381, %362 : vector<8x32xf32>
    %386 = arith.mulf %382, %383 : vector<8x32xf32>
    %387 = arith.addf %385, %386 : vector<8x32xf32>
    %388 = math.tanh %387 : vector<8x32xf32>
    %389 = arith.mulf %384, %388 : vector<8x32xf32>
    %390 = vector.extract_strided_slice %214 {offsets = [56, 0], sizes = [8, 128], strides = [1, 1]} : vector<64x128xf32> to vector<8x128xf32>
    %cst_73 = arith.constant dense<0.000000e+00> : vector<8x128xf32>
    %391 = tpu.matmul %389, %210, %cst_73 {dimension_numbers = #tpu.dot_dimension_numbers<[1], [0], [0], [1], [0, 0, 1, 1], [], []>} : vector<8x32xf32>, vector<32x128xf32>, vector<8x128xf32> -> vector<8x128xf32>
    %392 = arith.addf %390, %391 : vector<8x128xf32>
    %393 = tpu.iota {dimensions = array<i32: 1>} : vector<8x128xi32>
    %c64_i32_74 = arith.constant 64 : i32
    %394 = vector.broadcast %c64_i32_74 : i32 to vector<8x128xi32>
    %395 = arith.cmpi sge, %393, %394 : vector<8x128xi32>
    %c96_i32_75 = arith.constant 96 : i32
    %396 = vector.broadcast %c96_i32_75 : i32 to vector<8x128xi32>
    %397 = arith.cmpi slt, %393, %396 : vector<8x128xi32>
    %398 = arith.andi %395, %397 : vector<8x128xi1>
    %399 = math.tanh %392 : vector<8x128xf32>
    %400 = arith.negf %392 : vector<8x128xf32>
    %401 = math.exp %400 : vector<8x128xf32>
    %cst_76 = arith.constant 1.000000e+00 : f32
    %402 = vector.broadcast %cst_76 : f32 to vector<8x128xf32>
    %403 = arith.addf %402, %401 : vector<8x128xf32>
    %404 = arith.divf %402, %403 : vector<8x128xf32>
    %405 = arith.select %398, %399, %404 : vector<8x128xi1>, vector<8x128xf32>
    %406 = vector.extract_strided_slice %405 {offsets = [0, 0], sizes = [8, 32], strides = [1, 1]} : vector<8x128xf32> to vector<8x32xf32>
    %407 = vector.extract_strided_slice %405 {offsets = [0, 32], sizes = [8, 32], strides = [1, 1]} : vector<8x128xf32> to vector<8x32xf32>
    %408 = vector.extract_strided_slice %405 {offsets = [0, 64], sizes = [8, 32], strides = [1, 1]} : vector<8x128xf32> to vector<8x32xf32>
    %409 = vector.extract_strided_slice %405 {offsets = [0, 96], sizes = [8, 32], strides = [1, 1]} : vector<8x128xf32> to vector<8x32xf32>
    %410 = arith.mulf %406, %387 : vector<8x32xf32>
    %411 = arith.mulf %407, %408 : vector<8x32xf32>
    %412 = arith.addf %410, %411 : vector<8x32xf32>
    %413 = math.tanh %412 : vector<8x32xf32>
    %414 = arith.mulf %409, %413 : vector<8x32xf32>
    %c0_77 = arith.constant 0 : index
    %c0_78 = arith.constant 0 : index
    %415 = vector.load %arg1[%c0_77, %c0_78] : memref<64x4xf32, #tpu.memory_space<vmem>>, vector<64x4xf32>
    %c0_79 = arith.constant 0 : index
    %c0_80 = arith.constant 0 : index
    %416 = vector.load %arg8[%c0_79, %c0_80] : memref<4x128xf32, #tpu.memory_space<vmem>>, vector<4x128xf32>
    %c0_81 = arith.constant 0 : index
    %c0_82 = arith.constant 0 : index
    %417 = vector.load %arg9[%c0_81, %c0_82] : memref<32x128xf32, #tpu.memory_space<vmem>>, vector<32x128xf32>
    %cst_83 = arith.constant dense<0.000000e+00> : vector<64x128xf32>
    %418 = tpu.matmul %415, %416, %cst_83 {dimension_numbers = #tpu.dot_dimension_numbers<[1], [0], [0], [1], [0, 0, 1, 1], [], []>} : vector<64x4xf32>, vector<4x128xf32>, vector<64x128xf32> -> vector<64x128xf32>
    %c0_84 = arith.constant 0 : index
    %c0_85 = arith.constant 0 : index
    %419 = vector.load %arg10[%c0_84, %c0_85] : memref<1x128xf32, #tpu.memory_space<vmem>>, vector<1x128xf32>
    %420 = vector.broadcast %419 : vector<1x128xf32> to vector<64x128xf32>
    %421 = arith.addf %418, %420 : vector<64x128xf32>
    %422 = vector.extract_strided_slice %421 {offsets = [0, 0], sizes = [8, 128], strides = [1, 1]} : vector<64x128xf32> to vector<8x128xf32>
    %cst_86 = arith.constant dense<0.000000e+00> : vector<8x128xf32>
    %423 = tpu.matmul %207, %417, %cst_86 {dimension_numbers = #tpu.dot_dimension_numbers<[1], [0], [0], [1], [0, 0, 1, 1], [], []>} : vector<8x32xf32>, vector<32x128xf32>, vector<8x128xf32> -> vector<8x128xf32>
    %424 = arith.addf %422, %423 : vector<8x128xf32>
    %425 = tpu.iota {dimensions = array<i32: 1>} : vector<8x128xi32>
    %c64_i32_87 = arith.constant 64 : i32
    %426 = vector.broadcast %c64_i32_87 : i32 to vector<8x128xi32>
    %427 = arith.cmpi sge, %425, %426 : vector<8x128xi32>
    %c96_i32_88 = arith.constant 96 : i32
    %428 = vector.broadcast %c96_i32_88 : i32 to vector<8x128xi32>
    %429 = arith.cmpi slt, %425, %428 : vector<8x128xi32>
    %430 = arith.andi %427, %429 : vector<8x128xi1>
    %431 = math.tanh %424 : vector<8x128xf32>
    %432 = arith.negf %424 : vector<8x128xf32>
    %433 = math.exp %432 : vector<8x128xf32>
    %cst_89 = arith.constant 1.000000e+00 : f32
    %434 = vector.broadcast %cst_89 : f32 to vector<8x128xf32>
    %435 = arith.addf %434, %433 : vector<8x128xf32>
    %436 = arith.divf %434, %435 : vector<8x128xf32>
    %437 = arith.select %430, %431, %436 : vector<8x128xi1>, vector<8x128xf32>
    %438 = vector.extract_strided_slice %437 {offsets = [0, 0], sizes = [8, 32], strides = [1, 1]} : vector<8x128xf32> to vector<8x32xf32>
    %439 = vector.extract_strided_slice %437 {offsets = [0, 32], sizes = [8, 32], strides = [1, 1]} : vector<8x128xf32> to vector<8x32xf32>
    %440 = vector.extract_strided_slice %437 {offsets = [0, 64], sizes = [8, 32], strides = [1, 1]} : vector<8x128xf32> to vector<8x32xf32>
    %441 = vector.extract_strided_slice %437 {offsets = [0, 96], sizes = [8, 32], strides = [1, 1]} : vector<8x128xf32> to vector<8x32xf32>
    %442 = arith.mulf %438, %205 : vector<8x32xf32>
    %443 = arith.mulf %439, %440 : vector<8x32xf32>
    %444 = arith.addf %442, %443 : vector<8x32xf32>
    %445 = math.tanh %444 : vector<8x32xf32>
    %446 = arith.mulf %441, %445 : vector<8x32xf32>
    %447 = vector.extract_strided_slice %421 {offsets = [8, 0], sizes = [8, 128], strides = [1, 1]} : vector<64x128xf32> to vector<8x128xf32>
    %cst_90 = arith.constant dense<0.000000e+00> : vector<8x128xf32>
    %448 = tpu.matmul %446, %417, %cst_90 {dimension_numbers = #tpu.dot_dimension_numbers<[1], [0], [0], [1], [0, 0, 1, 1], [], []>} : vector<8x32xf32>, vector<32x128xf32>, vector<8x128xf32> -> vector<8x128xf32>
    %449 = arith.addf %447, %448 : vector<8x128xf32>
    %450 = tpu.iota {dimensions = array<i32: 1>} : vector<8x128xi32>
    %c64_i32_91 = arith.constant 64 : i32
    %451 = vector.broadcast %c64_i32_91 : i32 to vector<8x128xi32>
    %452 = arith.cmpi sge, %450, %451 : vector<8x128xi32>
    %c96_i32_92 = arith.constant 96 : i32
    %453 = vector.broadcast %c96_i32_92 : i32 to vector<8x128xi32>
    %454 = arith.cmpi slt, %450, %453 : vector<8x128xi32>
    %455 = arith.andi %452, %454 : vector<8x128xi1>
    %456 = math.tanh %449 : vector<8x128xf32>
    %457 = arith.negf %449 : vector<8x128xf32>
    %458 = math.exp %457 : vector<8x128xf32>
    %cst_93 = arith.constant 1.000000e+00 : f32
    %459 = vector.broadcast %cst_93 : f32 to vector<8x128xf32>
    %460 = arith.addf %459, %458 : vector<8x128xf32>
    %461 = arith.divf %459, %460 : vector<8x128xf32>
    %462 = arith.select %455, %456, %461 : vector<8x128xi1>, vector<8x128xf32>
    %463 = vector.extract_strided_slice %462 {offsets = [0, 0], sizes = [8, 32], strides = [1, 1]} : vector<8x128xf32> to vector<8x32xf32>
    %464 = vector.extract_strided_slice %462 {offsets = [0, 32], sizes = [8, 32], strides = [1, 1]} : vector<8x128xf32> to vector<8x32xf32>
    %465 = vector.extract_strided_slice %462 {offsets = [0, 64], sizes = [8, 32], strides = [1, 1]} : vector<8x128xf32> to vector<8x32xf32>
    %466 = vector.extract_strided_slice %462 {offsets = [0, 96], sizes = [8, 32], strides = [1, 1]} : vector<8x128xf32> to vector<8x32xf32>
    %467 = arith.mulf %463, %444 : vector<8x32xf32>
    %468 = arith.mulf %464, %465 : vector<8x32xf32>
    %469 = arith.addf %467, %468 : vector<8x32xf32>
    %470 = math.tanh %469 : vector<8x32xf32>
    %471 = arith.mulf %466, %470 : vector<8x32xf32>
    %472 = vector.extract_strided_slice %421 {offsets = [16, 0], sizes = [8, 128], strides = [1, 1]} : vector<64x128xf32> to vector<8x128xf32>
    %cst_94 = arith.constant dense<0.000000e+00> : vector<8x128xf32>
    %473 = tpu.matmul %471, %417, %cst_94 {dimension_numbers = #tpu.dot_dimension_numbers<[1], [0], [0], [1], [0, 0, 1, 1], [], []>} : vector<8x32xf32>, vector<32x128xf32>, vector<8x128xf32> -> vector<8x128xf32>
    %474 = arith.addf %472, %473 : vector<8x128xf32>
    %475 = tpu.iota {dimensions = array<i32: 1>} : vector<8x128xi32>
    %c64_i32_95 = arith.constant 64 : i32
    %476 = vector.broadcast %c64_i32_95 : i32 to vector<8x128xi32>
    %477 = arith.cmpi sge, %475, %476 : vector<8x128xi32>
    %c96_i32_96 = arith.constant 96 : i32
    %478 = vector.broadcast %c96_i32_96 : i32 to vector<8x128xi32>
    %479 = arith.cmpi slt, %475, %478 : vector<8x128xi32>
    %480 = arith.andi %477, %479 : vector<8x128xi1>
    %481 = math.tanh %474 : vector<8x128xf32>
    %482 = arith.negf %474 : vector<8x128xf32>
    %483 = math.exp %482 : vector<8x128xf32>
    %cst_97 = arith.constant 1.000000e+00 : f32
    %484 = vector.broadcast %cst_97 : f32 to vector<8x128xf32>
    %485 = arith.addf %484, %483 : vector<8x128xf32>
    %486 = arith.divf %484, %485 : vector<8x128xf32>
    %487 = arith.select %480, %481, %486 : vector<8x128xi1>, vector<8x128xf32>
    %488 = vector.extract_strided_slice %487 {offsets = [0, 0], sizes = [8, 32], strides = [1, 1]} : vector<8x128xf32> to vector<8x32xf32>
    %489 = vector.extract_strided_slice %487 {offsets = [0, 32], sizes = [8, 32], strides = [1, 1]} : vector<8x128xf32> to vector<8x32xf32>
    %490 = vector.extract_strided_slice %487 {offsets = [0, 64], sizes = [8, 32], strides = [1, 1]} : vector<8x128xf32> to vector<8x32xf32>
    %491 = vector.extract_strided_slice %487 {offsets = [0, 96], sizes = [8, 32], strides = [1, 1]} : vector<8x128xf32> to vector<8x32xf32>
    %492 = arith.mulf %488, %469 : vector<8x32xf32>
    %493 = arith.mulf %489, %490 : vector<8x32xf32>
    %494 = arith.addf %492, %493 : vector<8x32xf32>
    %495 = math.tanh %494 : vector<8x32xf32>
    %496 = arith.mulf %491, %495 : vector<8x32xf32>
    %497 = vector.extract_strided_slice %421 {offsets = [24, 0], sizes = [8, 128], strides = [1, 1]} : vector<64x128xf32> to vector<8x128xf32>
    %cst_98 = arith.constant dense<0.000000e+00> : vector<8x128xf32>
    %498 = tpu.matmul %496, %417, %cst_98 {dimension_numbers = #tpu.dot_dimension_numbers<[1], [0], [0], [1], [0, 0, 1, 1], [], []>} : vector<8x32xf32>, vector<32x128xf32>, vector<8x128xf32> -> vector<8x128xf32>
    %499 = arith.addf %497, %498 : vector<8x128xf32>
    %500 = tpu.iota {dimensions = array<i32: 1>} : vector<8x128xi32>
    %c64_i32_99 = arith.constant 64 : i32
    %501 = vector.broadcast %c64_i32_99 : i32 to vector<8x128xi32>
    %502 = arith.cmpi sge, %500, %501 : vector<8x128xi32>
    %c96_i32_100 = arith.constant 96 : i32
    %503 = vector.broadcast %c96_i32_100 : i32 to vector<8x128xi32>
    %504 = arith.cmpi slt, %500, %503 : vector<8x128xi32>
    %505 = arith.andi %502, %504 : vector<8x128xi1>
    %506 = math.tanh %499 : vector<8x128xf32>
    %507 = arith.negf %499 : vector<8x128xf32>
    %508 = math.exp %507 : vector<8x128xf32>
    %cst_101 = arith.constant 1.000000e+00 : f32
    %509 = vector.broadcast %cst_101 : f32 to vector<8x128xf32>
    %510 = arith.addf %509, %508 : vector<8x128xf32>
    %511 = arith.divf %509, %510 : vector<8x128xf32>
    %512 = arith.select %505, %506, %511 : vector<8x128xi1>, vector<8x128xf32>
    %513 = vector.extract_strided_slice %512 {offsets = [0, 0], sizes = [8, 32], strides = [1, 1]} : vector<8x128xf32> to vector<8x32xf32>
    %514 = vector.extract_strided_slice %512 {offsets = [0, 32], sizes = [8, 32], strides = [1, 1]} : vector<8x128xf32> to vector<8x32xf32>
    %515 = vector.extract_strided_slice %512 {offsets = [0, 64], sizes = [8, 32], strides = [1, 1]} : vector<8x128xf32> to vector<8x32xf32>
    %516 = vector.extract_strided_slice %512 {offsets = [0, 96], sizes = [8, 32], strides = [1, 1]} : vector<8x128xf32> to vector<8x32xf32>
    %517 = arith.mulf %513, %494 : vector<8x32xf32>
    %518 = arith.mulf %514, %515 : vector<8x32xf32>
    %519 = arith.addf %517, %518 : vector<8x32xf32>
    %520 = math.tanh %519 : vector<8x32xf32>
    %521 = arith.mulf %516, %520 : vector<8x32xf32>
    %522 = vector.extract_strided_slice %421 {offsets = [32, 0], sizes = [8, 128], strides = [1, 1]} : vector<64x128xf32> to vector<8x128xf32>
    %cst_102 = arith.constant dense<0.000000e+00> : vector<8x128xf32>
    %523 = tpu.matmul %521, %417, %cst_102 {dimension_numbers = #tpu.dot_dimension_numbers<[1], [0], [0], [1], [0, 0, 1, 1], [], []>} : vector<8x32xf32>, vector<32x128xf32>, vector<8x128xf32> -> vector<8x128xf32>
    %524 = arith.addf %522, %523 : vector<8x128xf32>
    %525 = tpu.iota {dimensions = array<i32: 1>} : vector<8x128xi32>
    %c64_i32_103 = arith.constant 64 : i32
    %526 = vector.broadcast %c64_i32_103 : i32 to vector<8x128xi32>
    %527 = arith.cmpi sge, %525, %526 : vector<8x128xi32>
    %c96_i32_104 = arith.constant 96 : i32
    %528 = vector.broadcast %c96_i32_104 : i32 to vector<8x128xi32>
    %529 = arith.cmpi slt, %525, %528 : vector<8x128xi32>
    %530 = arith.andi %527, %529 : vector<8x128xi1>
    %531 = math.tanh %524 : vector<8x128xf32>
    %532 = arith.negf %524 : vector<8x128xf32>
    %533 = math.exp %532 : vector<8x128xf32>
    %cst_105 = arith.constant 1.000000e+00 : f32
    %534 = vector.broadcast %cst_105 : f32 to vector<8x128xf32>
    %535 = arith.addf %534, %533 : vector<8x128xf32>
    %536 = arith.divf %534, %535 : vector<8x128xf32>
    %537 = arith.select %530, %531, %536 : vector<8x128xi1>, vector<8x128xf32>
    %538 = vector.extract_strided_slice %537 {offsets = [0, 0], sizes = [8, 32], strides = [1, 1]} : vector<8x128xf32> to vector<8x32xf32>
    %539 = vector.extract_strided_slice %537 {offsets = [0, 32], sizes = [8, 32], strides = [1, 1]} : vector<8x128xf32> to vector<8x32xf32>
    %540 = vector.extract_strided_slice %537 {offsets = [0, 64], sizes = [8, 32], strides = [1, 1]} : vector<8x128xf32> to vector<8x32xf32>
    %541 = vector.extract_strided_slice %537 {offsets = [0, 96], sizes = [8, 32], strides = [1, 1]} : vector<8x128xf32> to vector<8x32xf32>
    %542 = arith.mulf %538, %519 : vector<8x32xf32>
    %543 = arith.mulf %539, %540 : vector<8x32xf32>
    %544 = arith.addf %542, %543 : vector<8x32xf32>
    %545 = math.tanh %544 : vector<8x32xf32>
    %546 = arith.mulf %541, %545 : vector<8x32xf32>
    %547 = vector.extract_strided_slice %421 {offsets = [40, 0], sizes = [8, 128], strides = [1, 1]} : vector<64x128xf32> to vector<8x128xf32>
    %cst_106 = arith.constant dense<0.000000e+00> : vector<8x128xf32>
    %548 = tpu.matmul %546, %417, %cst_106 {dimension_numbers = #tpu.dot_dimension_numbers<[1], [0], [0], [1], [0, 0, 1, 1], [], []>} : vector<8x32xf32>, vector<32x128xf32>, vector<8x128xf32> -> vector<8x128xf32>
    %549 = arith.addf %547, %548 : vector<8x128xf32>
    %550 = tpu.iota {dimensions = array<i32: 1>} : vector<8x128xi32>
    %c64_i32_107 = arith.constant 64 : i32
    %551 = vector.broadcast %c64_i32_107 : i32 to vector<8x128xi32>
    %552 = arith.cmpi sge, %550, %551 : vector<8x128xi32>
    %c96_i32_108 = arith.constant 96 : i32
    %553 = vector.broadcast %c96_i32_108 : i32 to vector<8x128xi32>
    %554 = arith.cmpi slt, %550, %553 : vector<8x128xi32>
    %555 = arith.andi %552, %554 : vector<8x128xi1>
    %556 = math.tanh %549 : vector<8x128xf32>
    %557 = arith.negf %549 : vector<8x128xf32>
    %558 = math.exp %557 : vector<8x128xf32>
    %cst_109 = arith.constant 1.000000e+00 : f32
    %559 = vector.broadcast %cst_109 : f32 to vector<8x128xf32>
    %560 = arith.addf %559, %558 : vector<8x128xf32>
    %561 = arith.divf %559, %560 : vector<8x128xf32>
    %562 = arith.select %555, %556, %561 : vector<8x128xi1>, vector<8x128xf32>
    %563 = vector.extract_strided_slice %562 {offsets = [0, 0], sizes = [8, 32], strides = [1, 1]} : vector<8x128xf32> to vector<8x32xf32>
    %564 = vector.extract_strided_slice %562 {offsets = [0, 32], sizes = [8, 32], strides = [1, 1]} : vector<8x128xf32> to vector<8x32xf32>
    %565 = vector.extract_strided_slice %562 {offsets = [0, 64], sizes = [8, 32], strides = [1, 1]} : vector<8x128xf32> to vector<8x32xf32>
    %566 = vector.extract_strided_slice %562 {offsets = [0, 96], sizes = [8, 32], strides = [1, 1]} : vector<8x128xf32> to vector<8x32xf32>
    %567 = arith.mulf %563, %544 : vector<8x32xf32>
    %568 = arith.mulf %564, %565 : vector<8x32xf32>
    %569 = arith.addf %567, %568 : vector<8x32xf32>
    %570 = math.tanh %569 : vector<8x32xf32>
    %571 = arith.mulf %566, %570 : vector<8x32xf32>
    %572 = vector.extract_strided_slice %421 {offsets = [48, 0], sizes = [8, 128], strides = [1, 1]} : vector<64x128xf32> to vector<8x128xf32>
    %cst_110 = arith.constant dense<0.000000e+00> : vector<8x128xf32>
    %573 = tpu.matmul %571, %417, %cst_110 {dimension_numbers = #tpu.dot_dimension_numbers<[1], [0], [0], [1], [0, 0, 1, 1], [], []>} : vector<8x32xf32>, vector<32x128xf32>, vector<8x128xf32> -> vector<8x128xf32>
    %574 = arith.addf %572, %573 : vector<8x128xf32>
    %575 = tpu.iota {dimensions = array<i32: 1>} : vector<8x128xi32>
    %c64_i32_111 = arith.constant 64 : i32
    %576 = vector.broadcast %c64_i32_111 : i32 to vector<8x128xi32>
    %577 = arith.cmpi sge, %575, %576 : vector<8x128xi32>
    %c96_i32_112 = arith.constant 96 : i32
    %578 = vector.broadcast %c96_i32_112 : i32 to vector<8x128xi32>
    %579 = arith.cmpi slt, %575, %578 : vector<8x128xi32>
    %580 = arith.andi %577, %579 : vector<8x128xi1>
    %581 = math.tanh %574 : vector<8x128xf32>
    %582 = arith.negf %574 : vector<8x128xf32>
    %583 = math.exp %582 : vector<8x128xf32>
    %cst_113 = arith.constant 1.000000e+00 : f32
    %584 = vector.broadcast %cst_113 : f32 to vector<8x128xf32>
    %585 = arith.addf %584, %583 : vector<8x128xf32>
    %586 = arith.divf %584, %585 : vector<8x128xf32>
    %587 = arith.select %580, %581, %586 : vector<8x128xi1>, vector<8x128xf32>
    %588 = vector.extract_strided_slice %587 {offsets = [0, 0], sizes = [8, 32], strides = [1, 1]} : vector<8x128xf32> to vector<8x32xf32>
    %589 = vector.extract_strided_slice %587 {offsets = [0, 32], sizes = [8, 32], strides = [1, 1]} : vector<8x128xf32> to vector<8x32xf32>
    %590 = vector.extract_strided_slice %587 {offsets = [0, 64], sizes = [8, 32], strides = [1, 1]} : vector<8x128xf32> to vector<8x32xf32>
    %591 = vector.extract_strided_slice %587 {offsets = [0, 96], sizes = [8, 32], strides = [1, 1]} : vector<8x128xf32> to vector<8x32xf32>
    %592 = arith.mulf %588, %569 : vector<8x32xf32>
    %593 = arith.mulf %589, %590 : vector<8x32xf32>
    %594 = arith.addf %592, %593 : vector<8x32xf32>
    %595 = math.tanh %594 : vector<8x32xf32>
    %596 = arith.mulf %591, %595 : vector<8x32xf32>
    %597 = vector.extract_strided_slice %421 {offsets = [56, 0], sizes = [8, 128], strides = [1, 1]} : vector<64x128xf32> to vector<8x128xf32>
    %cst_114 = arith.constant dense<0.000000e+00> : vector<8x128xf32>
    %598 = tpu.matmul %596, %417, %cst_114 {dimension_numbers = #tpu.dot_dimension_numbers<[1], [0], [0], [1], [0, 0, 1, 1], [], []>} : vector<8x32xf32>, vector<32x128xf32>, vector<8x128xf32> -> vector<8x128xf32>
    %599 = arith.addf %597, %598 : vector<8x128xf32>
    %600 = tpu.iota {dimensions = array<i32: 1>} : vector<8x128xi32>
    %c64_i32_115 = arith.constant 64 : i32
    %601 = vector.broadcast %c64_i32_115 : i32 to vector<8x128xi32>
    %602 = arith.cmpi sge, %600, %601 : vector<8x128xi32>
    %c96_i32_116 = arith.constant 96 : i32
    %603 = vector.broadcast %c96_i32_116 : i32 to vector<8x128xi32>
    %604 = arith.cmpi slt, %600, %603 : vector<8x128xi32>
    %605 = arith.andi %602, %604 : vector<8x128xi1>
    %606 = math.tanh %599 : vector<8x128xf32>
    %607 = arith.negf %599 : vector<8x128xf32>
    %608 = math.exp %607 : vector<8x128xf32>
    %cst_117 = arith.constant 1.000000e+00 : f32
    %609 = vector.broadcast %cst_117 : f32 to vector<8x128xf32>
    %610 = arith.addf %609, %608 : vector<8x128xf32>
    %611 = arith.divf %609, %610 : vector<8x128xf32>
    %612 = arith.select %605, %606, %611 : vector<8x128xi1>, vector<8x128xf32>
    %613 = vector.extract_strided_slice %612 {offsets = [0, 0], sizes = [8, 32], strides = [1, 1]} : vector<8x128xf32> to vector<8x32xf32>
    %614 = vector.extract_strided_slice %612 {offsets = [0, 32], sizes = [8, 32], strides = [1, 1]} : vector<8x128xf32> to vector<8x32xf32>
    %615 = vector.extract_strided_slice %612 {offsets = [0, 64], sizes = [8, 32], strides = [1, 1]} : vector<8x128xf32> to vector<8x32xf32>
    %616 = vector.extract_strided_slice %612 {offsets = [0, 96], sizes = [8, 32], strides = [1, 1]} : vector<8x128xf32> to vector<8x32xf32>
    %617 = arith.mulf %613, %594 : vector<8x32xf32>
    %618 = arith.mulf %614, %615 : vector<8x32xf32>
    %619 = arith.addf %617, %618 : vector<8x32xf32>
    %620 = math.tanh %619 : vector<8x32xf32>
    %621 = arith.mulf %616, %620 : vector<8x32xf32>
    %622 = tpu.concatenate %446, %471, %496, %521, %546, %571, %596, %621 in 0 : vector<8x32xf32>, vector<8x32xf32>, vector<8x32xf32>, vector<8x32xf32>, vector<8x32xf32>, vector<8x32xf32>, vector<8x32xf32>, vector<8x32xf32> -> vector<64x32xf32>
    %c0_118 = arith.constant 0 : index
    %c0_119 = arith.constant 0 : index
    %623 = vector.load %arg11[%c0_118, %c0_119] : memref<32x128xf32, #tpu.memory_space<vmem>>, vector<32x128xf32>
    %c0_120 = arith.constant 0 : index
    %c0_121 = arith.constant 0 : index
    %624 = vector.load %arg12[%c0_120, %c0_121] : memref<32x128xf32, #tpu.memory_space<vmem>>, vector<32x128xf32>
    %cst_122 = arith.constant dense<0.000000e+00> : vector<64x128xf32>
    %625 = tpu.matmul %622, %623, %cst_122 {dimension_numbers = #tpu.dot_dimension_numbers<[1], [0], [0], [1], [0, 0, 1, 1], [], []>} : vector<64x32xf32>, vector<32x128xf32>, vector<64x128xf32> -> vector<64x128xf32>
    %c0_123 = arith.constant 0 : index
    %c0_124 = arith.constant 0 : index
    %626 = vector.load %arg13[%c0_123, %c0_124] : memref<1x128xf32, #tpu.memory_space<vmem>>, vector<1x128xf32>
    %627 = vector.broadcast %626 : vector<1x128xf32> to vector<64x128xf32>
    %628 = arith.addf %625, %627 : vector<64x128xf32>
    %629 = vector.extract_strided_slice %628 {offsets = [0, 0], sizes = [8, 128], strides = [1, 1]} : vector<64x128xf32> to vector<8x128xf32>
    %cst_125 = arith.constant dense<0.000000e+00> : vector<8x128xf32>
    %630 = tpu.matmul %414, %624, %cst_125 {dimension_numbers = #tpu.dot_dimension_numbers<[1], [0], [0], [1], [0, 0, 1, 1], [], []>} : vector<8x32xf32>, vector<32x128xf32>, vector<8x128xf32> -> vector<8x128xf32>
    %631 = arith.addf %629, %630 : vector<8x128xf32>
    %632 = tpu.iota {dimensions = array<i32: 1>} : vector<8x128xi32>
    %c64_i32_126 = arith.constant 64 : i32
    %633 = vector.broadcast %c64_i32_126 : i32 to vector<8x128xi32>
    %634 = arith.cmpi sge, %632, %633 : vector<8x128xi32>
    %c96_i32_127 = arith.constant 96 : i32
    %635 = vector.broadcast %c96_i32_127 : i32 to vector<8x128xi32>
    %636 = arith.cmpi slt, %632, %635 : vector<8x128xi32>
    %637 = arith.andi %634, %636 : vector<8x128xi1>
    %638 = math.tanh %631 : vector<8x128xf32>
    %639 = arith.negf %631 : vector<8x128xf32>
    %640 = math.exp %639 : vector<8x128xf32>
    %cst_128 = arith.constant 1.000000e+00 : f32
    %641 = vector.broadcast %cst_128 : f32 to vector<8x128xf32>
    %642 = arith.addf %641, %640 : vector<8x128xf32>
    %643 = arith.divf %641, %642 : vector<8x128xf32>
    %644 = arith.select %637, %638, %643 : vector<8x128xi1>, vector<8x128xf32>
    %645 = vector.extract_strided_slice %644 {offsets = [0, 0], sizes = [8, 32], strides = [1, 1]} : vector<8x128xf32> to vector<8x32xf32>
    %646 = vector.extract_strided_slice %644 {offsets = [0, 32], sizes = [8, 32], strides = [1, 1]} : vector<8x128xf32> to vector<8x32xf32>
    %647 = vector.extract_strided_slice %644 {offsets = [0, 64], sizes = [8, 32], strides = [1, 1]} : vector<8x128xf32> to vector<8x32xf32>
    %648 = vector.extract_strided_slice %644 {offsets = [0, 96], sizes = [8, 32], strides = [1, 1]} : vector<8x128xf32> to vector<8x32xf32>
    %649 = arith.mulf %645, %412 : vector<8x32xf32>
    %650 = arith.mulf %646, %647 : vector<8x32xf32>
    %651 = arith.addf %649, %650 : vector<8x32xf32>
    %652 = math.tanh %651 : vector<8x32xf32>
    %653 = arith.mulf %648, %652 : vector<8x32xf32>
    %654 = vector.extract_strided_slice %628 {offsets = [8, 0], sizes = [8, 128], strides = [1, 1]} : vector<64x128xf32> to vector<8x128xf32>
    %cst_129 = arith.constant dense<0.000000e+00> : vector<8x128xf32>
    %655 = tpu.matmul %653, %624, %cst_129 {dimension_numbers = #tpu.dot_dimension_numbers<[1], [0], [0], [1], [0, 0, 1, 1], [], []>} : vector<8x32xf32>, vector<32x128xf32>, vector<8x128xf32> -> vector<8x128xf32>
    %656 = arith.addf %654, %655 : vector<8x128xf32>
    %657 = tpu.iota {dimensions = array<i32: 1>} : vector<8x128xi32>
    %c64_i32_130 = arith.constant 64 : i32
    %658 = vector.broadcast %c64_i32_130 : i32 to vector<8x128xi32>
    %659 = arith.cmpi sge, %657, %658 : vector<8x128xi32>
    %c96_i32_131 = arith.constant 96 : i32
    %660 = vector.broadcast %c96_i32_131 : i32 to vector<8x128xi32>
    %661 = arith.cmpi slt, %657, %660 : vector<8x128xi32>
    %662 = arith.andi %659, %661 : vector<8x128xi1>
    %663 = math.tanh %656 : vector<8x128xf32>
    %664 = arith.negf %656 : vector<8x128xf32>
    %665 = math.exp %664 : vector<8x128xf32>
    %cst_132 = arith.constant 1.000000e+00 : f32
    %666 = vector.broadcast %cst_132 : f32 to vector<8x128xf32>
    %667 = arith.addf %666, %665 : vector<8x128xf32>
    %668 = arith.divf %666, %667 : vector<8x128xf32>
    %669 = arith.select %662, %663, %668 : vector<8x128xi1>, vector<8x128xf32>
    %670 = vector.extract_strided_slice %669 {offsets = [0, 0], sizes = [8, 32], strides = [1, 1]} : vector<8x128xf32> to vector<8x32xf32>
    %671 = vector.extract_strided_slice %669 {offsets = [0, 32], sizes = [8, 32], strides = [1, 1]} : vector<8x128xf32> to vector<8x32xf32>
    %672 = vector.extract_strided_slice %669 {offsets = [0, 64], sizes = [8, 32], strides = [1, 1]} : vector<8x128xf32> to vector<8x32xf32>
    %673 = vector.extract_strided_slice %669 {offsets = [0, 96], sizes = [8, 32], strides = [1, 1]} : vector<8x128xf32> to vector<8x32xf32>
    %674 = arith.mulf %670, %651 : vector<8x32xf32>
    %675 = arith.mulf %671, %672 : vector<8x32xf32>
    %676 = arith.addf %674, %675 : vector<8x32xf32>
    %677 = math.tanh %676 : vector<8x32xf32>
    %678 = arith.mulf %673, %677 : vector<8x32xf32>
    %679 = vector.extract_strided_slice %628 {offsets = [16, 0], sizes = [8, 128], strides = [1, 1]} : vector<64x128xf32> to vector<8x128xf32>
    %cst_133 = arith.constant dense<0.000000e+00> : vector<8x128xf32>
    %680 = tpu.matmul %678, %624, %cst_133 {dimension_numbers = #tpu.dot_dimension_numbers<[1], [0], [0], [1], [0, 0, 1, 1], [], []>} : vector<8x32xf32>, vector<32x128xf32>, vector<8x128xf32> -> vector<8x128xf32>
    %681 = arith.addf %679, %680 : vector<8x128xf32>
    %682 = tpu.iota {dimensions = array<i32: 1>} : vector<8x128xi32>
    %c64_i32_134 = arith.constant 64 : i32
    %683 = vector.broadcast %c64_i32_134 : i32 to vector<8x128xi32>
    %684 = arith.cmpi sge, %682, %683 : vector<8x128xi32>
    %c96_i32_135 = arith.constant 96 : i32
    %685 = vector.broadcast %c96_i32_135 : i32 to vector<8x128xi32>
    %686 = arith.cmpi slt, %682, %685 : vector<8x128xi32>
    %687 = arith.andi %684, %686 : vector<8x128xi1>
    %688 = math.tanh %681 : vector<8x128xf32>
    %689 = arith.negf %681 : vector<8x128xf32>
    %690 = math.exp %689 : vector<8x128xf32>
    %cst_136 = arith.constant 1.000000e+00 : f32
    %691 = vector.broadcast %cst_136 : f32 to vector<8x128xf32>
    %692 = arith.addf %691, %690 : vector<8x128xf32>
    %693 = arith.divf %691, %692 : vector<8x128xf32>
    %694 = arith.select %687, %688, %693 : vector<8x128xi1>, vector<8x128xf32>
    %695 = vector.extract_strided_slice %694 {offsets = [0, 0], sizes = [8, 32], strides = [1, 1]} : vector<8x128xf32> to vector<8x32xf32>
    %696 = vector.extract_strided_slice %694 {offsets = [0, 32], sizes = [8, 32], strides = [1, 1]} : vector<8x128xf32> to vector<8x32xf32>
    %697 = vector.extract_strided_slice %694 {offsets = [0, 64], sizes = [8, 32], strides = [1, 1]} : vector<8x128xf32> to vector<8x32xf32>
    %698 = vector.extract_strided_slice %694 {offsets = [0, 96], sizes = [8, 32], strides = [1, 1]} : vector<8x128xf32> to vector<8x32xf32>
    %699 = arith.mulf %695, %676 : vector<8x32xf32>
    %700 = arith.mulf %696, %697 : vector<8x32xf32>
    %701 = arith.addf %699, %700 : vector<8x32xf32>
    %702 = math.tanh %701 : vector<8x32xf32>
    %703 = arith.mulf %698, %702 : vector<8x32xf32>
    %704 = vector.extract_strided_slice %628 {offsets = [24, 0], sizes = [8, 128], strides = [1, 1]} : vector<64x128xf32> to vector<8x128xf32>
    %cst_137 = arith.constant dense<0.000000e+00> : vector<8x128xf32>
    %705 = tpu.matmul %703, %624, %cst_137 {dimension_numbers = #tpu.dot_dimension_numbers<[1], [0], [0], [1], [0, 0, 1, 1], [], []>} : vector<8x32xf32>, vector<32x128xf32>, vector<8x128xf32> -> vector<8x128xf32>
    %706 = arith.addf %704, %705 : vector<8x128xf32>
    %707 = tpu.iota {dimensions = array<i32: 1>} : vector<8x128xi32>
    %c64_i32_138 = arith.constant 64 : i32
    %708 = vector.broadcast %c64_i32_138 : i32 to vector<8x128xi32>
    %709 = arith.cmpi sge, %707, %708 : vector<8x128xi32>
    %c96_i32_139 = arith.constant 96 : i32
    %710 = vector.broadcast %c96_i32_139 : i32 to vector<8x128xi32>
    %711 = arith.cmpi slt, %707, %710 : vector<8x128xi32>
    %712 = arith.andi %709, %711 : vector<8x128xi1>
    %713 = math.tanh %706 : vector<8x128xf32>
    %714 = arith.negf %706 : vector<8x128xf32>
    %715 = math.exp %714 : vector<8x128xf32>
    %cst_140 = arith.constant 1.000000e+00 : f32
    %716 = vector.broadcast %cst_140 : f32 to vector<8x128xf32>
    %717 = arith.addf %716, %715 : vector<8x128xf32>
    %718 = arith.divf %716, %717 : vector<8x128xf32>
    %719 = arith.select %712, %713, %718 : vector<8x128xi1>, vector<8x128xf32>
    %720 = vector.extract_strided_slice %719 {offsets = [0, 0], sizes = [8, 32], strides = [1, 1]} : vector<8x128xf32> to vector<8x32xf32>
    %721 = vector.extract_strided_slice %719 {offsets = [0, 32], sizes = [8, 32], strides = [1, 1]} : vector<8x128xf32> to vector<8x32xf32>
    %722 = vector.extract_strided_slice %719 {offsets = [0, 64], sizes = [8, 32], strides = [1, 1]} : vector<8x128xf32> to vector<8x32xf32>
    %723 = vector.extract_strided_slice %719 {offsets = [0, 96], sizes = [8, 32], strides = [1, 1]} : vector<8x128xf32> to vector<8x32xf32>
    %724 = arith.mulf %720, %701 : vector<8x32xf32>
    %725 = arith.mulf %721, %722 : vector<8x32xf32>
    %726 = arith.addf %724, %725 : vector<8x32xf32>
    %727 = math.tanh %726 : vector<8x32xf32>
    %728 = arith.mulf %723, %727 : vector<8x32xf32>
    %729 = vector.extract_strided_slice %628 {offsets = [32, 0], sizes = [8, 128], strides = [1, 1]} : vector<64x128xf32> to vector<8x128xf32>
    %cst_141 = arith.constant dense<0.000000e+00> : vector<8x128xf32>
    %730 = tpu.matmul %728, %624, %cst_141 {dimension_numbers = #tpu.dot_dimension_numbers<[1], [0], [0], [1], [0, 0, 1, 1], [], []>} : vector<8x32xf32>, vector<32x128xf32>, vector<8x128xf32> -> vector<8x128xf32>
    %731 = arith.addf %729, %730 : vector<8x128xf32>
    %732 = tpu.iota {dimensions = array<i32: 1>} : vector<8x128xi32>
    %c64_i32_142 = arith.constant 64 : i32
    %733 = vector.broadcast %c64_i32_142 : i32 to vector<8x128xi32>
    %734 = arith.cmpi sge, %732, %733 : vector<8x128xi32>
    %c96_i32_143 = arith.constant 96 : i32
    %735 = vector.broadcast %c96_i32_143 : i32 to vector<8x128xi32>
    %736 = arith.cmpi slt, %732, %735 : vector<8x128xi32>
    %737 = arith.andi %734, %736 : vector<8x128xi1>
    %738 = math.tanh %731 : vector<8x128xf32>
    %739 = arith.negf %731 : vector<8x128xf32>
    %740 = math.exp %739 : vector<8x128xf32>
    %cst_144 = arith.constant 1.000000e+00 : f32
    %741 = vector.broadcast %cst_144 : f32 to vector<8x128xf32>
    %742 = arith.addf %741, %740 : vector<8x128xf32>
    %743 = arith.divf %741, %742 : vector<8x128xf32>
    %744 = arith.select %737, %738, %743 : vector<8x128xi1>, vector<8x128xf32>
    %745 = vector.extract_strided_slice %744 {offsets = [0, 0], sizes = [8, 32], strides = [1, 1]} : vector<8x128xf32> to vector<8x32xf32>
    %746 = vector.extract_strided_slice %744 {offsets = [0, 32], sizes = [8, 32], strides = [1, 1]} : vector<8x128xf32> to vector<8x32xf32>
    %747 = vector.extract_strided_slice %744 {offsets = [0, 64], sizes = [8, 32], strides = [1, 1]} : vector<8x128xf32> to vector<8x32xf32>
    %748 = vector.extract_strided_slice %744 {offsets = [0, 96], sizes = [8, 32], strides = [1, 1]} : vector<8x128xf32> to vector<8x32xf32>
    %749 = arith.mulf %745, %726 : vector<8x32xf32>
    %750 = arith.mulf %746, %747 : vector<8x32xf32>
    %751 = arith.addf %749, %750 : vector<8x32xf32>
    %752 = math.tanh %751 : vector<8x32xf32>
    %753 = arith.mulf %748, %752 : vector<8x32xf32>
    %754 = vector.extract_strided_slice %628 {offsets = [40, 0], sizes = [8, 128], strides = [1, 1]} : vector<64x128xf32> to vector<8x128xf32>
    %cst_145 = arith.constant dense<0.000000e+00> : vector<8x128xf32>
    %755 = tpu.matmul %753, %624, %cst_145 {dimension_numbers = #tpu.dot_dimension_numbers<[1], [0], [0], [1], [0, 0, 1, 1], [], []>} : vector<8x32xf32>, vector<32x128xf32>, vector<8x128xf32> -> vector<8x128xf32>
    %756 = arith.addf %754, %755 : vector<8x128xf32>
    %757 = tpu.iota {dimensions = array<i32: 1>} : vector<8x128xi32>
    %c64_i32_146 = arith.constant 64 : i32
    %758 = vector.broadcast %c64_i32_146 : i32 to vector<8x128xi32>
    %759 = arith.cmpi sge, %757, %758 : vector<8x128xi32>
    %c96_i32_147 = arith.constant 96 : i32
    %760 = vector.broadcast %c96_i32_147 : i32 to vector<8x128xi32>
    %761 = arith.cmpi slt, %757, %760 : vector<8x128xi32>
    %762 = arith.andi %759, %761 : vector<8x128xi1>
    %763 = math.tanh %756 : vector<8x128xf32>
    %764 = arith.negf %756 : vector<8x128xf32>
    %765 = math.exp %764 : vector<8x128xf32>
    %cst_148 = arith.constant 1.000000e+00 : f32
    %766 = vector.broadcast %cst_148 : f32 to vector<8x128xf32>
    %767 = arith.addf %766, %765 : vector<8x128xf32>
    %768 = arith.divf %766, %767 : vector<8x128xf32>
    %769 = arith.select %762, %763, %768 : vector<8x128xi1>, vector<8x128xf32>
    %770 = vector.extract_strided_slice %769 {offsets = [0, 0], sizes = [8, 32], strides = [1, 1]} : vector<8x128xf32> to vector<8x32xf32>
    %771 = vector.extract_strided_slice %769 {offsets = [0, 32], sizes = [8, 32], strides = [1, 1]} : vector<8x128xf32> to vector<8x32xf32>
    %772 = vector.extract_strided_slice %769 {offsets = [0, 64], sizes = [8, 32], strides = [1, 1]} : vector<8x128xf32> to vector<8x32xf32>
    %773 = vector.extract_strided_slice %769 {offsets = [0, 96], sizes = [8, 32], strides = [1, 1]} : vector<8x128xf32> to vector<8x32xf32>
    %774 = arith.mulf %770, %751 : vector<8x32xf32>
    %775 = arith.mulf %771, %772 : vector<8x32xf32>
    %776 = arith.addf %774, %775 : vector<8x32xf32>
    %777 = math.tanh %776 : vector<8x32xf32>
    %778 = arith.mulf %773, %777 : vector<8x32xf32>
    %779 = vector.extract_strided_slice %628 {offsets = [48, 0], sizes = [8, 128], strides = [1, 1]} : vector<64x128xf32> to vector<8x128xf32>
    %cst_149 = arith.constant dense<0.000000e+00> : vector<8x128xf32>
    %780 = tpu.matmul %778, %624, %cst_149 {dimension_numbers = #tpu.dot_dimension_numbers<[1], [0], [0], [1], [0, 0, 1, 1], [], []>} : vector<8x32xf32>, vector<32x128xf32>, vector<8x128xf32> -> vector<8x128xf32>
    %781 = arith.addf %779, %780 : vector<8x128xf32>
    %782 = tpu.iota {dimensions = array<i32: 1>} : vector<8x128xi32>
    %c64_i32_150 = arith.constant 64 : i32
    %783 = vector.broadcast %c64_i32_150 : i32 to vector<8x128xi32>
    %784 = arith.cmpi sge, %782, %783 : vector<8x128xi32>
    %c96_i32_151 = arith.constant 96 : i32
    %785 = vector.broadcast %c96_i32_151 : i32 to vector<8x128xi32>
    %786 = arith.cmpi slt, %782, %785 : vector<8x128xi32>
    %787 = arith.andi %784, %786 : vector<8x128xi1>
    %788 = math.tanh %781 : vector<8x128xf32>
    %789 = arith.negf %781 : vector<8x128xf32>
    %790 = math.exp %789 : vector<8x128xf32>
    %cst_152 = arith.constant 1.000000e+00 : f32
    %791 = vector.broadcast %cst_152 : f32 to vector<8x128xf32>
    %792 = arith.addf %791, %790 : vector<8x128xf32>
    %793 = arith.divf %791, %792 : vector<8x128xf32>
    %794 = arith.select %787, %788, %793 : vector<8x128xi1>, vector<8x128xf32>
    %795 = vector.extract_strided_slice %794 {offsets = [0, 0], sizes = [8, 32], strides = [1, 1]} : vector<8x128xf32> to vector<8x32xf32>
    %796 = vector.extract_strided_slice %794 {offsets = [0, 32], sizes = [8, 32], strides = [1, 1]} : vector<8x128xf32> to vector<8x32xf32>
    %797 = vector.extract_strided_slice %794 {offsets = [0, 64], sizes = [8, 32], strides = [1, 1]} : vector<8x128xf32> to vector<8x32xf32>
    %798 = vector.extract_strided_slice %794 {offsets = [0, 96], sizes = [8, 32], strides = [1, 1]} : vector<8x128xf32> to vector<8x32xf32>
    %799 = arith.mulf %795, %776 : vector<8x32xf32>
    %800 = arith.mulf %796, %797 : vector<8x32xf32>
    %801 = arith.addf %799, %800 : vector<8x32xf32>
    %802 = math.tanh %801 : vector<8x32xf32>
    %803 = arith.mulf %798, %802 : vector<8x32xf32>
    %804 = vector.extract_strided_slice %628 {offsets = [56, 0], sizes = [8, 128], strides = [1, 1]} : vector<64x128xf32> to vector<8x128xf32>
    %cst_153 = arith.constant dense<0.000000e+00> : vector<8x128xf32>
    %805 = tpu.matmul %803, %624, %cst_153 {dimension_numbers = #tpu.dot_dimension_numbers<[1], [0], [0], [1], [0, 0, 1, 1], [], []>} : vector<8x32xf32>, vector<32x128xf32>, vector<8x128xf32> -> vector<8x128xf32>
    %806 = arith.addf %804, %805 : vector<8x128xf32>
    %807 = tpu.iota {dimensions = array<i32: 1>} : vector<8x128xi32>
    %c64_i32_154 = arith.constant 64 : i32
    %808 = vector.broadcast %c64_i32_154 : i32 to vector<8x128xi32>
    %809 = arith.cmpi sge, %807, %808 : vector<8x128xi32>
    %c96_i32_155 = arith.constant 96 : i32
    %810 = vector.broadcast %c96_i32_155 : i32 to vector<8x128xi32>
    %811 = arith.cmpi slt, %807, %810 : vector<8x128xi32>
    %812 = arith.andi %809, %811 : vector<8x128xi1>
    %813 = math.tanh %806 : vector<8x128xf32>
    %814 = arith.negf %806 : vector<8x128xf32>
    %815 = math.exp %814 : vector<8x128xf32>
    %cst_156 = arith.constant 1.000000e+00 : f32
    %816 = vector.broadcast %cst_156 : f32 to vector<8x128xf32>
    %817 = arith.addf %816, %815 : vector<8x128xf32>
    %818 = arith.divf %816, %817 : vector<8x128xf32>
    %819 = arith.select %812, %813, %818 : vector<8x128xi1>, vector<8x128xf32>
    %820 = vector.extract_strided_slice %819 {offsets = [0, 0], sizes = [8, 32], strides = [1, 1]} : vector<8x128xf32> to vector<8x32xf32>
    %821 = vector.extract_strided_slice %819 {offsets = [0, 32], sizes = [8, 32], strides = [1, 1]} : vector<8x128xf32> to vector<8x32xf32>
    %822 = vector.extract_strided_slice %819 {offsets = [0, 64], sizes = [8, 32], strides = [1, 1]} : vector<8x128xf32> to vector<8x32xf32>
    %823 = vector.extract_strided_slice %819 {offsets = [0, 96], sizes = [8, 32], strides = [1, 1]} : vector<8x128xf32> to vector<8x32xf32>
    %824 = arith.mulf %820, %801 : vector<8x32xf32>
    %825 = arith.mulf %821, %822 : vector<8x32xf32>
    %826 = arith.addf %824, %825 : vector<8x32xf32>
    %827 = math.tanh %826 : vector<8x32xf32>
    %828 = arith.mulf %823, %827 : vector<8x32xf32>
    %829 = tpu.concatenate %653, %678, %703, %728, %753, %778, %803, %828 in 0 : vector<8x32xf32>, vector<8x32xf32>, vector<8x32xf32>, vector<8x32xf32>, vector<8x32xf32>, vector<8x32xf32>, vector<8x32xf32>, vector<8x32xf32> -> vector<64x32xf32>
    %c0_157 = arith.constant 0 : index
    %c0_158 = arith.constant 0 : index
    %830 = vector.load %arg14[%c0_157, %c0_158] : memref<32x128xf32, #tpu.memory_space<vmem>>, vector<32x128xf32>
    %cst_159 = arith.constant dense<0.000000e+00> : vector<64x128xf32>
    %831 = tpu.matmul %829, %830, %cst_159 {dimension_numbers = #tpu.dot_dimension_numbers<[1], [0], [0], [1], [0, 0, 1, 1], [], []>} : vector<64x32xf32>, vector<32x128xf32>, vector<64x128xf32> -> vector<64x128xf32>
    %c0_160 = arith.constant 0 : index
    %c0_161 = arith.constant 0 : index
    %832 = vector.load %arg15[%c0_160, %c0_161] : memref<1x128xf32, #tpu.memory_space<vmem>>, vector<1x128xf32>
    %833 = vector.broadcast %832 : vector<1x128xf32> to vector<64x128xf32>
    %834 = arith.addf %831, %833 : vector<64x128xf32>
    %835 = tpu.iota {dimensions = array<i32: 1>} : vector<64x128xi32>
    %c2_i32 = arith.constant 2 : i32
    %836 = vector.broadcast %c2_i32 : i32 to vector<64x128xi32>
    %837 = arith.cmpi sge, %835, %836 : vector<64x128xi32>
    %c4_i32 = arith.constant 4 : i32
    %838 = vector.broadcast %c4_i32 : i32 to vector<64x128xi32>
    %839 = arith.cmpi slt, %835, %838 : vector<64x128xi32>
    %840 = arith.andi %837, %839 : vector<64x128xi1>
    %cst_162 = arith.constant -2.99573231 : f32
    %cst_163 = arith.constant 2.99573231 : f32
    %841 = vector.broadcast %cst_162 : f32 to vector<64x128xf32>
    %842 = arith.maximumf %841, %834 : vector<64x128xf32>
    %843 = vector.broadcast %cst_163 : f32 to vector<64x128xf32>
    %844 = arith.minimumf %843, %842 : vector<64x128xf32>
    %845 = math.exp %844 : vector<64x128xf32>
    %846 = arith.select %840, %845, %834 : vector<64x128xi1>, vector<64x128xf32>
    %c0_164 = arith.constant 0 : index
    %c0_165 = arith.constant 0 : index
    %847 = vector.load %arg16[%c0_164, %c0_165] : memref<64x128xf32, #tpu.memory_space<vmem>>, vector<64x128xf32>
    tpu.vector_store %arg16[%c0_164, %c0_165], %846 {strides = array<i32>} : memref<64x128xf32, #tpu.memory_space<vmem>>, vector<64x128xf32>,
    return
  }
}

</mosaic_0001>

<bundles_post_ra>
// kernel: seq2seq_forward.1
= control target key start
LH: loop header
LB: loop body
LE: loop exit
PB: predicated region body
PF: predicated region fallthrough
CT: control target
= control target key end

     0   :  { %s6297_s0 = inlined_call_operand.vmem [shape: f32[64,6], index: 0, kind: input, shape index: {}]   ;;  %s6298_s1 = inlined_call_operand.vmem [shape: f32[64,4], index: 1, kind: input, shape index: {}]   ;;  %s6299_s2 = inlined_call_operand.vmem [shape: f32[6,128], index: 2, kind: input, shape index: {}]   ;;  %s6300_s3 = inlined_call_operand.vmem [shape: f32[32,128], index: 3, kind: input, shape index: {}]   ;;  %s6301_s4 = inlined_call_operand.vmem [shape: f32[1,128], index: 4, kind: input, shape index: {}]   ;;  %s6302_s5 = inlined_call_operand.vmem [shape: f32[32,128], index: 5, kind: input, shape index: {}]   ;;  %s6303_s6 = inlined_call_operand.vmem [shape: f32[32,128], index: 6, kind: input, shape index: {}]   ;;  %s6304_s7 = inlined_call_operand.vmem [shape: f32[1,128], index: 7, kind: input, shape index: {}]   ;;  %s6305_s8 = inlined_call_operand.vmem [shape: f32[4,128], index: 8, kind: input, shape index: {}]   ;;  %s6306_s9 = inlined_call_operand.vmem [shape: f32[32,128], index: 9, kind: input, shape index: {}]   ;;  %s6307_s10 = inlined_call_operand.vmem [shape: f32[1,128], index: 10, kind: input, shape index: {}]   ;;  %s6308_s11 = inlined_call_operand.vmem [shape: f32[32,128], index: 11, kind: input, shape index: {}]   ;;  %s6309_s12 = inlined_call_operand.vmem [shape: f32[32,128], index: 12, kind: input, shape index: {}]   ;;  %s6310_s13 = inlined_call_operand.vmem [shape: f32[1,128], index: 13, kind: input, shape index: {}]   ;;  %s6311_s14 = inlined_call_operand.vmem [shape: f32[32,128], index: 14, kind: input, shape index: {}]   ;;  %s6312_s15 = inlined_call_operand.hbm [shape: f32[1,128], index: 15, kind: input, shape index: {}]   ;;  %s6313_s16 = inlined_call_operand.vmem [shape: f32[64,128], index: 16, kind: output, shape index: {}]  }
   0x1   :  { %6315 = sst [smem:[#allocation5_spill]] %s6297_s0 }
   0x2   :  { %21 = vsyncpa [#allocation3], 0  ;;  %s5315_s21 = smov [#allocation2]   ;;  %s5291_s25 = scalar_lea.hbm %s6312_s15, 16 }
   0x3   :  { %s58_s22 = sshll.u32 %s5315_s21, 4  ;;  %p5292_p0 = scmp.ne.s32.totalorder %s6312_s15, %s5291_s25  ;;  %s59_s22 = int_to_ptr.vmem [resolvable:$true] %s58_s22 }
   0x4   :  { %p5295_p1 = scmp.lt.u32.totalorder %s5291_s25, %s6312_s15 }
   0x6   :  { %p5297_p2 = pnand %p5295_p1, %p5292_p0 }
   0x8   :  { %5300 = shalt.err (!%p5297_p2)
}
   0x9   :  { %s5301_s30 = scalar_lea.vmem %s59_s22, 16  ;;  %s5305_s0 = scalar_lea.vmem %s59_s22, 32 }
   0xa   :  { %p5302_p3 = scmp.ne.s32.totalorder %s59_s22, %s5301_s30  ;;  %p5306_p4 = scmp.lt.s32.totalorder %s59_s22, %s59_s22 }
   0xb   :  { %p5307_p5 = scmp.lt.s32.totalorder %s5305_s0, %s5301_s30 }
   0xd   :  { %p5308_p6 = por %p5307_p5, %p5306_p4 }
   0xf   :  { %p5309_p7 = pnand %p5308_p6, %p5302_p3 }
  0x11   :  { %5312 = shalt.err (!%p5309_p7)
}
  0x12   :  { %61 = dma.hbm_to_vmem [thread:$0]  %s6312_s15, 16, %s59_s22, [#allocation3]  }
  0x13   :  { %5313 = dma.done.wait [#allocation3], 16  }
  0x14   :  { %5314 = vsyncadd [#allocation3], 4294967280  ;;  %v5316_v0 = vmov 0.0|0.0   ;;  %vm5317_vm0 = vmmov 0   ;;  %v5318_v1 = vmov 0.0   ;;  %vm110_vm1 = vcmask 1045504  }
  0x15   :  { %4803 = vmatprep.subr.bf16.mxu1 %v5316_v0  ;;  %4390 = vmatprep.mubr.msk.f32.mxu1 %vm5317_vm0, %v5318_v1  ;;  %vm85_vm2 = vcmask 48128   ;;  %v73_v2 = vld [vmem:[%s6299_s2] sm:$0x3f]  ;;  %s6316_s24 = sld [smem:[#allocation5_spill]]  ;;  %v75_v6 = vld [vmem:[%s6300_s3 + $0x8] sm:$0xff]  ;;  %v76_v9 = vld [vmem:[%s6300_s3 + $0x10] sm:$0xff]  ;;  %v294_v39 = vlaneseq }
  0x16   :  { %4357 = vmatprep.subr.msk.mxu0 %vm110_vm1, %v73_v2  ;;  %v74_v5 = vld [vmem:[%s6300_s3] sm:$0xff]  ;;  %v77_v10 = vld [vmem:[%s6300_s3 + $0x18] sm:$0xff]  ;;  %s5320_s2 = smov 32   ;;  %vm219_vm6 = vcmask 261120   ;;  %vm2004_vm7 = vcmask 1043456   ;;  %vm1979_vm8 = vcmask 31744  }
  0x17   :  { %4358 = vmatpush3.msk.msra.mxu0 %vm110_vm1, %v73_v2  ;;  %v5440_v8 = vpack.c.bf16 %v75_v6, %v74_v5  ;;  %v5455_v12 = vpack.c.bf16 %v77_v10, %v76_v9  ;;  %v4026_v17 = vld [vmem:[%s6301_s4] ss:$0 sm:$0xff]  ;;  %v5505_v41 = vand.u32 127, %v294_v39  ;;  %s5319_s4 = smov 96  }
  0x18   :  { %4797 = vmatprep.subr.bf16.mxu0 %v5316_v0 }
  0x19   :  { %4805 = vmatpush3.bf16.msra.mxu1 %v5440_v8  ;;  %vm296_vm3 = vcmp.ge.s32.totalorder %v5505_v41, 64  ;;  %vm297_vm4 = vcmp.lt.s32.totalorder %v5505_v41, 96  ;;  %vm3970_vm9 = vcmp.ge.s32.totalorder %v5505_v41, 2  ;;  %vm3971_vm10 = vcmp.lt.s32.totalorder %v5505_v41, 4 }
  0x1a   :  { %4806 = vmatprep.subr.bf16.mxu1 %v5316_v0  ;;  %vm5509_vm5 = vmand %vm296_vm3, %vm297_vm4 }
  0x1b   :  { %v65_v3 = vld [vmem:[%s6316_s24] sm:$0xff]  ;;  %v66_v4 = vld [vmem:[%s6316_s24 + $0x8] sm:$0xff]  ;;  %v67_v7 = vld [vmem:[%s6316_s24 + $0x10] sm:$0xff] }
  0x1c   :  { %4359 = vmatprep.mubr.msk.f32.mxu0 %vm85_vm2, %v65_v3  ;;  %v68_v11 = vld [vmem:[%s6316_s24 + $0x18] sm:$0xff]  ;;  %v69_v13 = vld [vmem:[%s6316_s24 + $0x20] sm:$0xff]  ;;  %v70_v14 = vld [vmem:[%s6316_s24 + $0x28] sm:$0xff] }
  0x1d   :  { %4360 = vmatmul.mubr.msk.f32.vlgmr.msra.gmra.mrb[0].mxu0 %vm85_vm2, %v66_v4  ;;  %v71_v15 = vld [vmem:[%s6316_s24 + $0x30] sm:$0xff]  ;;  %4808 = vmatpush3.bf16.msra.mxu1 %v5455_v12  ;;  %v72_v16 = vld [vmem:[%s6316_s24 + $0x38] sm:$0xff]  ;;  %vm6233_vm11 = vmand %vm3970_vm9, %vm3971_vm10 }
  0x1e   :  { %4799 = vmatpush3.bf16.msra.mxu0 %v5440_v8  ;;  %4362 = vmatprep.mubr.msk.f32.mxu0 %vm85_vm2, %v67_v7 }
  0x1f   :  { %4800 = vmatprep.subr.bf16.mxu0 %v5316_v0  ;;  %4815 = vmatprep.subr.bf16.mxu1 %v5316_v0 }
  0x21   :  { %4363 = vmatmul.mubr.msk.f32.gmra.mrb[2].mxu0 %vm85_vm2, %v68_v11 }
  0x22   :  { %4365 = vmatprep.mubr.msk.f32.mxu0 %vm85_vm2, %v69_v13  ;;  %4802 = vmatpush3.bf16.msra.mxu0 %v5455_v12 }
  0x23   :  { %4809 = vmatprep.subr.bf16.mxu0 %v5316_v0 }
  0x25   :  { %4366 = vmatmul.mubr.msk.f32.gmra.mrb[4].mxu0 %vm85_vm2, %v70_v14 }
  0x26   :  { %4368 = vmatprep.mubr.msk.f32.mxu0 %vm85_vm2, %v71_v15 }
  0x29   :  { %4369 = vmatmul.mubr.msk.f32.gmra.mrb[6].mxu0 %vm85_vm2, %v72_v16 }
  0x2a   :  { %4379 = vmatprep.mubr.msk.f32.mxu0 %vm5317_vm0, %v5318_v1 }
  0x2d   :  { %4380 = vmatmul.mubr.f32.vlgmr.msra.gmra.mrb[8].mxu0 %v5318_v1 }
  0x2e   :  { %4811 = vmatpush3.bf16.msra.mxu0 %v5440_v8  ;;  %4401 = vmatprep.mubr.msk.f32.mxu0 %vm5317_vm0, %v5318_v1 }
  0x2f   :  { %4812 = vmatprep.subr.bf16.mxu0 %v5316_v0 }
  0x32   :  { %4814 = vmatpush3.bf16.msra.mxu0 %v5455_v12 }
  0x33   :  { %4821 = vmatprep.subr.bf16.mxu0 %v5316_v0 }
  0xf0   :  { %v4361_v18 = vpop.f32.mrb[0].mxu0 }
  0xf1   :  { %v186_v19 = vadd.f32 %v4361_v18, %v4026_v17  ;;  %v180_v20 = vpop.f32.mrb[1].mxu0 }
  0xf2   :  { %v181_v33 = vadd.f32 %v4026_v17, %v180_v20 }
  0xf4   :  { %v4364_v21 = vpop.f32.mrb[2].mxu0 }
  0xf5   :  { %v5493_v22 = vadd.f32 %v4364_v21, %v4026_v17  ;;  %v190_v23 = vpop.f32.mrb[3].mxu0 }
  0xf6   :  { %v5495_v24 = vadd.f32 %v4026_v17, %v190_v23 }
  0xf8   :  { %v4367_v25 = vpop.f32.mrb[4].mxu0 }
  0xf9   :  { %v5497_v26 = vadd.f32 %v4367_v25, %v4026_v17  ;;  %v200_v27 = vpop.f32.mrb[5].mxu0 }
  0xfa   :  { %v5499_v28 = vadd.f32 %v4026_v17, %v200_v27 }
  0xfc   :  { %v4370_v29 = vpop.f32.mrb[6].mxu0 }
  0xfd   :  { %v5501_v30 = vadd.f32 %v4370_v29, %v4026_v17  ;;  %v210_v31 = vpop.f32.mrb[7].mxu0 }
  0xfe   :  { %v5503_v32 = vadd.f32 %v4026_v17, %v210_v31 }
 0x100   :  { %v289_v34 = vpop.f32.mrb[8].mxu0 }
 0x101   :  { %v293_v35 = vadd.f32 %v289_v34, %v181_v33  ;;  %v4381_v36 = vpop.f32.mrb[9].mxu0 }
 0x103   :  { %v4036_v37 = vmul.f32 -1.442695, %v293_v35 }
 0x105   :  { %5019 = vpow2.f32 %v4036_v37 }
 0x106   :  { %5021 = vtanh.f32 %v293_v35 }
 0x10f   :  { %v5020_v38 = vpop.eup %5019 }
 0x110   :  { %v303_v40 = vadd.f32 1.0, %v5020_v38  ;;  %v5022_v43 = vpop.eup %5021 }
 0x112   :  { %5023 = vrcp.f32 %v303_v40 }
 0x11c   :  { %v5024_v44 = vpop.eup %5023 }
 0x11d   :  { %v306_v45 = vsel %vm5509_vm5, %v5022_v43, %v5024_v44 }
 0x11e   :  { %309 = vrot.lane.b32.xlu0 %v306_v45, %s5319_s4  ;;  %v307_v48 = vmul.f32 0.0, %v306_v45 }
 0x190   :  { %v310_v46 = vpop.permute.xlu0 %309 }
 0x191   :  { %v312_v47 = vmul.f32 %v310_v46, %v306_v45 }
 0x193   :  { %314 = vrot.lane.b32.xlu0 %v312_v47, %s5319_s4 }
 0x205   :  { %v315_v49 = vpop.permute.xlu0 %314 }
 0x206   :  { %v317_v50 = vadd.f32 %v315_v49, %v307_v48 }
 0x208   :  { %5025 = vtanh.f32 %v317_v50 }
 0x212   :  { %v5026_v51 = vpop.eup %5025 }
 0x213   :  { %320 = vrot.lane.b32.xlu1 %v5026_v51, %s5319_s4 }
 0x285   :  { %v321_v52 = vpop.permute.xlu1 %320 }
 0x286   :  { %v323_v53 = vmul.f32 %v321_v52, %v306_v45 }
 0x288   :  { %325 = vrot.lane.b32.xlu1 %v323_v53, %s5320_s2 }
 0x2fa   :  { %v5519_v54 = vpop.permute.xlu1 %325 }
 0x2fb   :  { %4391 = vmatmul.mubr.msk.f32.vlgmr.msra.gmra.mrb[0].mxu1 %vm219_vm6, %v5519_v54 }
 0x2fc   :  { %4817 = vmatpush3.bf16.msra.mxu1 %v5440_v8  ;;  %4412 = vmatprep.mubr.msk.f32.mxu1 %vm5317_vm0, %v5318_v1 }
 0x2fd   :  { %4818 = vmatprep.subr.bf16.mxu1 %v5316_v0 }
 0x300   :  { %4820 = vmatpush3.bf16.msra.mxu1 %v5455_v12 }
 0x301   :  { %4827 = vmatprep.subr.bf16.mxu1 %v5316_v0 }
 0x3ce   :  { %v395_v55 = vpop.f32.mrb[0].mxu1 }
 0x3cf   :  { %v399_v56 = vadd.f32 %v395_v55, %v186_v19  ;;  %v4392_v57 = vpop.f32.mrb[1].mxu1 }
 0x3d1   :  { %v4038_v58 = vmul.f32 -1.442695, %v399_v56 }
 0x3d3   :  { %5027 = vpow2.f32 %v4038_v58 }
 0x3d4   :  { %5029 = vtanh.f32 %v399_v56 }
 0x3dd   :  { %v5028_v59 = vpop.eup %5027 }
 0x3de   :  { %v404_v60 = vadd.f32 1.0, %v5028_v59  ;;  %v5030_v61 = vpop.eup %5029 }
 0x3e0   :  { %5031 = vrcp.f32 %v404_v60 }
 0x3ea   :  { %v5032_v62 = vpop.eup %5031 }
 0x3eb   :  { %v407_v63 = vsel %vm5509_vm5, %v5030_v61, %v5032_v62 }
 0x3ec   :  { %410 = vrot.lane.b32.xlu0 %v407_v63, %s5319_s4  ;;  %v408_v4 = vmul.f32 %v407_v63, %v317_v50 }
 0x45e   :  { %v411_v2 = vpop.permute.xlu0 %410 }
 0x45f   :  { %v413_v3 = vmul.f32 %v411_v2, %v407_v63 }
 0x461   :  { %415 = vrot.lane.b32.xlu1 %v413_v3, %s5319_s4 }
 0x4d3   :  { %v416_v5 = vpop.permute.xlu1 %415 }
 0x4d4   :  { %v418_v6 = vadd.f32 %v416_v5, %v408_v4 }
 0x4d6   :  { %5033 = vtanh.f32 %v418_v6 }
 0x4e0   :  { %v5034_v7 = vpop.eup %5033 }
 0x4e1   :  { %421 = vrot.lane.b32.xlu0 %v5034_v7, %s5319_s4 }
 0x553   :  { %v422_v9 = vpop.permute.xlu0 %421 }
 0x554   :  { %v424_v10 = vmul.f32 %v422_v9, %v407_v63 }
 0x556   :  { %426 = vrot.lane.b32.xlu1 %v424_v10, %s5320_s2 }
 0x5c8   :  { %v5535_v11 = vpop.permute.xlu1 %426 }
 0x5c9   :  { %4402 = vmatmul.mubr.msk.f32.vlgmr.msra.gmra.mrb[10].mxu0 %vm219_vm6, %v5535_v11 }
 0x5ca   :  { %4823 = vmatpush3.bf16.msra.mxu0 %v5440_v8  ;;  %4423 = vmatprep.mubr.msk.f32.mxu0 %vm5317_vm0, %v5318_v1 }
 0x5cb   :  { %4824 = vmatprep.subr.bf16.mxu0 %v5316_v0 }
 0x5ce   :  { %4826 = vmatpush3.bf16.msra.mxu0 %v5455_v12 }
 0x5cf   :  { %4833 = vmatprep.subr.bf16.mxu0 %v5316_v0 }
 0x69c   :  { %v496_v13 = vpop.f32.mrb[10].mxu0 }
 0x69d   :  { %v500_v14 = vadd.f32 %v496_v13, %v5495_v24  ;;  %v4403_v15 = vpop.f32.mrb[11].mxu0 }
 0x69f   :  { %v4040_v16 = vmul.f32 -1.442695, %v500_v14 }
 0x6a1   :  { %5035 = vpow2.f32 %v4040_v16 }
 0x6a2   :  { %5037 = vtanh.f32 %v500_v14 }
 0x6ab   :  { %v5036_v17 = vpop.eup %5035 }
 0x6ac   :  { %v505_v18 = vadd.f32 1.0, %v5036_v17  ;;  %v5038_v19 = vpop.eup %5037 }
 0x6ae   :  { %5039 = vrcp.f32 %v505_v18 }
 0x6b8   :  { %v5040_v20 = vpop.eup %5039 }
 0x6b9   :  { %v508_v21 = vsel %vm5509_vm5, %v5038_v19, %v5040_v20 }
 0x6ba   :  { %511 = vrot.lane.b32.xlu0 %v508_v21, %s5319_s4  ;;  %v509_v27 = vmul.f32 %v508_v21, %v418_v6 }
 0x72c   :  { %v512_v23 = vpop.permute.xlu0 %511 }
 0x72d   :  { %v514_v25 = vmul.f32 %v512_v23, %v508_v21 }
 0x72f   :  { %516 = vrot.lane.b32.xlu1 %v514_v25, %s5319_s4 }
 0x7a1   :  { %v517_v24 = vpop.permute.xlu1 %516 }
 0x7a2   :  { %v519_v29 = vadd.f32 %v517_v24, %v509_v27  ;;  %v1031_v24 = vld [vmem:[%s6302_s5] sm:$0xff] }
 0x7a4   :  { %5041 = vtanh.f32 %v519_v29 }
 0x7ae   :  { %v5042_v31 = vpop.eup %5041 }
 0x7af   :  { %522 = vrot.lane.b32.xlu0 %v5042_v31, %s5319_s4 }
 0x821   :  { %v523_v33 = vpop.permute.xlu0 %522 }
 0x822   :  { %v525_v34 = vmul.f32 %v523_v33, %v508_v21 }
 0x824   :  { %527 = vrot.lane.b32.xlu1 %v525_v34, %s5320_s2 }
 0x896   :  { %v5552_v35 = vpop.permute.xlu1 %527 }
 0x897   :  { %4413 = vmatmul.mubr.msk.f32.vlgmr.msra.gmra.mrb[2].mxu1 %vm219_vm6, %v5552_v35 }
 0x898   :  { %4829 = vmatpush3.bf16.msra.mxu1 %v5440_v8  ;;  %4434 = vmatprep.mubr.msk.f32.mxu1 %vm5317_vm0, %v5318_v1 }
 0x899   :  { %4830 = vmatprep.subr.bf16.mxu1 %v5316_v0 }
 0x89c   :  { %4832 = vmatpush3.bf16.msra.mxu1 %v5455_v12 }
 0x89d   :  { %4839 = vmatprep.subr.bf16.mxu1 %v5316_v0 }
 0x96a   :  { %v597_v36 = vpop.f32.mrb[2].mxu1 }
 0x96b   :  { %v601_v37 = vadd.f32 %v597_v36, %v5493_v22  ;;  %v4414_v38 = vpop.f32.mrb[3].mxu1 }
 0x96c   :  { %v1034_v38 = vld [vmem:[%s6302_s5 + $0x18] sm:$0xff] }
 0x96d   :  { %v4042_v39 = vmul.f32 -1.442695, %v601_v37 }
 0x96f   :  { %5043 = vpow2.f32 %v4042_v39 }
 0x970   :  { %5045 = vtanh.f32 %v601_v37  ;;  %v1033_v37 = vld [vmem:[%s6302_s5 + $0x10] sm:$0xff] }
 0x971   :  { %v4849_v39 = vpack.c.bf16 %v1034_v38, %v1033_v37 }
 0x979   :  { %v5044_v40 = vpop.eup %5043 }
 0x97a   :  { %v606_v43 = vadd.f32 1.0, %v5044_v40  ;;  %v5046_v44 = vpop.eup %5045 }
 0x97c   :  { %5047 = vrcp.f32 %v606_v43 }
 0x986   :  { %v5048_v45 = vpop.eup %5047 }
 0x987   :  { %v609_v46 = vsel %vm5509_vm5, %v5046_v44, %v5048_v45 }
 0x988   :  { %612 = vrot.lane.b32.xlu0 %v609_v46, %s5319_s4  ;;  %v610_v49 = vmul.f32 %v609_v46, %v519_v29  ;;  %v1032_v29 = vld [vmem:[%s6302_s5 + $0x8] sm:$0xff] }
 0x989   :  { %v4845_v31 = vpack.c.bf16 %v1032_v29, %v1031_v24 }
 0x9fa   :  { %v613_v47 = vpop.permute.xlu0 %612 }
 0x9fb   :  { %v615_v48 = vmul.f32 %v613_v47, %v609_v46 }
 0x9fd   :  { %617 = vrot.lane.b32.xlu1 %v615_v48, %s5319_s4 }
 0xa6f   :  { %v618_v22 = vpop.permute.xlu1 %617 }
 0xa70   :  { %v620_v50 = vadd.f32 %v618_v22, %v610_v49 }
 0xa72   :  { %5049 = vtanh.f32 %v620_v50 }
 0xa7c   :  { %v5050_v51 = vpop.eup %5049 }
 0xa7d   :  { %623 = vrot.lane.b32.xlu0 %v5050_v51, %s5319_s4 }
 0xaef   :  { %v624_v52 = vpop.permute.xlu0 %623 }
 0xaf0   :  { %v626_v53 = vmul.f32 %v624_v52, %v609_v46 }
 0xaf2   :  { %628 = vrot.lane.b32.xlu1 %v626_v53, %s5320_s2 }
 0xb64   :  { %v5569_v55 = vpop.permute.xlu1 %628 }
 0xb65   :  { %4424 = vmatmul.mubr.msk.f32.vlgmr.msra.gmra.mrb[12].mxu0 %vm219_vm6, %v5569_v55 }
 0xb66   :  { %4835 = vmatpush3.bf16.msra.mxu0 %v5440_v8  ;;  %4445 = vmatprep.mubr.msk.f32.mxu0 %vm5317_vm0, %v5318_v1 }
 0xb67   :  { %4836 = vmatprep.subr.bf16.mxu0 %v5316_v0 }
 0xb6a   :  { %4838 = vmatpush3.bf16.msra.mxu0 %v5455_v12 }
 0xb6b   :  { %4846 = vmatprep.subr.bf16.mxu0 %v4845_v31 }
 0xc38   :  { %v698_v56 = vpop.f32.mrb[12].mxu0 }
 0xc39   :  { %v702_v57 = vadd.f32 %v698_v56, %v5499_v28  ;;  %v4425_v58 = vpop.f32.mrb[13].mxu0 }
 0xc3b   :  { %v4044_v59 = vmul.f32 -1.442695, %v702_v57 }
 0xc3d   :  { %5051 = vpow2.f32 %v4044_v59 }
 0xc3e   :  { %5053 = vtanh.f32 %v702_v57 }
 0xc47   :  { %v5052_v60 = vpop.eup %5051 }
 0xc48   :  { %v707_v61 = vadd.f32 1.0, %v5052_v60  ;;  %v5054_v62 = vpop.eup %5053  ;;  %v1035_v60 = vld [vmem:[%s6303_s6] sm:$0xff] }
 0xc4a   :  { %5055 = vrcp.f32 %v707_v61  ;;  %v1036_v61 = vld [vmem:[%s6303_s6 + $0x8] sm:$0xff] }
 0xc54   :  { %v5056_v63 = vpop.eup %5055 }
 0xc55   :  { %v710_v2 = vsel %vm5509_vm5, %v5054_v62, %v5056_v63  ;;  %v5648_v62 = vpack.c.bf16 %v1036_v61, %v1035_v60  ;;  %v1037_v63 = vld [vmem:[%s6303_s6 + $0x10] sm:$0xff] }
 0xc56   :  { %713 = vrot.lane.b32.xlu0 %v710_v2, %s5319_s4  ;;  %v711_v5 = vmul.f32 %v710_v2, %v620_v50 }
 0xcc8   :  { %v714_v3 = vpop.permute.xlu0 %713 }
 0xcc9   :  { %v716_v4 = vmul.f32 %v714_v3, %v710_v2 }
 0xccb   :  { %718 = vrot.lane.b32.xlu1 %v716_v4, %s5319_s4 }
 0xd3d   :  { %v719_v28 = vpop.permute.xlu1 %718 }
 0xd3e   :  { %v721_v6 = vadd.f32 %v719_v28, %v711_v5 }
 0xd40   :  { %5057 = vtanh.f32 %v721_v6 }
 0xd4a   :  { %v5058_v7 = vpop.eup %5057 }
 0xd4b   :  { %724 = vrot.lane.b32.xlu0 %v5058_v7, %s5319_s4 }
 0xdbd   :  { %v725_v9 = vpop.permute.xlu0 %724 }
 0xdbe   :  { %v727_v10 = vmul.f32 %v725_v9, %v710_v2  ;;  %v1038_v2 = vld [vmem:[%s6303_s6 + $0x18] sm:$0xff] }
 0xdbf   :  { %v5658_v3 = vpack.c.bf16 %v1038_v2, %v1037_v63 }
 0xdc0   :  { %729 = vrot.lane.b32.xlu1 %v727_v10, %s5320_s2  ;;  %v5682_v10 = vld [vmem:[%s6304_s7] ss:$0 sm:$0xff] }
 0xe32   :  { %v730_v13 = vpop.permute.xlu1 %729 }
 0xe33   :  { %4435 = vmatmul.mubr.msk.f32.vlgmr.msra.gmra.mrb[4].mxu1 %vm219_vm6, %v730_v13 }
 0xe34   :  { %4841 = vmatpush3.bf16.msra.mxu1 %v5440_v8  ;;  %4456 = vmatprep.mubr.msk.f32.mxu1 %vm5317_vm0, %v5318_v1 }
 0xe35   :  { %4842 = vmatprep.subr.bf16.mxu1 %v5316_v0 }
 0xe38   :  { %4844 = vmatpush3.bf16.msra.mxu1 %v5455_v12 }
 0xe39   :  { %4853 = vmatprep.subr.bf16.mxu1 %v5316_v0 }
 0xf06   :  { %v799_v14 = vpop.f32.mrb[4].mxu1 }
 0xf07   :  { %v803_v15 = vadd.f32 %v799_v14, %v5497_v26  ;;  %v4436_v16 = vpop.f32.mrb[5].mxu1 }
 0xf09   :  { %v4046_v17 = vmul.f32 -1.442695, %v803_v15 }
 0xf0b   :  { %5059 = vpow2.f32 %v4046_v17 }
 0xf0c   :  { %5061 = vtanh.f32 %v803_v15 }
 0xf15   :  { %v5060_v18 = vpop.eup %5059 }
 0xf16   :  { %v808_v19 = vadd.f32 1.0, %v5060_v18  ;;  %v5062_v8 = vpop.eup %5061 }
 0xf18   :  { %5063 = vrcp.f32 %v808_v19 }
 0xf22   :  { %v5064_v20 = vpop.eup %5063 }
 0xf23   :  { %v811_v21 = vsel %vm5509_vm5, %v5062_v8, %v5064_v20 }
 0xf24   :  { %814 = vrot.lane.b32.xlu0 %v811_v21, %s5319_s4  ;;  %v812_v25 = vmul.f32 %v811_v21, %v721_v6 }
 0xf96   :  { %v815_v12 = vpop.permute.xlu0 %814 }
 0xf97   :  { %v817_v23 = vmul.f32 %v815_v12, %v811_v21 }
 0xf99   :  { %819 = vrot.lane.b32.xlu1 %v817_v23, %s5319_s4 }
0x100b   :  { %v820_v26 = vpop.permute.xlu1 %819 }
0x100c   :  { %v822_v27 = vadd.f32 %v820_v26, %v812_v25 }
0x100e   :  { %5065 = vtanh.f32 %v822_v27 }
0x1018   :  { %v5066_v33 = vpop.eup %5065 }
0x1019   :  { %825 = vrot.lane.b32.xlu0 %v5066_v33, %s5319_s4 }
0x108b   :  { %v826_v34 = vpop.permute.xlu0 %825 }
0x108c   :  { %v828_v36 = vmul.f32 %v826_v34, %v811_v21 }
0x108e   :  { %830 = vrot.lane.b32.xlu1 %v828_v36, %s5320_s2 }
0x1100   :  { %v831_v40 = vpop.permute.xlu1 %830 }
0x1101   :  { %4446 = vmatmul.mubr.msk.f32.vlgmr.msra.gmra.mrb[14].mxu0 %vm219_vm6, %v831_v40 }
0x1102   :  { %4848 = vmatpush3.bf16.msra.mxu0 %v4845_v31  ;;  %4467 = vmatprep.mubr.msk.f32.mxu0 %vm219_vm6, %v5519_v54 }
0x1103   :  { %4850 = vmatprep.subr.bf16.mxu0 %v4849_v39 }
0x1106   :  { %4852 = vmatpush3.bf16.msra.mxu0 %v4849_v39 }
0x1107   :  { %4865 = vmatprep.subr.bf16.mxu0 %v5316_v0 }
0x1109   :  { %4468 = vmatmul.mubr.msk.f32.vlgmr.msra.gmra.mrb[16].mxu0 %vm219_vm6, %v5535_v11 }
0x110a   :  { %4470 = vmatprep.mubr.msk.f32.mxu0 %vm219_vm6, %v5552_v35  ;;  %4867 = vmatpush3.bf16.msra.mxu0 %v5648_v62 }
0x110b   :  { %4868 = vmatprep.subr.bf16.mxu0 %v5316_v0 }
0x110d   :  { %4471 = vmatmul.mubr.msk.f32.gmra.mrb[18].mxu0 %vm219_vm6, %v5569_v55 }
0x110e   :  { %4473 = vmatprep.mubr.msk.f32.mxu0 %vm219_vm6, %v730_v13  ;;  %4870 = vmatpush3.bf16.msra.mxu0 %v5658_v3 }
0x110f   :  { %4877 = vmatprep.subr.bf16.mxu0 %v5316_v0 }
0x1111   :  { %4474 = vmatmul.mubr.msk.f32.gmra.mrb[20].mxu0 %vm219_vm6, %v831_v40 }
0x11d4   :  { %v900_v43 = vpop.f32.mrb[14].mxu0 }
0x11d5   :  { %v904_v54 = vadd.f32 %v900_v43, %v5503_v32  ;;  %v4447_v44 = vpop.f32.mrb[15].mxu0 }
0x11d7   :  { %v4048_v45 = vmul.f32 -1.442695, %v904_v54 }
0x11d9   :  { %5067 = vpow2.f32 %v4048_v45 }
0x11da   :  { %5069 = vtanh.f32 %v904_v54 }
0x11dc   :  { %v5624_v46 = vpop.f32.mrb[16].mxu0 }
0x11dd   :  { %v1117_v47 = vpop.f32.mrb[17].mxu0 }
0x11de   :  { %v1118_v13 = vadd.f32 %v5682_v10, %v1117_v47 }
0x11e0   :  { %v5626_v11 = vpop.f32.mrb[18].mxu0 }
0x11e1   :  { %v5628_v48 = vpop.f32.mrb[19].mxu0 }
0x11e3   :  { %v5068_v35 = vpop.eup %5067 }
0x11e4   :  { %v909_v49 = vadd.f32 1.0, %v5068_v35  ;;  %v5630_v22 = vpop.f32.mrb[20].mxu0  ;;  %v5070_v51 = vpop.eup %5069 }
0x11e5   :  { %v5632_v50 = vpop.f32.mrb[21].mxu0 }
0x11e6   :  { %5071 = vrcp.f32 %v909_v49 }
0x11f0   :  { %v5072_v32 = vpop.eup %5071 }
0x11f1   :  { %v912_v52 = vsel %vm5509_vm5, %v5070_v51, %v5072_v32  ;;  %v1123_v51 = vadd.f32 %v5624_v46, %v5682_v10 }
0x11f2   :  { %915 = vrot.lane.b32.xlu0 %v912_v52, %s5319_s4  ;;  %v913_v56 = vmul.f32 %v912_v52, %v822_v27 }
0x1264   :  { %v916_v53 = vpop.permute.xlu0 %915 }
0x1265   :  { %v918_v55 = vmul.f32 %v916_v53, %v912_v52 }
0x1267   :  { %920 = vrot.lane.b32.xlu1 %v918_v55, %s5319_s4 }
0x12d9   :  { %v921_v57 = vpop.permute.xlu1 %920 }
0x12da   :  { %v5638_v58 = vadd.f32 %v921_v57, %v913_v56 }
0x12dc   :  { %5073 = vtanh.f32 %v5638_v58 }
0x12e6   :  { %v5074_v59 = vpop.eup %5073 }
0x12e7   :  { %926 = vrot.lane.b32.xlu0 %v5074_v59, %s5319_s4 }
0x1359   :  { %v927_v4 = vpop.permute.xlu0 %926 }
0x135a   :  { %v929_v5 = vmul.f32 %v927_v4, %v912_v52 }
0x135c   :  { %931 = vrot.lane.b32.xlu1 %v929_v5, %s5320_s2 }
0x13ce   :  { %v932_v28 = vpop.permute.xlu1 %931 }
0x13cf   :  { %4457 = vmatmul.mubr.msk.f32.vlgmr.msra.gmra.mrb[6].mxu1 %vm219_vm6, %v932_v28  ;;  %4476 = vmatprep.mubr.msk.f32.mxu0 %vm219_vm6, %v932_v28 }
0x13d0   :  { %4855 = vmatpush3.bf16.msra.mxu1 %v5648_v62  ;;  %4487 = vmatprep.mubr.msk.f32.mxu1 %vm5317_vm0, %v5318_v1 }
0x13d1   :  { %4856 = vmatprep.subr.bf16.mxu1 %v5316_v0 }
0x13d4   :  { %4858 = vmatpush3.bf16.msra.mxu1 %v5658_v3 }
0x13d5   :  { %4859 = vmatprep.subr.bf16.mxu1 %v5316_v0 }
0x13d7   :  { %4488 = vmatmul.mubr.f32.vlgmr.msra.gmra.mrb[8].mxu1 %v5318_v1 }
0x13d8   :  { %4861 = vmatpush3.bf16.msra.mxu1 %v5648_v62  ;;  %4498 = vmatprep.mubr.msk.f32.mxu1 %vm5317_vm0, %v5318_v1 }
0x13d9   :  { %4862 = vmatprep.subr.bf16.mxu1 %v5316_v0 }
0x13dc   :  { %4864 = vmatpush3.bf16.msra.mxu1 %v5658_v3 }
0x13dd   :  { %4871 = vmatprep.subr.bf16.mxu1 %v5316_v0 }
0x14a2   :  { %v1001_v6 = vpop.f32.mrb[6].mxu1 }
0x14a3   :  { %v1005_v7 = vadd.f32 %v1001_v6, %v5501_v30  ;;  %v4458_v9 = vpop.f32.mrb[7].mxu1 }
0x14a5   :  { %v4050_v23 = vmul.f32 -1.442695, %v1005_v7 }
0x14aa   :  { %v1222_v14 = vpop.f32.mrb[8].mxu1 }
0x14ab   :  { %v1226_v15 = vadd.f32 %v1222_v14, %v1118_v13  ;;  %v4489_v16 = vpop.f32.mrb[9].mxu1 }
0x14ad   :  { %v4060_v17 = vmul.f32 -1.442695, %v1226_v15 }
0x14af   :  { %5075 = vpow2.f32 %v4060_v17 }
0x14b0   :  { %5077 = vtanh.f32 %v1226_v15  ;;  %v1128_v15 = vadd.f32 %v5682_v10, %v5628_v48 }
0x14b9   :  { %v5076_v18 = vpop.eup %5075 }
0x14ba   :  { %v1231_v19 = vadd.f32 1.0, %v5076_v18  ;;  %v5078_v8 = vpop.eup %5077 }
0x14bc   :  { %5079 = vrcp.f32 %v1231_v19 }
0x14bd   :  { %5081 = vpow2.f32 %v4050_v23 }
0x14c6   :  { %v5080_v20 = vpop.eup %5079 }
0x14c7   :  { %v1234_v30 = vsel %vm5509_vm5, %v5078_v8, %v5080_v20  ;;  %v5082_v25 = vpop.eup %5081 }
0x14c8   :  { %1237 = vrot.lane.b32.xlu0 %v1234_v30, %s5319_s4  ;;  %v1235_v26 = vmul.f32 0.0, %v1234_v30  ;;  %v1010_v27 = vadd.f32 1.0, %v5082_v25 }
0x153a   :  { %v1238_v21 = vpop.permute.xlu0 %1237 }
0x153b   :  { %v1240_v12 = vmul.f32 %v1238_v21, %v1234_v30 }
0x153d   :  { %1242 = vrot.lane.b32.xlu1 %v1240_v12, %s5319_s4 }
0x15af   :  { %v1243_v24 = vpop.permute.xlu1 %1242 }
0x15b0   :  { %v1245_v29 = vadd.f32 %v1243_v24, %v1235_v26 }
0x15b2   :  { %5083 = vtanh.f32 %v1245_v29 }
0x15b3   :  { %5085 = vrcp.f32 %v1010_v27 }
0x15b4   :  { %5087 = vtanh.f32 %v1005_v7 }
0x15bc   :  { %v5084_v31 = vpop.eup %5083 }
0x15bd   :  { %v5086_v33 = vpop.eup %5085  ;;  %1248 = vrot.lane.b32.xlu0 %v5084_v31, %s5319_s4 }
0x15be   :  { %v5088_v34 = vpop.eup %5087 }
0x15bf   :  { %v1013_v36 = vsel %vm5509_vm5, %v5088_v34, %v5086_v33  ;;  %v1133_v34 = vadd.f32 %v5626_v11, %v5682_v10 }
0x15c0   :  { %v1014_v54 = vmul.f32 %v1013_v36, %v5638_v58 }
0x15c1   :  { %1016 = vrot.lane.b32.xlu0 %v1013_v36, %s5319_s4 }
0x162f   :  { %v1249_v37 = vpop.permute.xlu0 %1248 }
0x1630   :  { %v1251_v38 = vmul.f32 %v1249_v37, %v1234_v30 }
0x1632   :  { %1253 = vrot.lane.b32.xlu1 %v1251_v38, %s5320_s2 }
0x1633   :  { %v1017_v39 = vpop.permute.xlu0 %1016 }
0x1634   :  { %v1019_v40 = vmul.f32 %v1017_v39, %v1013_v36 }
0x1636   :  { %1021 = vrot.lane.b32.xlu0 %v1019_v40, %s5319_s4 }
0x16a4   :  { %v1254_v43 = vpop.permute.xlu1 %1253 }
0x16a5   :  { %4499 = vmatmul.mubr.msk.f32.vlgmr.msra.gmra.mrb[10].mxu1 %vm219_vm6, %v1254_v43 }
0x16a6   :  { %4873 = vmatpush3.bf16.msra.mxu1 %v5648_v62  ;;  %4520 = vmatprep.mubr.msk.f32.mxu1 %vm5317_vm0, %v5318_v1 }
0x16a7   :  { %4874 = vmatprep.subr.bf16.mxu1 %v5316_v0 }
0x16a8   :  { %v1022_v44 = vpop.permute.xlu0 %1021 }
0x16a9   :  { %v5701_v45 = vadd.f32 %v1022_v44, %v1014_v54 }
0x16aa   :  { %4876 = vmatpush3.bf16.msra.mxu1 %v5658_v3 }
0x16ab   :  { %5089 = vtanh.f32 %v5701_v45  ;;  %4883 = vmatprep.subr.bf16.mxu1 %v5316_v0 }
0x16b5   :  { %v5090_v47 = vpop.eup %5089 }
0x16b6   :  { %1027 = vrot.lane.b32.xlu0 %v5090_v47, %s5319_s4 }
0x1728   :  { %v1028_v35 = vpop.permute.xlu0 %1027 }
0x1729   :  { %v1030_v49 = vmul.f32 %v1028_v35, %v1013_v36 }
0x172b   :  { %1047 = vrot.lane.b32.xlu0 %v1030_v49, %s5320_s2 }
0x1778   :  { %v1323_v32 = vpop.f32.mrb[10].mxu1 }
0x1779   :  { %v1327_v52 = vadd.f32 %v1323_v32, %v1123_v51  ;;  %v4500_v53 = vpop.f32.mrb[11].mxu1 }
0x177b   :  { %v4062_v55 = vmul.f32 -1.442695, %v1327_v52 }
0x177d   :  { %5091 = vpow2.f32 %v4062_v55 }
0x177e   :  { %5093 = vtanh.f32 %v1327_v52 }
0x1787   :  { %v5092_v56 = vpop.eup %5091 }
0x1788   :  { %v1332_v57 = vadd.f32 1.0, %v5092_v56  ;;  %v5094_v58 = vpop.eup %5093 }
0x178a   :  { %5095 = vrcp.f32 %v1332_v57  ;;  %v1138_v57 = vadd.f32 %v5682_v10, %v5632_v50 }
0x1794   :  { %v5096_v59 = vpop.eup %5095 }
0x1795   :  { %v1335_v60 = vsel %vm5509_vm5, %v5094_v58, %v5096_v59 }
0x1796   :  { %1338 = vrot.lane.b32.xlu1 %v1335_v60, %s5319_s4  ;;  %v1336_v5 = vmul.f32 %v1335_v60, %v1245_v29 }
0x179d   :  { %v5713_v61 = vpop.permute.xlu0 %1047 }
0x179e   :  { %4477 = vmatmul.mubr.msk.f32.gmra.mrb[22].mxu0 %vm219_vm6, %v5713_v61 }
0x179f   :  { %4509 = vmatprep.mubr.msk.f32.mxu0 %vm5317_vm0, %v5318_v1 }
0x1808   :  { %v1339_v46 = vpop.permute.xlu1 %1338 }
0x1809   :  { %v1341_v63 = vmul.f32 %v1339_v46, %v1335_v60 }
0x180b   :  { %1343 = vrot.lane.b32.xlu1 %v1341_v63, %s5319_s4 }
0x1871   :  { %v5720_v2 = vpop.f32.mrb[22].mxu0 }
0x1872   :  { %v5722_v4 = vpop.f32.mrb[23].mxu0 }
0x187d   :  { %v1344_v28 = vpop.permute.xlu1 %1343 }
0x187e   :  { %v1346_v6 = vadd.f32 %v1344_v28, %v1336_v5 }
0x1880   :  { %5097 = vtanh.f32 %v1346_v6 }
0x188a   :  { %v5098_v7 = vpop.eup %5097 }
0x188b   :  { %1349 = vrot.lane.b32.xlu1 %v5098_v7, %s5319_s4 }
0x18fd   :  { %v1350_v9 = vpop.permute.xlu1 %1349 }
0x18fe   :  { %v1352_v13 = vmul.f32 %v1350_v9, %v1335_v60 }
0x1900   :  { %1354 = vrot.lane.b32.xlu1 %v1352_v13, %s5320_s2 }
0x1972   :  { %v1355_v14 = vpop.permute.xlu1 %1354 }
0x1973   :  { %4510 = vmatmul.mubr.msk.f32.vlgmr.msra.gmra.mrb[24].mxu0 %vm219_vm6, %v1355_v14 }
0x1974   :  { %4879 = vmatpush3.bf16.msra.mxu0 %v5648_v62  ;;  %4531 = vmatprep.mubr.msk.f32.mxu0 %vm5317_vm0, %v5318_v1 }
0x1975   :  { %4880 = vmatprep.subr.bf16.mxu0 %v5316_v0 }
0x1978   :  { %4882 = vmatpush3.bf16.msra.mxu0 %v5658_v3 }
0x1979   :  { %4889 = vmatprep.subr.bf16.mxu0 %v5316_v0 }
0x1a46   :  { %v1424_v16 = vpop.f32.mrb[24].mxu0 }
0x1a47   :  { %v1428_v17 = vadd.f32 %v1424_v16, %v1128_v15  ;;  %v4511_v18 = vpop.f32.mrb[25].mxu0 }
0x1a49   :  { %v4064_v19 = vmul.f32 -1.442695, %v1428_v17 }
0x1a4b   :  { %5099 = vpow2.f32 %v4064_v19 }
0x1a4c   :  { %5101 = vtanh.f32 %v1428_v17 }
0x1a55   :  { %v5100_v8 = vpop.eup %5099 }
0x1a56   :  { %v1433_v20 = vadd.f32 1.0, %v5100_v8  ;;  %v5102_v30 = vpop.eup %5101  ;;  %v1143_v8 = vadd.f32 %v5630_v22, %v5682_v10 }
0x1a58   :  { %5103 = vrcp.f32 %v1433_v20 }
0x1a62   :  { %v5104_v21 = vpop.eup %5103 }
0x1a63   :  { %v1436_v12 = vsel %vm5509_vm5, %v5102_v30, %v5104_v21 }
0x1a64   :  { %1439 = vrot.lane.b32.xlu0 %v1436_v12, %s5319_s4  ;;  %v1437_v48 = vmul.f32 %v1436_v12, %v1346_v6 }
0x1ad6   :  { %v1440_v23 = vpop.permute.xlu0 %1439 }
0x1ad7   :  { %v1442_v25 = vmul.f32 %v1440_v23, %v1436_v12 }
0x1ad9   :  { %1444 = vrot.lane.b32.xlu1 %v1442_v25, %s5319_s4 }
0x1b4b   :  { %v1445_v26 = vpop.permute.xlu1 %1444 }
0x1b4c   :  { %v1447_v27 = vadd.f32 %v1445_v26, %v1437_v48 }
0x1b4e   :  { %5105 = vtanh.f32 %v1447_v27 }
0x1b58   :  { %v5106_v24 = vpop.eup %5105 }
0x1b59   :  { %1450 = vrot.lane.b32.xlu0 %v5106_v24, %s5319_s4 }
0x1bcb   :  { %v1451_v29 = vpop.permute.xlu0 %1450 }
0x1bcc   :  { %v1453_v31 = vmul.f32 %v1451_v29, %v1436_v12 }
0x1bce   :  { %1455 = vrot.lane.b32.xlu1 %v1453_v31, %s5320_s2 }
0x1c40   :  { %v1456_v33 = vpop.permute.xlu1 %1455 }
0x1c41   :  { %4521 = vmatmul.mubr.msk.f32.vlgmr.msra.gmra.mrb[12].mxu1 %vm219_vm6, %v1456_v33 }
0x1c42   :  { %4885 = vmatpush3.bf16.msra.mxu1 %v5648_v62  ;;  %4542 = vmatprep.mubr.msk.f32.mxu1 %vm5317_vm0, %v5318_v1 }
0x1c43   :  { %4886 = vmatprep.subr.bf16.mxu1 %v5316_v0 }
0x1c46   :  { %4888 = vmatpush3.bf16.msra.mxu1 %v5658_v3 }
0x1c47   :  { %4895 = vmatprep.subr.bf16.mxu1 %v5316_v0 }
0x1d14   :  { %v1525_v36 = vpop.f32.mrb[12].mxu1 }
0x1d15   :  { %v1529_v37 = vadd.f32 %v1525_v36, %v1133_v34  ;;  %v4522_v38 = vpop.f32.mrb[13].mxu1 }
0x1d17   :  { %v4066_v39 = vmul.f32 -1.442695, %v1529_v37 }
0x1d19   :  { %5107 = vpow2.f32 %v4066_v39 }
0x1d1a   :  { %5109 = vtanh.f32 %v1529_v37  ;;  %v1148_v37 = vadd.f32 %v5682_v10, %v5722_v4 }
0x1d23   :  { %v5108_v40 = vpop.eup %5107 }
0x1d24   :  { %v1534_v43 = vadd.f32 1.0, %v5108_v40  ;;  %v5110_v54 = vpop.eup %5109 }
0x1d26   :  { %5111 = vrcp.f32 %v1534_v43 }
0x1d30   :  { %v5112_v44 = vpop.eup %5111 }
0x1d31   :  { %v1537_v47 = vsel %vm5509_vm5, %v5110_v54, %v5112_v44 }
0x1d32   :  { %1540 = vrot.lane.b32.xlu0 %v1537_v47, %s5319_s4  ;;  %v1538_v11 = vmul.f32 %v1537_v47, %v1447_v27 }
0x1da4   :  { %v1541_v35 = vpop.permute.xlu0 %1540 }
0x1da5   :  { %v1543_v49 = vmul.f32 %v1541_v35, %v1537_v47 }
0x1da7   :  { %1545 = vrot.lane.b32.xlu1 %v1543_v49, %s5319_s4 }
0x1e19   :  { %v1546_v51 = vpop.permute.xlu1 %1545 }
0x1e1a   :  { %v1548_v32 = vadd.f32 %v1546_v51, %v1538_v11 }
0x1e1c   :  { %5113 = vtanh.f32 %v1548_v32 }
0x1e26   :  { %v5114_v52 = vpop.eup %5113 }
0x1e27   :  { %1551 = vrot.lane.b32.xlu0 %v5114_v52, %s5319_s4 }
0x1e99   :  { %v1552_v53 = vpop.permute.xlu0 %1551 }
0x1e9a   :  { %v1554_v55 = vmul.f32 %v1552_v53, %v1537_v47 }
0x1e9c   :  { %1556 = vrot.lane.b32.xlu1 %v1554_v55, %s5320_s2  ;;  %v1968_v55 = vld [vmem:[%s6306_s9] sm:$0xff] }
0x1f0e   :  { %v1557_v56 = vpop.permute.xlu1 %1556 }
0x1f0f   :  { %4532 = vmatmul.mubr.msk.f32.vlgmr.msra.gmra.mrb[26].mxu0 %vm219_vm6, %v1557_v56  ;;  %v1969_v56 = vld [vmem:[%s6306_s9 + $0x8] sm:$0xff] }
0x1f10   :  { %4891 = vmatpush3.bf16.msra.mxu0 %v5648_v62  ;;  %4553 = vmatprep.mubr.msk.f32.mxu0 %vm5317_vm0, %v5318_v1 }
0x1f11   :  { %4892 = vmatprep.subr.bf16.mxu0 %v5316_v0 }
0x1f14   :  { %4894 = vmatpush3.bf16.msra.mxu0 %v5658_v3 }
0x1fe2   :  { %v1626_v58 = vpop.f32.mrb[26].mxu0 }
0x1fe3   :  { %v1630_v59 = vadd.f32 %v1626_v58, %v1138_v57  ;;  %v4533_v60 = vpop.f32.mrb[27].mxu0  ;;  %v1967_v57 = vld [vmem:[%s6305_s8] sm:$0xf] }
0x1fe4   :  { %4567 = vmatprep.subr.msk.mxu0 %vm2004_vm7, %v1967_v57  ;;  %v1959_v58 = vld [vmem:[%s6298_s1] sm:$0xff]  ;;  %v1960_v60 = vld [vmem:[%s6298_s1 + $0x8] sm:$0xff] }
0x1fe5   :  { %v4068_v46 = vmul.f32 -1.442695, %v1630_v59 }
0x1fe7   :  { %5115 = vpow2.f32 %v4068_v46  ;;  %v1970_v46 = vld [vmem:[%s6306_s9 + $0x10] sm:$0xff] }
0x1fe8   :  { %5117 = vtanh.f32 %v1630_v59  ;;  %v5808_v59 = vpack.c.bf16 %v1969_v56, %v1968_v55 }
0x1ff1   :  { %v5116_v63 = vpop.eup %5115 }
0x1ff2   :  { %v1635_v5 = vadd.f32 1.0, %v5116_v63  ;;  %v5118_v28 = vpop.eup %5117  ;;  %v1971_v63 = vld [vmem:[%s6306_s9 + $0x18] sm:$0xff] }
0x1ff4   :  { %5119 = vrcp.f32 %v1635_v5  ;;  %v5824_v5 = vpack.c.bf16 %v1971_v63, %v1970_v46 }
0x1ffe   :  { %v5120_v6 = vpop.eup %5119 }
0x1fff   :  { %v1638_v7 = vsel %vm5509_vm5, %v5118_v28, %v5120_v6 }
0x2000   :  { %1641 = vrot.lane.b32.xlu0 %v1638_v7, %s5319_s4  ;;  %v1639_v50 = vmul.f32 %v1638_v7, %v1548_v32 }
0x2072   :  { %v1642_v9 = vpop.permute.xlu0 %1641 }
0x2073   :  { %v1644_v13 = vmul.f32 %v1642_v9, %v1638_v7 }
0x2075   :  { %1646 = vrot.lane.b32.xlu1 %v1644_v13, %s5319_s4 }
0x20e7   :  { %v1647_v14 = vpop.permute.xlu1 %1646 }
0x20e8   :  { %v1649_v15 = vadd.f32 %v1647_v14, %v1639_v50  ;;  %v1153_v50 = vadd.f32 %v5720_v2, %v5682_v10 }
0x20ea   :  { %5121 = vtanh.f32 %v1649_v15 }
0x20f4   :  { %v5122_v16 = vpop.eup %5121 }
0x20f5   :  { %1652 = vrot.lane.b32.xlu0 %v5122_v16, %s5319_s4  ;;  %v5851_v16 = vld [vmem:[%s6307_s10] ss:$0 sm:$0xff] }
0x2167   :  { %v1653_v17 = vpop.permute.xlu0 %1652 }
0x2168   :  { %v1655_v18 = vmul.f32 %v1653_v17, %v1638_v7 }
0x216a   :  { %1657 = vrot.lane.b32.xlu1 %v1655_v18, %s5320_s2 }
0x21dc   :  { %v1658_v19 = vpop.permute.xlu1 %1657 }
0x21dd   :  { %4543 = vmatmul.mubr.msk.f32.vlgmr.msra.gmra.mrb[14].mxu1 %vm219_vm6, %v1658_v19 }
0x21de   :  { %4897 = vmatpush3.bf16.msra.mxu1 %v5648_v62  ;;  %4564 = vmatprep.mubr.msk.f32.mxu1 %vm5317_vm0, %v5318_v1 }
0x21df   :  { %4898 = vmatprep.subr.bf16.mxu1 %v5316_v0 }
0x21e2   :  { %4900 = vmatpush3.bf16.msra.mxu1 %v5658_v3 }
0x21e3   :  { %4901 = vmatprep.subr.bf16.mxu1 %v5316_v0 }
0x22b0   :  { %v1727_v20 = vpop.f32.mrb[14].mxu1 }
0x22b1   :  { %v1731_v30 = vadd.f32 %v1727_v20, %v1143_v8  ;;  %v4544_v21 = vpop.f32.mrb[15].mxu1 }
0x22b3   :  { %v4070_v12 = vmul.f32 -1.442695, %v1731_v30 }
0x22b5   :  { %5123 = vpow2.f32 %v4070_v12 }
0x22b6   :  { %5125 = vtanh.f32 %v1731_v30 }
0x22bf   :  { %v5124_v23 = vpop.eup %5123 }
0x22c0   :  { %v1736_v25 = vadd.f32 1.0, %v5124_v23  ;;  %v5126_v62 = vpop.eup %5125 }
0x22c2   :  { %5127 = vrcp.f32 %v1736_v25 }
0x22cc   :  { %v5128_v48 = vpop.eup %5127 }
0x22cd   :  { %v1739_v26 = vsel %vm5509_vm5, %v5126_v62, %v5128_v48 }
0x22ce   :  { %1742 = vrot.lane.b32.xlu0 %v1739_v26, %s5319_s4  ;;  %v1740_v22 = vmul.f32 %v1739_v26, %v1649_v15 }
0x2340   :  { %v1743_v3 = vpop.permute.xlu0 %1742 }
0x2341   :  { %v1745_v27 = vmul.f32 %v1743_v3, %v1739_v26  ;;  %v1961_v3 = vld [vmem:[%s6298_s1 + $0x10] sm:$0xff] }
0x2343   :  { %1747 = vrot.lane.b32.xlu1 %v1745_v27, %s5319_s4  ;;  %v1962_v27 = vld [vmem:[%s6298_s1 + $0x18] sm:$0xff] }
0x23b5   :  { %v1748_v24 = vpop.permute.xlu1 %1747 }
0x23b6   :  { %v1750_v29 = vadd.f32 %v1748_v24, %v1740_v22  ;;  %v1963_v22 = vld [vmem:[%s6298_s1 + $0x20] sm:$0xff]  ;;  %v1965_v24 = vld [vmem:[%s6298_s1 + $0x30] sm:$0xff] }
0x23b8   :  { %5129 = vtanh.f32 %v1750_v29 }
0x23c2   :  { %v5130_v31 = vpop.eup %5129 }
0x23c3   :  { %1753 = vrot.lane.b32.xlu0 %v5130_v31, %s5319_s4 }
0x2435   :  { %v1754_v33 = vpop.permute.xlu0 %1753 }
0x2436   :  { %v1756_v34 = vmul.f32 %v1754_v33, %v1739_v26 }
0x2438   :  { %1758 = vrot.lane.b32.xlu1 %v1756_v34, %s5320_s2 }
0x24aa   :  { %v1759_v36 = vpop.permute.xlu1 %1758 }
0x24ab   :  { %4554 = vmatmul.mubr.msk.f32.vlgmr.msra.gmra.mrb[28].mxu0 %vm219_vm6, %v1759_v36 }
0x24ac   :  { %4568 = vmatpush3.msk.msra.mxu0 %vm2004_vm7, %v1967_v57  ;;  %4569 = vmatprep.mubr.msk.f32.mxu0 %vm1979_vm8, %v1959_v58 }
0x24ad   :  { %4907 = vmatprep.subr.bf16.mxu0 %v5316_v0 }
0x24af   :  { %4570 = vmatmul.mubr.msk.f32.vlgmr.msra.gmra.mrb[30].mxu0 %vm1979_vm8, %v1960_v60 }
0x24b0   :  { %4909 = vmatpush3.bf16.msra.mxu0 %v5808_v59  ;;  %4572 = vmatprep.mubr.msk.f32.mxu0 %vm1979_vm8, %v1961_v3 }
0x24b1   :  { %4910 = vmatprep.subr.bf16.mxu0 %v5316_v0 }
0x24b3   :  { %4573 = vmatmul.mubr.msk.f32.gmra.mrb[32].mxu0 %vm1979_vm8, %v1962_v27 }
0x24b4   :  { %4912 = vmatpush3.bf16.msra.mxu0 %v5824_v5  ;;  %4575 = vmatprep.mubr.msk.f32.mxu0 %vm1979_vm8, %v1963_v22 }
0x24b5   :  { %4919 = vmatprep.subr.bf16.mxu0 %v5316_v0 }
0x257e   :  { %v1828_v38 = vpop.f32.mrb[28].mxu0 }
0x257f   :  { %v1832_v39 = vadd.f32 %v1828_v38, %v1148_v37  ;;  %v4555_v40 = vpop.f32.mrb[29].mxu0 }
0x2581   :  { %v4072_v43 = vmul.f32 -1.442695, %v1832_v39 }
0x2582   :  { %v4571_v9 = vpop.f32.mrb[30].mxu0 }
0x2583   :  { %5131 = vpow2.f32 %v4072_v43  ;;  %v2074_v13 = vpop.f32.mrb[31].mxu0 }
0x2584   :  { %5133 = vtanh.f32 %v1832_v39  ;;  %v2075_v17 = vadd.f32 %v5851_v16, %v2074_v13 }
0x2586   :  { %v5887_v36 = vpop.f32.mrb[32].mxu0 }
0x2587   :  { %v2084_v37 = vpop.f32.mrb[33].mxu0 }
0x258d   :  { %v5132_v54 = vpop.eup %5131 }
0x258e   :  { %v1837_v44 = vadd.f32 1.0, %v5132_v54  ;;  %v5134_v47 = vpop.eup %5133 }
0x2590   :  { %5135 = vrcp.f32 %v1837_v44  ;;  %v2080_v44 = vadd.f32 %v4571_v9, %v5851_v16  ;;  %v2085_v9 = vadd.f32 %v5851_v16, %v2084_v37 }
0x259a   :  { %v5136_v35 = vpop.eup %5135 }
0x259b   :  { %v1840_v49 = vsel %vm5509_vm5, %v5134_v47, %v5136_v35 }
0x259c   :  { %1843 = vrot.lane.b32.xlu0 %v1840_v49, %s5319_s4  ;;  %v1841_v4 = vmul.f32 %v1840_v49, %v1750_v29  ;;  %v1966_v29 = vld [vmem:[%s6298_s1 + $0x38] sm:$0xff] }
0x260e   :  { %v1844_v11 = vpop.permute.xlu0 %1843 }
0x260f   :  { %v1846_v51 = vmul.f32 %v1844_v11, %v1840_v49 }
0x2611   :  { %1848 = vrot.lane.b32.xlu1 %v1846_v51, %s5319_s4 }
0x2683   :  { %v1849_v32 = vpop.permute.xlu1 %1848 }
0x2684   :  { %v5792_v52 = vadd.f32 %v1849_v32, %v1841_v4 }
0x2686   :  { %5137 = vtanh.f32 %v5792_v52 }
0x2690   :  { %v5138_v53 = vpop.eup %5137 }
0x2691   :  { %1854 = vrot.lane.b32.xlu0 %v5138_v53, %s5319_s4 }
0x2703   :  { %v1855_v28 = vpop.permute.xlu0 %1854 }
0x2704   :  { %v1857_v6 = vmul.f32 %v1855_v28, %v1840_v49 }
0x2706   :  { %1859 = vrot.lane.b32.xlu1 %v1857_v6, %s5320_s2 }
0x2778   :  { %v1860_v7 = vpop.permute.xlu1 %1859 }
0x2779   :  { %4565 = vmatmul.mubr.msk.f32.vlgmr.msra.gmra.mrb[16].mxu1 %vm219_vm6, %v1860_v7 }
0x277a   :  { %4903 = vmatpush3.bf16.msra.mxu1 %v5808_v59  ;;  %4589 = vmatprep.mubr.msk.f32.mxu1 %vm5317_vm0, %v5318_v1 }
0x277b   :  { %4904 = vmatprep.subr.bf16.mxu1 %v5316_v0 }
0x277e   :  { %4906 = vmatpush3.bf16.msra.mxu1 %v5824_v5 }
0x277f   :  { %4913 = vmatprep.subr.bf16.mxu1 %v5316_v0 }
0x2781   :  { %4590 = vmatmul.mubr.msk.f32.vlgmr.msra.gmra.mrb[18].mxu1 %vm219_vm6, %v5713_v61 }
0x2782   :  { %4915 = vmatpush3.bf16.msra.mxu1 %v5808_v59  ;;  %4611 = vmatprep.mubr.msk.f32.mxu1 %vm5317_vm0, %v5318_v1 }
0x2783   :  { %4916 = vmatprep.subr.bf16.mxu1 %v5316_v0 }
0x2786   :  { %4918 = vmatpush3.bf16.msra.mxu1 %v5824_v5 }
0x2787   :  { %4925 = vmatprep.subr.bf16.mxu1 %v5316_v0 }
0x284c   :  { %v1929_v14 = vpop.f32.mrb[16].mxu1 }
0x284d   :  { %v5846_v15 = vadd.f32 %v1929_v14, %v1153_v50  ;;  %v4566_v61 = vpop.f32.mrb[17].mxu1 }
0x2854   :  { %v2179_v18 = vpop.f32.mrb[18].mxu1 }
0x2855   :  { %v2183_v19 = vadd.f32 %v2179_v18, %v2075_v17  ;;  %v4591_v8 = vpop.f32.mrb[19].mxu1 }
0x2857   :  { %v4086_v20 = vmul.f32 -1.442695, %v2183_v19 }
0x2859   :  { %5139 = vpow2.f32 %v4086_v20 }
0x285a   :  { %5141 = vtanh.f32 %v2183_v19 }
0x2863   :  { %v5140_v30 = vpop.eup %5139 }
0x2864   :  { %v2188_v21 = vadd.f32 1.0, %v5140_v30  ;;  %v5142_v10 = vpop.eup %5141 }
0x2866   :  { %5143 = vrcp.f32 %v2188_v21 }
0x2870   :  { %v5144_v2 = vpop.eup %5143 }
0x2871   :  { %v2191_v12 = vsel %vm5509_vm5, %v5142_v10, %v5144_v2 }
0x2872   :  { %2194 = vrot.lane.b32.xlu0 %v2191_v12, %s5319_s4  ;;  %v2192_v62 = vmul.f32 %v2191_v12, %v5701_v45  ;;  %v1964_v45 = vld [vmem:[%s6298_s1 + $0x28] sm:$0xff] }
0x2873   :  { %4576 = vmatmul.mubr.msk.f32.gmra.mrb[34].mxu0 %vm1979_vm8, %v1964_v45 }
0x2874   :  { %4578 = vmatprep.mubr.msk.f32.mxu0 %vm1979_vm8, %v1965_v24 }
0x2877   :  { %4579 = vmatmul.mubr.msk.f32.gmra.mrb[36].mxu0 %vm1979_vm8, %v1966_v29 }
0x2878   :  { %4600 = vmatprep.mubr.msk.f32.mxu0 %vm5317_vm0, %v5318_v1 }
0x28e4   :  { %v2195_v23 = vpop.permute.xlu0 %2194 }
0x28e5   :  { %v2197_v25 = vmul.f32 %v2195_v23, %v2191_v12 }
0x28e7   :  { %2199 = vrot.lane.b32.xlu1 %v2197_v25, %s5319_s4 }
0x2946   :  { %v5889_v38 = vpop.f32.mrb[34].mxu0 }
0x2947   :  { %v5891_v39 = vpop.f32.mrb[35].mxu0 }
0x294a   :  { %v5893_v40 = vpop.f32.mrb[36].mxu0 }
0x294b   :  { %v5895_v43 = vpop.f32.mrb[37].mxu0 }
0x2959   :  { %v2200_v48 = vpop.permute.xlu1 %2199 }
0x295a   :  { %v2202_v26 = vadd.f32 %v2200_v48, %v2192_v62 }
0x295c   :  { %5145 = vtanh.f32 %v2202_v26 }
0x2966   :  { %v5146_v31 = vpop.eup %5145 }
0x2967   :  { %2205 = vrot.lane.b32.xlu0 %v5146_v31, %s5319_s4 }
0x29d9   :  { %v2206_v33 = vpop.permute.xlu0 %2205 }
0x29da   :  { %v2208_v34 = vmul.f32 %v2206_v33, %v2191_v12 }
0x29dc   :  { %2210 = vrot.lane.b32.xlu1 %v2208_v34, %s5320_s2 }
0x2a4e   :  { %v5897_v54 = vpop.permute.xlu1 %2210 }
0x2a4f   :  { %4601 = vmatmul.mubr.msk.f32.vlgmr.msra.gmra.mrb[38].mxu0 %vm219_vm6, %v5897_v54 }
0x2a50   :  { %4921 = vmatpush3.bf16.msra.mxu0 %v5808_v59  ;;  %4622 = vmatprep.mubr.msk.f32.mxu0 %vm5317_vm0, %v5318_v1 }
0x2a51   :  { %4922 = vmatprep.subr.bf16.mxu0 %v5316_v0 }
0x2a54   :  { %4924 = vmatpush3.bf16.msra.mxu0 %v5824_v5 }
0x2a55   :  { %4931 = vmatprep.subr.bf16.mxu0 %v5316_v0 }
0x2b22   :  { %v2280_v47 = vpop.f32.mrb[38].mxu0 }
0x2b23   :  { %v2284_v35 = vadd.f32 %v2280_v47, %v2080_v44  ;;  %v4602_v49 = vpop.f32.mrb[39].mxu0 }
0x2b25   :  { %v4088_v11 = vmul.f32 -1.442695, %v2284_v35 }
0x2b27   :  { %5147 = vpow2.f32 %v4088_v11 }
0x2b28   :  { %5149 = vtanh.f32 %v2284_v35 }
0x2b31   :  { %v5148_v51 = vpop.eup %5147 }
0x2b32   :  { %v2289_v4 = vadd.f32 1.0, %v5148_v51  ;;  %v5150_v32 = vpop.eup %5149 }
0x2b34   :  { %5151 = vrcp.f32 %v2289_v4 }
0x2b3e   :  { %v5152_v53 = vpop.eup %5151 }
0x2b3f   :  { %v2292_v55 = vsel %vm5509_vm5, %v5150_v32, %v5152_v53  ;;  %v2095_v32 = vadd.f32 %v5851_v16, %v5891_v39 }
0x2b40   :  { %2295 = vrot.lane.b32.xlu0 %v2292_v55, %s5319_s4  ;;  %v2293_v58 = vmul.f32 %v2292_v55, %v2202_v26  ;;  %v2090_v26 = vadd.f32 %v5887_v36, %v5851_v16 }
0x2bb2   :  { %v2296_v56 = vpop.permute.xlu0 %2295 }
0x2bb3   :  { %v2298_v57 = vmul.f32 %v2296_v56, %v2292_v55 }
0x2bb5   :  { %2300 = vrot.lane.b32.xlu1 %v2298_v57, %s5319_s4 }
0x2c27   :  { %v2301_v60 = vpop.permute.xlu1 %2300 }
0x2c28   :  { %v2303_v46 = vadd.f32 %v2301_v60, %v2293_v58 }
0x2c2a   :  { %5153 = vtanh.f32 %v2303_v46 }
0x2c34   :  { %v5154_v63 = vpop.eup %5153 }
0x2c35   :  { %2306 = vrot.lane.b32.xlu0 %v5154_v63, %s5319_s4 }
0x2ca7   :  { %v2307_v28 = vpop.permute.xlu0 %2306 }
0x2ca8   :  { %v2309_v6 = vmul.f32 %v2307_v28, %v2292_v55 }
0x2caa   :  { %2311 = vrot.lane.b32.xlu1 %v2309_v6, %s5320_s2 }
0x2d1c   :  { %v5914_v7 = vpop.permute.xlu1 %2311 }
0x2d1d   :  { %4612 = vmatmul.mubr.msk.f32.vlgmr.msra.gmra.mrb[20].mxu1 %vm219_vm6, %v5914_v7 }
0x2d1e   :  { %4927 = vmatpush3.bf16.msra.mxu1 %v5808_v59  ;;  %4633 = vmatprep.mubr.msk.f32.mxu1 %vm5317_vm0, %v5318_v1 }
0x2d1f   :  { %4928 = vmatprep.subr.bf16.mxu1 %v5316_v0 }
0x2d22   :  { %4930 = vmatpush3.bf16.msra.mxu1 %v5824_v5 }
0x2d23   :  { %4937 = vmatprep.subr.bf16.mxu1 %v5316_v0 }
0x2df0   :  { %v2381_v13 = vpop.f32.mrb[20].mxu1 }
0x2df1   :  { %v2385_v50 = vadd.f32 %v2381_v13, %v2085_v9  ;;  %v4613_v14 = vpop.f32.mrb[21].mxu1 }
0x2df3   :  { %v4090_v61 = vmul.f32 -1.442695, %v2385_v50 }
0x2df5   :  { %5155 = vpow2.f32 %v4090_v61 }
0x2df6   :  { %5157 = vtanh.f32 %v2385_v50 }
0x2dff   :  { %v5156_v17 = vpop.eup %5155 }
0x2e00   :  { %v2390_v18 = vadd.f32 1.0, %v5156_v17  ;;  %v5158_v19 = vpop.eup %5157 }
0x2e02   :  { %5159 = vrcp.f32 %v2390_v18 }
0x2e0c   :  { %v5160_v8 = vpop.eup %5159 }
0x2e0d   :  { %v2393_v20 = vsel %vm5509_vm5, %v5158_v19, %v5160_v8  ;;  %v2100_v19 = vadd.f32 %v5889_v38, %v5851_v16 }
0x2e0e   :  { %2396 = vrot.lane.b32.xlu0 %v2393_v20, %s5319_s4  ;;  %v2394_v10 = vmul.f32 %v2393_v20, %v2303_v46 }
0x2e80   :  { %v2397_v30 = vpop.permute.xlu0 %2396 }
0x2e81   :  { %v2399_v21 = vmul.f32 %v2397_v30, %v2393_v20 }
0x2e83   :  { %2401 = vrot.lane.b32.xlu1 %v2399_v21, %s5319_s4 }
0x2ef5   :  { %v2402_v2 = vpop.permute.xlu1 %2401 }
0x2ef6   :  { %v2404_v12 = vadd.f32 %v2402_v2, %v2394_v10 }
0x2ef8   :  { %5161 = vtanh.f32 %v2404_v12 }
0x2f02   :  { %v5162_v23 = vpop.eup %5161 }
0x2f03   :  { %2407 = vrot.lane.b32.xlu0 %v5162_v23, %s5319_s4 }
0x2f75   :  { %v2408_v25 = vpop.permute.xlu0 %2407 }
0x2f76   :  { %v2410_v62 = vmul.f32 %v2408_v25, %v2393_v20 }
0x2f78   :  { %2412 = vrot.lane.b32.xlu1 %v2410_v62, %s5320_s2 }
0x2fea   :  { %v5931_v48 = vpop.permute.xlu1 %2412 }
0x2feb   :  { %4623 = vmatmul.mubr.msk.f32.vlgmr.msra.gmra.mrb[40].mxu0 %vm219_vm6, %v5931_v48 }
0x2fec   :  { %4933 = vmatpush3.bf16.msra.mxu0 %v5808_v59  ;;  %4644 = vmatprep.mubr.msk.f32.mxu0 %vm5317_vm0, %v5318_v1 }
0x2fed   :  { %4934 = vmatprep.subr.bf16.mxu0 %v5316_v0 }
0x2ff0   :  { %4936 = vmatpush3.bf16.msra.mxu0 %v5824_v5 }
0x2ff1   :  { %4943 = vmatprep.subr.bf16.mxu0 %v5316_v0 }
0x30be   :  { %v2482_v3 = vpop.f32.mrb[40].mxu0 }
0x30bf   :  { %v2486_v27 = vadd.f32 %v2482_v3, %v2090_v26  ;;  %v4624_v22 = vpop.f32.mrb[41].mxu0  ;;  %v2916_v3 = vld [vmem:[%s6308_s11] sm:$0xff] }
0x30c1   :  { %v4092_v45 = vmul.f32 -1.442695, %v2486_v27 }
0x30c3   :  { %5163 = vpow2.f32 %v4092_v45 }
0x30c4   :  { %5165 = vtanh.f32 %v2486_v27  ;;  %v2917_v27 = vld [vmem:[%s6308_s11 + $0x8] sm:$0xff] }
0x30c5   :  { %v4949_v22 = vpack.c.bf16 %v2917_v27, %v2916_v3 }
0x30cd   :  { %v5164_v24 = vpop.eup %5163 }
0x30ce   :  { %v2491_v29 = vadd.f32 1.0, %v5164_v24  ;;  %v5166_v31 = vpop.eup %5165  ;;  %v4074_v24 = vmul.f32 -1.442695, %v5846_v15 }
0x30d0   :  { %5167 = vrcp.f32 %v2491_v29 }
0x30da   :  { %v5168_v33 = vpop.eup %5167 }
0x30db   :  { %v2494_v34 = vsel %vm5509_vm5, %v5166_v31, %v5168_v33 }
0x30dc   :  { %2497 = vrot.lane.b32.xlu0 %v2494_v34, %s5319_s4  ;;  %v2495_v36 = vmul.f32 %v2494_v34, %v2404_v12 }
0x314e   :  { %v2498_v37 = vpop.permute.xlu0 %2497 }
0x314f   :  { %v2500_v44 = vmul.f32 %v2498_v37, %v2494_v34 }
0x3151   :  { %2502 = vrot.lane.b32.xlu1 %v2500_v44, %s5319_s4 }
0x31c3   :  { %v2503_v47 = vpop.permute.xlu1 %2502 }
0x31c4   :  { %v2505_v35 = vadd.f32 %v2503_v47, %v2495_v36  ;;  %v2918_v47 = vld [vmem:[%s6308_s11 + $0x10] sm:$0xff] }
0x31c6   :  { %5169 = vtanh.f32 %v2505_v35 }
0x31d0   :  { %v5170_v49 = vpop.eup %5169 }
0x31d1   :  { %2508 = vrot.lane.b32.xlu0 %v5170_v49, %s5319_s4 }
0x3243   :  { %v2509_v11 = vpop.permute.xlu0 %2508 }
0x3244   :  { %v2511_v51 = vmul.f32 %v2509_v11, %v2494_v34 }
0x3246   :  { %2513 = vrot.lane.b32.xlu1 %v2511_v51, %s5320_s2 }
0x32b8   :  { %v5949_v4 = vpop.permute.xlu1 %2513 }
0x32b9   :  { %4634 = vmatmul.mubr.msk.f32.vlgmr.msra.gmra.mrb[22].mxu1 %vm219_vm6, %v5949_v4 }
0x32ba   :  { %4939 = vmatpush3.bf16.msra.mxu1 %v5808_v59  ;;  %4655 = vmatprep.mubr.msk.f32.mxu1 %vm5317_vm0, %v5318_v1 }
0x32bb   :  { %4940 = vmatprep.subr.bf16.mxu1 %v5316_v0 }
0x32be   :  { %4942 = vmatpush3.bf16.msra.mxu1 %v5824_v5 }
0x32bf   :  { %4950 = vmatprep.subr.bf16.mxu1 %v4949_v22 }
0x338c   :  { %v2583_v53 = vpop.f32.mrb[22].mxu1 }
0x338d   :  { %v2587_v55 = vadd.f32 %v2583_v53, %v2095_v32  ;;  %v4635_v56 = vpop.f32.mrb[23].mxu1 }
0x338f   :  { %v4094_v57 = vmul.f32 -1.442695, %v2587_v55 }
0x3391   :  { %5171 = vpow2.f32 %v4094_v57 }
0x3392   :  { %5173 = vtanh.f32 %v2587_v55 }
0x339b   :  { %v5172_v58 = vpop.eup %5171 }
0x339c   :  { %v2592_v60 = vadd.f32 1.0, %v5172_v58  ;;  %v5174_v46 = vpop.eup %5173 }
0x339e   :  { %5175 = vrcp.f32 %v2592_v60 }
0x33a8   :  { %v5176_v63 = vpop.eup %5175 }
0x33a9   :  { %v2595_v28 = vsel %vm5509_vm5, %v5174_v46, %v5176_v63 }
0x33aa   :  { %2598 = vrot.lane.b32.xlu0 %v2595_v28, %s5319_s4  ;;  %v2596_v39 = vmul.f32 %v2595_v28, %v2505_v35  ;;  %v2919_v35 = vld [vmem:[%s6308_s11 + $0x18] sm:$0xff] }
0x341c   :  { %v2599_v6 = vpop.permute.xlu0 %2598 }
0x341d   :  { %v2601_v9 = vmul.f32 %v2599_v6, %v2595_v28 }
0x341f   :  { %2603 = vrot.lane.b32.xlu1 %v2601_v9, %s5319_s4 }
0x3491   :  { %v2604_v13 = vpop.permute.xlu1 %2603 }
0x3492   :  { %v2606_v50 = vadd.f32 %v2604_v13, %v2596_v39 }
0x3494   :  { %5177 = vtanh.f32 %v2606_v50 }
0x349e   :  { %v5178_v14 = vpop.eup %5177 }
0x349f   :  { %2609 = vrot.lane.b32.xlu0 %v5178_v14, %s5319_s4 }
0x3511   :  { %v2610_v61 = vpop.permute.xlu0 %2609 }
0x3512   :  { %v2612_v17 = vmul.f32 %v2610_v61, %v2595_v28 }
0x3514   :  { %2614 = vrot.lane.b32.xlu1 %v2612_v17, %s5320_s2 }
0x3586   :  { %v5966_v18 = vpop.permute.xlu1 %2614 }
0x3587   :  { %4645 = vmatmul.mubr.msk.f32.vlgmr.msra.gmra.mrb[42].mxu0 %vm219_vm6, %v5966_v18 }
0x3588   :  { %4945 = vmatpush3.bf16.msra.mxu0 %v5808_v59  ;;  %4666 = vmatprep.mubr.msk.f32.mxu0 %vm5317_vm0, %v5318_v1 }
0x3589   :  { %4946 = vmatprep.subr.bf16.mxu0 %v5316_v0 }
0x358c   :  { %4948 = vmatpush3.bf16.msra.mxu0 %v5824_v5 }
0x358d   :  { %4957 = vmatprep.subr.bf16.mxu0 %v5316_v0 }
0x365a   :  { %v2684_v8 = vpop.f32.mrb[42].mxu0 }
0x365b   :  { %v2688_v20 = vadd.f32 %v2684_v8, %v2100_v19  ;;  %v4646_v30 = vpop.f32.mrb[43].mxu0 }
0x365c   :  { %v2920_v30 = vld [vmem:[%s6309_s12] sm:$0xff] }
0x365d   :  { %v4096_v21 = vmul.f32 -1.442695, %v2688_v20 }
0x365f   :  { %5179 = vpow2.f32 %v4096_v21  ;;  %v2921_v21 = vld [vmem:[%s6309_s12 + $0x8] sm:$0xff] }
0x3660   :  { %5181 = vtanh.f32 %v2688_v20 }
0x3669   :  { %v5180_v10 = vpop.eup %5179 }
0x366a   :  { %v2693_v2 = vadd.f32 1.0, %v5180_v10  ;;  %v5182_v59 = vpop.eup %5181  ;;  %v6051_v10 = vpack.c.bf16 %v2921_v21, %v2920_v30 }
0x366c   :  { %5183 = vrcp.f32 %v2693_v2  ;;  %v2922_v2 = vld [vmem:[%s6309_s12 + $0x10] sm:$0xff] }
0x3676   :  { %v5184_v12 = vpop.eup %5183 }
0x3677   :  { %v2696_v23 = vsel %vm5509_vm5, %v5182_v59, %v5184_v12  ;;  %v2923_v59 = vld [vmem:[%s6309_s12 + $0x18] sm:$0xff] }
0x3678   :  { %2699 = vrot.lane.b32.xlu0 %v2696_v23, %s5319_s4  ;;  %v2697_v38 = vmul.f32 %v2696_v23, %v2606_v50  ;;  %v6061_v12 = vpack.c.bf16 %v2923_v59, %v2922_v2 }
0x36ea   :  { %v2700_v5 = vpop.permute.xlu0 %2699 }
0x36eb   :  { %v2702_v25 = vmul.f32 %v2700_v5, %v2696_v23 }
0x36ed   :  { %2704 = vrot.lane.b32.xlu1 %v2702_v25, %s5319_s4 }
0x375f   :  { %v2705_v62 = vpop.permute.xlu1 %2704 }
0x3760   :  { %v5982_v26 = vadd.f32 %v2705_v62, %v2697_v38  ;;  %v2110_v62 = vadd.f32 %v5893_v40, %v5851_v16 }
0x3762   :  { %5185 = vtanh.f32 %v5982_v26 }
0x3763   :  { %5187 = vpow2.f32 %v4074_v24 }
0x376c   :  { %v5186_v45 = vpop.eup %5185 }
0x376d   :  { %2710 = vrot.lane.b32.xlu0 %v5186_v45, %s5319_s4  ;;  %v5188_v29 = vpop.eup %5187 }
0x376e   :  { %v1938_v31 = vadd.f32 1.0, %v5188_v29 }
0x3770   :  { %5189 = vrcp.f32 %v1938_v31 }
0x3771   :  { %5191 = vtanh.f32 %v5846_v15  ;;  %v4953_v15 = vpack.c.bf16 %v2919_v35, %v2918_v47 }
0x377a   :  { %v5190_v37 = vpop.eup %5189 }
0x377b   :  { %v5192_v44 = vpop.eup %5191 }
0x377c   :  { %v1941_v36 = vsel %vm5509_vm5, %v5192_v44, %v5190_v37 }
0x37df   :  { %v2711_v33 = vpop.permute.xlu0 %2710 }
0x37e0   :  { %v2713_v34 = vmul.f32 %v2711_v33, %v2696_v23 }
0x37e2   :  { %2715 = vrot.lane.b32.xlu1 %v2713_v34, %s5320_s2 }
0x37e6   :  { %1944 = vrot.lane.b32.xlu1 %v1941_v36, %s5319_s4 }
0x3854   :  { %v2716_v49 = vpop.permute.xlu1 %2715 }
0x3855   :  { %4656 = vmatmul.mubr.msk.f32.vlgmr.msra.gmra.mrb[24].mxu1 %vm219_vm6, %v2716_v49 }
0x3856   :  { %4952 = vmatpush3.bf16.msra.mxu1 %v4949_v22  ;;  %4677 = vmatprep.mubr.msk.f32.mxu1 %vm219_vm6, %v5897_v54  ;;  %v1942_v54 = vmul.f32 %v1941_v36, %v5792_v52  ;;  %v6086_v22 = vld [vmem:[%s6310_s13] ss:$0 sm:$0xff] }
0x3857   :  { %4954 = vmatprep.subr.bf16.mxu1 %v4953_v15 }
0x3858   :  { %v1945_v11 = vpop.permute.xlu1 %1944 }
0x3859   :  { %v1947_v51 = vmul.f32 %v1945_v11, %v1941_v36 }
0x385a   :  { %4956 = vmatpush3.bf16.msra.mxu1 %v4953_v15 }
0x385b   :  { %1949 = vrot.lane.b32.xlu1 %v1947_v51, %s5319_s4  ;;  %4969 = vmatprep.subr.bf16.mxu1 %v5316_v0 }
0x385d   :  { %4678 = vmatmul.mubr.msk.f32.vlgmr.msra.gmra.mrb[26].mxu1 %vm219_vm6, %v5914_v7  ;;  %v2105_v7 = vadd.f32 %v5851_v16, %v5895_v43 }
0x385e   :  { %4680 = vmatprep.mubr.msk.f32.mxu1 %vm219_vm6, %v5931_v48  ;;  %4971 = vmatpush3.bf16.msra.mxu1 %v6051_v10 }
0x385f   :  { %4972 = vmatprep.subr.bf16.mxu1 %v5316_v0 }
0x3861   :  { %4681 = vmatmul.mubr.msk.f32.gmra.mrb[28].mxu1 %vm219_vm6, %v5949_v4 }
0x3862   :  { %4683 = vmatprep.mubr.msk.f32.mxu1 %vm219_vm6, %v5966_v18  ;;  %4974 = vmatpush3.bf16.msra.mxu1 %v6061_v12 }
0x3863   :  { %4981 = vmatprep.subr.bf16.mxu1 %v5316_v0 }
0x3865   :  { %4684 = vmatmul.mubr.msk.f32.gmra.mrb[30].mxu1 %vm219_vm6, %v2716_v49 }
0x38cd   :  { %v1950_v32 = vpop.permute.xlu1 %1949 }
0x38ce   :  { %v6019_v53 = vadd.f32 %v1950_v32, %v1942_v54 }
0x38d0   :  { %5193 = vtanh.f32 %v6019_v53 }
0x38da   :  { %v5194_v55 = vpop.eup %5193 }
0x38db   :  { %1955 = vrot.lane.b32.xlu1 %v5194_v55, %s5319_s4 }
0x3928   :  { %v2785_v48 = vpop.f32.mrb[24].mxu1 }
0x3929   :  { %v2789_v4 = vadd.f32 %v2785_v48, %v2105_v7  ;;  %v4657_v56 = vpop.f32.mrb[25].mxu1 }
0x392b   :  { %v4098_v57 = vmul.f32 -1.442695, %v2789_v4 }
0x392d   :  { %5195 = vpow2.f32 %v4098_v57 }
0x392e   :  { %5197 = vtanh.f32 %v2789_v4 }
0x3930   :  { %v6025_v58 = vpop.f32.mrb[26].mxu1 }
0x3931   :  { %v3002_v60 = vpop.f32.mrb[27].mxu1 }
0x3932   :  { %v3003_v45 = vadd.f32 %v6086_v22, %v3002_v60 }
0x3934   :  { %v6027_v52 = vpop.f32.mrb[28].mxu1 }
0x3935   :  { %v6029_v46 = vpop.f32.mrb[29].mxu1 }
0x3937   :  { %v5196_v63 = vpop.eup %5195 }
0x3938   :  { %v2794_v28 = vadd.f32 1.0, %v5196_v63  ;;  %v6031_v6 = vpop.f32.mrb[30].mxu1  ;;  %v5198_v43 = vpop.eup %5197 }
0x3939   :  { %v6033_v9 = vpop.f32.mrb[31].mxu1 }
0x393a   :  { %5199 = vrcp.f32 %v2794_v28 }
0x3944   :  { %v5200_v39 = vpop.eup %5199 }
0x3945   :  { %v2797_v13 = vsel %vm5509_vm5, %v5198_v43, %v5200_v39 }
0x3946   :  { %2800 = vrot.lane.b32.xlu0 %v2797_v13, %s5319_s4  ;;  %v2798_v18 = vmul.f32 %v2797_v13, %v5982_v26 }
0x394d   :  { %v1956_v50 = vpop.permute.xlu1 %1955 }
0x394e   :  { %v1958_v14 = vmul.f32 %v1956_v50, %v1941_v36 }
0x3950   :  { %3042 = vrot.lane.b32.xlu1 %v1958_v14, %s5320_s2  ;;  %v3008_v14 = vadd.f32 %v6025_v58, %v6086_v22 }
0x39b8   :  { %v2801_v61 = vpop.permute.xlu0 %2800 }
0x39b9   :  { %v2803_v17 = vmul.f32 %v2801_v61, %v2797_v13 }
0x39bb   :  { %2805 = vrot.lane.b32.xlu0 %v2803_v17, %s5319_s4 }
0x39c2   :  { %v3043_v38 = vpop.permute.xlu1 %3042 }
0x3a2d   :  { %v2806_v19 = vpop.permute.xlu0 %2805 }
0x3a2e   :  { %v6041_v8 = vadd.f32 %v2806_v19, %v2798_v18 }
0x3a30   :  { %5201 = vtanh.f32 %v6041_v8 }
0x3a3a   :  { %v5202_v20 = vpop.eup %5201 }
0x3a3b   :  { %2811 = vrot.lane.b32.xlu0 %v5202_v20, %s5319_s4 }
0x3aad   :  { %v2812_v23 = vpop.permute.xlu0 %2811 }
0x3aae   :  { %v2814_v5 = vmul.f32 %v2812_v23, %v2797_v13 }
0x3ab0   :  { %2816 = vrot.lane.b32.xlu0 %v2814_v5, %s5320_s2 }
0x3b22   :  { %v2817_v25 = vpop.permute.xlu0 %2816 }
0x3b23   :  { %4667 = vmatmul.mubr.msk.f32.vlgmr.msra.gmra.mrb[44].mxu0 %vm219_vm6, %v2817_v25  ;;  %4686 = vmatprep.mubr.msk.f32.mxu1 %vm219_vm6, %v2817_v25 }
0x3b24   :  { %4959 = vmatpush3.bf16.msra.mxu0 %v6051_v10  ;;  %4697 = vmatprep.mubr.msk.f32.mxu0 %vm5317_vm0, %v5318_v1 }
0x3b25   :  { %4960 = vmatprep.subr.bf16.mxu0 %v5316_v0 }
0x3b28   :  { %4962 = vmatpush3.bf16.msra.mxu0 %v6061_v12 }
0x3b29   :  { %4963 = vmatprep.subr.bf16.mxu0 %v5316_v0 }
0x3b2b   :  { %4698 = vmatmul.mubr.msk.f32.vlgmr.msra.gmra.mrb[46].mxu0 %vm219_vm6, %v3043_v38 }
0x3b2c   :  { %4965 = vmatpush3.bf16.msra.mxu0 %v6051_v10  ;;  %4708 = vmatprep.mubr.msk.f32.mxu0 %vm5317_vm0, %v5318_v1 }
0x3b2d   :  { %4966 = vmatprep.subr.bf16.mxu0 %v5316_v0 }
0x3b30   :  { %4968 = vmatpush3.bf16.msra.mxu0 %v6061_v12 }
0x3b31   :  { %4975 = vmatprep.subr.bf16.mxu0 %v5316_v0 }
0x3bf6   :  { %v2886_v26 = vpop.f32.mrb[44].mxu0 }
0x3bf7   :  { %v2890_v3 = vadd.f32 %v2886_v26, %v2110_v62  ;;  %v4668_v27 = vpop.f32.mrb[45].mxu0 }
0x3bf9   :  { %v4100_v35 = vmul.f32 -1.442695, %v2890_v3 }
0x3bfe   :  { %v3112_v24 = vpop.f32.mrb[46].mxu0 }
0x3bff   :  { %v3116_v29 = vadd.f32 %v3112_v24, %v3003_v45  ;;  %v4699_v31 = vpop.f32.mrb[47].mxu0 }
0x3c01   :  { %v4111_v33 = vmul.f32 -1.442695, %v3116_v29 }
0x3c03   :  { %5203 = vpow2.f32 %v4111_v33 }
0x3c04   :  { %5205 = vtanh.f32 %v3116_v29  ;;  %v3013_v29 = vadd.f32 %v6086_v22, %v6029_v46 }
0x3c0d   :  { %v5204_v34 = vpop.eup %5203 }
0x3c0e   :  { %v3121_v37 = vadd.f32 1.0, %v5204_v34  ;;  %v5206_v16 = vpop.eup %5205 }
0x3c10   :  { %5207 = vrcp.f32 %v3121_v37 }
0x3c11   :  { %5209 = vpow2.f32 %v4100_v35 }
0x3c1a   :  { %v5208_v40 = vpop.eup %5207 }
0x3c1b   :  { %v3124_v44 = vsel %vm5509_vm5, %v5206_v16, %v5208_v40  ;;  %v5210_v15 = vpop.eup %5209 }
0x3c1c   :  { %3127 = vrot.lane.b32.xlu0 %v3124_v44, %s5319_s4  ;;  %v3125_v49 = vmul.f32 %v3124_v44, %v6019_v53  ;;  %v2895_v11 = vadd.f32 1.0, %v5210_v15 }
0x3c8e   :  { %v3128_v36 = vpop.permute.xlu0 %3127 }
0x3c8f   :  { %v3130_v47 = vmul.f32 %v3128_v36, %v3124_v44 }
0x3c91   :  { %3132 = vrot.lane.b32.xlu1 %v3130_v47, %s5319_s4 }
0x3d03   :  { %v3133_v51 = vpop.permute.xlu1 %3132 }
0x3d04   :  { %v3135_v54 = vadd.f32 %v3133_v51, %v3125_v49 }
0x3d06   :  { %5211 = vtanh.f32 %v3135_v54 }
0x3d07   :  { %5213 = vrcp.f32 %v2895_v11 }
0x3d08   :  { %5215 = vtanh.f32 %v2890_v3 }
0x3d10   :  { %v5212_v32 = vpop.eup %5211 }
0x3d11   :  { %v5214_v55 = vpop.eup %5213  ;;  %3138 = vrot.lane.b32.xlu0 %v5212_v32, %s5319_s4 }
0x3d12   :  { %v5216_v7 = vpop.eup %5215 }
0x3d13   :  { %v2898_v48 = vsel %vm5509_vm5, %v5216_v7, %v5214_v55  ;;  %v3018_v7 = vadd.f32 %v6027_v52, %v6086_v22 }
0x3d14   :  { %v2899_v63 = vmul.f32 %v2898_v48, %v6041_v8 }
0x3d15   :  { %2901 = vrot.lane.b32.xlu0 %v2898_v48, %s5319_s4 }
0x3d83   :  { %v3139_v4 = vpop.permute.xlu0 %3138 }
0x3d84   :  { %v3141_v56 = vmul.f32 %v3139_v4, %v3124_v44 }
0x3d86   :  { %3143 = vrot.lane.b32.xlu1 %v3141_v56, %s5320_s2 }
0x3d87   :  { %v2902_v53 = vpop.permute.xlu0 %2901 }
0x3d88   :  { %v2904_v57 = vmul.f32 %v2902_v53, %v2898_v48 }
0x3d8a   :  { %2906 = vrot.lane.b32.xlu0 %v2904_v57, %s5319_s4 }
0x3df8   :  { %v6100_v60 = vpop.permute.xlu1 %3143 }
0x3df9   :  { %4709 = vmatmul.mubr.msk.f32.vlgmr.msra.gmra.mrb[48].mxu0 %vm219_vm6, %v6100_v60 }
0x3dfa   :  { %4977 = vmatpush3.bf16.msra.mxu0 %v6051_v10  ;;  %4730 = vmatprep.mubr.msk.f32.mxu0 %vm5317_vm0, %v5318_v1 }
0x3dfb   :  { %4978 = vmatprep.subr.bf16.mxu0 %v5316_v0 }
0x3dfc   :  { %v2907_v28 = vpop.permute.xlu0 %2906 }
0x3dfd   :  { %v2909_v43 = vadd.f32 %v2907_v28, %v2899_v63 }
0x3dfe   :  { %4980 = vmatpush3.bf16.msra.mxu0 %v6061_v12 }
0x3dff   :  { %5217 = vtanh.f32 %v2909_v43  ;;  %4987 = vmatprep.subr.bf16.mxu0 %v5316_v0 }
0x3e09   :  { %v5218_v39 = vpop.eup %5217 }
0x3e0a   :  { %2912 = vrot.lane.b32.xlu0 %v5218_v39, %s5319_s4 }
0x3e7c   :  { %v2913_v13 = vpop.permute.xlu0 %2912 }
0x3e7d   :  { %v2915_v50 = vmul.f32 %v2913_v13, %v2898_v48 }
0x3e7f   :  { %2932 = vrot.lane.b32.xlu0 %v2915_v50, %s5320_s2 }
0x3ecc   :  { %v3213_v61 = vpop.f32.mrb[48].mxu0 }
0x3ecd   :  { %v3217_v17 = vadd.f32 %v3213_v61, %v3008_v14  ;;  %v4710_v18 = vpop.f32.mrb[49].mxu0 }
0x3ecf   :  { %v4113_v19 = vmul.f32 -1.442695, %v3217_v17 }
0x3ed1   :  { %5219 = vpow2.f32 %v4113_v19 }
0x3ed2   :  { %5221 = vtanh.f32 %v3217_v17 }
0x3edb   :  { %v5220_v8 = vpop.eup %5219 }
0x3edc   :  { %v3222_v20 = vadd.f32 1.0, %v5220_v8  ;;  %v5222_v30 = vpop.eup %5221 }
0x3ede   :  { %5223 = vrcp.f32 %v3222_v20  ;;  %v3023_v20 = vadd.f32 %v6086_v22, %v6033_v9 }
0x3ee8   :  { %v5224_v21 = vpop.eup %5223 }
0x3ee9   :  { %v3225_v2 = vsel %vm5509_vm5, %v5222_v30, %v5224_v21 }
0x3eea   :  { %3228 = vrot.lane.b32.xlu1 %v3225_v2, %s5319_s4  ;;  %v3226_v38 = vmul.f32 %v3225_v2, %v3135_v54 }
0x3ef1   :  { %v2933_v59 = vpop.permute.xlu0 %2932 }
0x3ef2   :  { %4687 = vmatmul.mubr.msk.f32.gmra.mrb[32].mxu1 %vm219_vm6, %v2933_v59 }
0x3ef3   :  { %4719 = vmatprep.mubr.msk.f32.mxu1 %vm5317_vm0, %v5318_v1 }
0x3f5c   :  { %v3229_v58 = vpop.permute.xlu1 %3228 }
0x3f5d   :  { %v3231_v23 = vmul.f32 %v3229_v58, %v3225_v2 }
0x3f5f   :  { %3233 = vrot.lane.b32.xlu1 %v3231_v23, %s5319_s4 }
0x3fc5   :  { %v6122_v5 = vpop.f32.mrb[32].mxu1 }
0x3fc6   :  { %v6124_v25 = vpop.f32.mrb[33].mxu1 }
0x3fd1   :  { %v3234_v62 = vpop.permute.xlu1 %3233 }
0x3fd2   :  { %v3236_v26 = vadd.f32 %v3234_v62, %v3226_v38 }
0x3fd4   :  { %5225 = vtanh.f32 %v3236_v26 }
0x3fde   :  { %v5226_v3 = vpop.eup %5225 }
0x3fdf   :  { %3239 = vrot.lane.b32.xlu1 %v5226_v3, %s5319_s4 }
0x4051   :  { %v3240_v27 = vpop.permute.xlu1 %3239 }
0x4052   :  { %v3242_v45 = vmul.f32 %v3240_v27, %v3225_v2 }
0x4054   :  { %3244 = vrot.lane.b32.xlu1 %v3242_v45, %s5320_s2 }
0x40c6   :  { %v6128_v24 = vpop.permute.xlu1 %3244 }
0x40c7   :  { %4720 = vmatmul.mubr.msk.f32.vlgmr.msra.gmra.mrb[34].mxu1 %vm219_vm6, %v6128_v24 }
0x40c8   :  { %4983 = vmatpush3.bf16.msra.mxu1 %v6051_v10  ;;  %4741 = vmatprep.mubr.msk.f32.mxu1 %vm5317_vm0, %v5318_v1 }
0x40c9   :  { %4984 = vmatprep.subr.bf16.mxu1 %v5316_v0 }
0x40cc   :  { %4986 = vmatpush3.bf16.msra.mxu1 %v6061_v12 }
0x40cd   :  { %4993 = vmatprep.subr.bf16.mxu1 %v5316_v0 }
0x419a   :  { %v3314_v31 = vpop.f32.mrb[34].mxu1 }
0x419b   :  { %v3318_v33 = vadd.f32 %v3314_v31, %v3013_v29  ;;  %v4721_v34 = vpop.f32.mrb[35].mxu1 }
0x419d   :  { %v4115_v37 = vmul.f32 -1.442695, %v3318_v33 }
0x419f   :  { %5227 = vpow2.f32 %v4115_v37 }
0x41a0   :  { %5229 = vtanh.f32 %v3318_v33 }
0x41a9   :  { %v5228_v16 = vpop.eup %5227 }
0x41aa   :  { %v3323_v40 = vadd.f32 1.0, %v5228_v16  ;;  %v5230_v44 = vpop.eup %5229  ;;  %v3028_v16 = vadd.f32 %v6031_v6, %v6086_v22 }
0x41ac   :  { %5231 = vrcp.f32 %v3323_v40 }
0x41b6   :  { %v5232_v36 = vpop.eup %5231 }
0x41b7   :  { %v3326_v47 = vsel %vm5509_vm5, %v5230_v44, %v5232_v36 }
0x41b8   :  { %3329 = vrot.lane.b32.xlu0 %v3326_v47, %s5319_s4  ;;  %v3327_v46 = vmul.f32 %v3326_v47, %v3236_v26 }
0x422a   :  { %v3330_v35 = vpop.permute.xlu0 %3329 }
0x422b   :  { %v3332_v15 = vmul.f32 %v3330_v35, %v3326_v47 }
0x422d   :  { %3334 = vrot.lane.b32.xlu1 %v3332_v15, %s5319_s4 }
0x429f   :  { %v3335_v49 = vpop.permute.xlu1 %3334 }
0x42a0   :  { %v3337_v11 = vadd.f32 %v3335_v49, %v3327_v46 }
0x42a2   :  { %5233 = vtanh.f32 %v3337_v11 }
0x42ac   :  { %v5234_v51 = vpop.eup %5233 }
0x42ad   :  { %3340 = vrot.lane.b32.xlu0 %v5234_v51, %s5319_s4  ;;  %v3849_v51 = vld [vmem:[%s6311_s14] sm:$0xff] }
0x431f   :  { %v3341_v54 = vpop.permute.xlu0 %3340 }
0x4320   :  { %v3343_v32 = vmul.f32 %v3341_v54, %v3326_v47  ;;  %v3850_v54 = vld [vmem:[%s6311_s14 + $0x8] sm:$0xff] }
0x4322   :  { %3345 = vrot.lane.b32.xlu1 %v3343_v32, %s5320_s2  ;;  %v5005_v32 = vpack.c.bf16 %v3850_v54, %v3849_v51 }
0x4394   :  { %v6146_v55 = vpop.permute.xlu1 %3345 }
0x4395   :  { %4731 = vmatmul.mubr.msk.f32.vlgmr.msra.gmra.mrb[50].mxu0 %vm219_vm6, %v6146_v55 }
0x4396   :  { %4989 = vmatpush3.bf16.msra.mxu0 %v6051_v10  ;;  %4752 = vmatprep.mubr.msk.f32.mxu0 %vm5317_vm0, %v5318_v1 }
0x4397   :  { %4990 = vmatprep.subr.bf16.mxu0 %v5316_v0 }
0x439a   :  { %4992 = vmatpush3.bf16.msra.mxu0 %v6061_v12 }
0x439b   :  { %4999 = vmatprep.subr.bf16.mxu0 %v5316_v0 }
0x4468   :  { %v3415_v48 = vpop.f32.mrb[50].mxu0 }
0x4469   :  { %v3419_v4 = vadd.f32 %v3415_v48, %v3018_v7  ;;  %v4732_v56 = vpop.f32.mrb[51].mxu0 }
0x446a   :  { %v3851_v56 = vld [vmem:[%s6311_s14 + $0x10] sm:$0xff] }
0x446b   :  { %v4117_v53 = vmul.f32 -1.442695, %v3419_v4 }
0x446d   :  { %5235 = vpow2.f32 %v4117_v53  ;;  %v3852_v53 = vld [vmem:[%s6311_s14 + $0x18] sm:$0xff] }
0x446e   :  { %5237 = vtanh.f32 %v3419_v4 }
0x4477   :  { %v5236_v57 = vpop.eup %5235 }
0x4478   :  { %v3424_v63 = vadd.f32 1.0, %v5236_v57  ;;  %v5238_v28 = vpop.eup %5237  ;;  %v5009_v57 = vpack.c.bf16 %v3852_v53, %v3851_v56  ;;  %v3038_v53 = vadd.f32 %v6122_v5, %v6086_v22 }
0x447a   :  { %5239 = vrcp.f32 %v3424_v63 }
0x4484   :  { %v5240_v43 = vpop.eup %5239 }
0x4485   :  { %v3427_v39 = vsel %vm5509_vm5, %v5238_v28, %v5240_v43  ;;  %v3033_v28 = vadd.f32 %v6086_v22, %v6124_v25 }
0x4486   :  { %3430 = vrot.lane.b32.xlu0 %v3427_v39, %s5319_s4  ;;  %v3428_v52 = vmul.f32 %v3427_v39, %v3337_v11 }
0x44f8   :  { %v3431_v13 = vpop.permute.xlu0 %3430 }
0x44f9   :  { %v3433_v50 = vmul.f32 %v3431_v13, %v3427_v39 }
0x44fb   :  { %3435 = vrot.lane.b32.xlu1 %v3433_v50, %s5319_s4  ;;  %v6223_v50 = vld [vmem:[#allocation2] ss:$0 sm:$0xff] }
0x456d   :  { %v3436_v14 = vpop.permute.xlu1 %3435 }
0x456e   :  { %v3438_v61 = vadd.f32 %v3436_v14, %v3428_v52 }
0x4570   :  { %5241 = vtanh.f32 %v3438_v61 }
0x457a   :  { %v5242_v17 = vpop.eup %5241 }
0x457b   :  { %3441 = vrot.lane.b32.xlu0 %v5242_v17, %s5319_s4 }
0x45ed   :  { %v3442_v18 = vpop.permute.xlu0 %3441 }
0x45ee   :  { %v3444_v19 = vmul.f32 %v3442_v18, %v3427_v39 }
0x45f0   :  { %3446 = vrot.lane.b32.xlu1 %v3444_v19, %s5320_s2 }
0x4662   :  { %v6164_v8 = vpop.permute.xlu1 %3446 }
0x4663   :  { %4742 = vmatmul.mubr.msk.f32.vlgmr.msra.gmra.mrb[36].mxu1 %vm219_vm6, %v6164_v8 }
0x4664   :  { %4995 = vmatpush3.bf16.msra.mxu1 %v6051_v10  ;;  %4763 = vmatprep.mubr.msk.f32.mxu1 %vm5317_vm0, %v5318_v1 }
0x4665   :  { %4996 = vmatprep.subr.bf16.mxu1 %v5316_v0 }
0x4668   :  { %4998 = vmatpush3.bf16.msra.mxu1 %v6061_v12 }
0x4669   :  { %5006 = vmatprep.subr.bf16.mxu1 %v5005_v32 }
0x4736   :  { %v3516_v30 = vpop.f32.mrb[36].mxu1 }
0x4737   :  { %v3520_v21 = vadd.f32 %v3516_v30, %v3023_v20  ;;  %v4743_v2 = vpop.f32.mrb[37].mxu1 }
0x4739   :  { %v4119_v59 = vmul.f32 -1.442695, %v3520_v21 }
0x473b   :  { %5243 = vpow2.f32 %v4119_v59 }
0x473c   :  { %5245 = vtanh.f32 %v3520_v21 }
0x4745   :  { %v5244_v58 = vpop.eup %5243 }
0x4746   :  { %v3525_v23 = vadd.f32 1.0, %v5244_v58  ;;  %v5246_v38 = vpop.eup %5245 }
0x4748   :  { %5247 = vrcp.f32 %v3525_v23 }
0x4752   :  { %v5248_v62 = vpop.eup %5247 }
0x4753   :  { %v3528_v26 = vsel %vm5509_vm5, %v5246_v38, %v5248_v62 }
0x4754   :  { %3531 = vrot.lane.b32.xlu0 %v3528_v26, %s5319_s4  ;;  %v3529_v9 = vmul.f32 %v3528_v26, %v3438_v61 }
0x47c6   :  { %v3532_v3 = vpop.permute.xlu0 %3531 }
0x47c7   :  { %v3534_v27 = vmul.f32 %v3532_v3, %v3528_v26 }
0x47c9   :  { %3536 = vrot.lane.b32.xlu1 %v3534_v27, %s5319_s4 }
0x483b   :  { %v3537_v45 = vpop.permute.xlu1 %3536 }
0x483c   :  { %v3539_v29 = vadd.f32 %v3537_v45, %v3529_v9 }
0x483e   :  { %5249 = vtanh.f32 %v3539_v29 }
0x4848   :  { %v5250_v31 = vpop.eup %5249 }
0x4849   :  { %3542 = vrot.lane.b32.xlu0 %v5250_v31, %s5319_s4 }
0x48bb   :  { %v3543_v33 = vpop.permute.xlu0 %3542 }
0x48bc   :  { %v3545_v34 = vmul.f32 %v3543_v33, %v3528_v26 }
0x48be   :  { %3547 = vrot.lane.b32.xlu1 %v3545_v34, %s5320_s2 }
0x4930   :  { %v3548_v37 = vpop.permute.xlu1 %3547 }
0x4931   :  { %4753 = vmatmul.mubr.msk.f32.vlgmr.msra.gmra.mrb[52].mxu0 %vm219_vm6, %v3548_v37 }
0x4932   :  { %5001 = vmatpush3.bf16.msra.mxu0 %v6051_v10  ;;  %4774 = vmatprep.mubr.msk.f32.mxu0 %vm5317_vm0, %v5318_v1 }
0x4933   :  { %5002 = vmatprep.subr.bf16.mxu0 %v5316_v0 }
0x4936   :  { %5004 = vmatpush3.bf16.msra.mxu0 %v6061_v12 }
0x4a04   :  { %v3617_v40 = vpop.f32.mrb[52].mxu0 }
0x4a05   :  { %v3621_v44 = vadd.f32 %v3617_v40, %v3028_v16  ;;  %v4754_v36 = vpop.f32.mrb[53].mxu0 }
0x4a07   :  { %v4121_v47 = vmul.f32 -1.442695, %v3621_v44 }
0x4a09   :  { %5251 = vpow2.f32 %v4121_v47 }
0x4a0a   :  { %5253 = vtanh.f32 %v3621_v44 }
0x4a13   :  { %v5252_v35 = vpop.eup %5251 }
0x4a14   :  { %v3626_v15 = vadd.f32 1.0, %v5252_v35  ;;  %v5254_v10 = vpop.eup %5253 }
0x4a16   :  { %5255 = vrcp.f32 %v3626_v15 }
0x4a20   :  { %v5256_v46 = vpop.eup %5255 }
0x4a21   :  { %v3629_v1 = vsel %vm5509_vm5, %v5254_v10, %v5256_v46 }
0x4a22   :  { %3632 = vrot.lane.b32.xlu0 %v3629_v1, %s5319_s4  ;;  %v3630_v6 = vmul.f32 %v3629_v1, %v3539_v29 }
0x4a94   :  { %v3633_v0 = vpop.permute.xlu0 %3632 }
0x4a95   :  { %v3635_v12 = vmul.f32 %v3633_v0, %v3629_v1 }
0x4a97   :  { %3637 = vrot.lane.b32.xlu1 %v3635_v12, %s5319_s4 }
0x4b09   :  { %v3638_v49 = vpop.permute.xlu1 %3637 }
0x4b0a   :  { %v6193_v11 = vadd.f32 %v3638_v49, %v3630_v6 }
0x4b0c   :  { %5257 = vtanh.f32 %v6193_v11 }
0x4b16   :  { %v5258_v7 = vpop.eup %5257 }
0x4b17   :  { %3643 = vrot.lane.b32.xlu0 %v5258_v7, %s5319_s4 }
0x4b89   :  { %v3644_v48 = vpop.permute.xlu0 %3643 }
0x4b8a   :  { %v3646_v4 = vmul.f32 %v3644_v48, %v3629_v1 }
0x4b8c   :  { %3648 = vrot.lane.b32.xlu1 %v3646_v4, %s5320_s2 }
0x4bfe   :  { %v3649_v63 = vpop.permute.xlu1 %3648 }
0x4bff   :  { %4764 = vmatmul.mubr.msk.f32.vlgmr.msra.gmra.mrb[38].mxu1 %vm219_vm6, %v3649_v63 }
0x4c00   :  { %5008 = vmatpush3.bf16.msra.mxu1 %v5005_v32  ;;  %4785 = vmatprep.mubr.msk.f32.mxu1 %vm219_vm6, %v6100_v60 }
0x4c01   :  { %5010 = vmatprep.subr.bf16.mxu1 %v5009_v57 }
0x4c04   :  { %5012 = vmatpush3.bf16.msra.mxu1 %v5009_v57 }
0x4c07   :  { %4786 = vmatmul.mubr.msk.f32.vlgmr.msra.gmra.mrb[40].mxu1 %vm219_vm6, %v6128_v24 }
0x4c08   :  { %4788 = vmatprep.mubr.msk.f32.mxu1 %vm219_vm6, %v6146_v55 }
0x4c0b   :  { %4789 = vmatmul.mubr.msk.f32.gmra.mrb[42].mxu1 %vm219_vm6, %v6164_v8 }
0x4c0c   :  { %4791 = vmatprep.mubr.msk.f32.mxu1 %vm219_vm6, %v3548_v37 }
0x4c0f   :  { %4792 = vmatmul.mubr.msk.f32.gmra.mrb[44].mxu1 %vm219_vm6, %v3649_v63 }
0x4cd2   :  { %v3718_v43 = vpop.f32.mrb[38].mxu1 }
0x4cd3   :  { %v3722_v60 = vadd.f32 %v3718_v43, %v3033_v28  ;;  %v4765_v39 = vpop.f32.mrb[39].mxu1 }
0x4cd5   :  { %v4123_v13 = vmul.f32 -1.442695, %v3722_v60 }
0x4cd7   :  { %5259 = vpow2.f32 %v4123_v13 }
0x4cda   :  { %v4787_v24 = vpop.f32.mrb[40].mxu1 }
0x4cdb   :  { %v3937_v55 = vadd.f32 %v4787_v24, %v6223_v50  ;;  %v3931_v52 = vpop.f32.mrb[41].mxu1 }
0x4cdc   :  { %v3932_v14 = vadd.f32 %v6223_v50, %v3931_v52 }
0x4cdd   :  { %v4136_v61 = vclamps-f32 %v3937_v55, 2.9957323 }
0x4cde   :  { %v4135_v17 = vclamps-f32 %v3932_v14, 2.9957323  ;;  %v4790_v18 = vpop.f32.mrb[42].mxu1 }
0x4cdf   :  { %v3991_v19 = vmul.f32 1.442695, %v4136_v61  ;;  %v3947_v8 = vadd.f32 %v4790_v18, %v6223_v50  ;;  %v3941_v25 = vpop.f32.mrb[43].mxu1 }
0x4ce0   :  { %v3989_v20 = vmul.f32 1.442695, %v4135_v17  ;;  %v3942_v30 = vadd.f32 %v6223_v50, %v3941_v25 }
0x4ce1   :  { %v5260_v21 = vpop.eup %5259  ;;  %5261 = vpow2.f32 %v3991_v19  ;;  %v4138_v2 = vclamps-f32 %v3947_v8, 2.9957323 }
0x4ce2   :  { %v3727_v59 = vadd.f32 1.0, %v5260_v21  ;;  %5263 = vpow2.f32 %v3989_v20  ;;  %v4137_v58 = vclamps-f32 %v3942_v30, 2.9957323  ;;  %v4793_v23 = vpop.f32.mrb[44].mxu1 }
0x4ce3   :  { %5265 = vtanh.f32 %v3722_v60  ;;  %v3995_v38 = vmul.f32 1.442695, %v4138_v2  ;;  %v3957_v62 = vadd.f32 %v4793_v23, %v6223_v50  ;;  %v3951_v26 = vpop.f32.mrb[45].mxu1 }
0x4ce4   :  { %5267 = vrcp.f32 %v3727_v59  ;;  %v3993_v3 = vmul.f32 1.442695, %v4137_v58  ;;  %v3952_v27 = vadd.f32 %v6223_v50, %v3951_v26 }
0x4ce5   :  { %5269 = vpow2.f32 %v3995_v38  ;;  %v4140_v9 = vclamps-f32 %v3957_v62, 2.9957323 }
0x4ce6   :  { %5271 = vpow2.f32 %v3993_v3  ;;  %v4139_v45 = vclamps-f32 %v3952_v27, 2.9957323 }
0x4ce7   :  { %v3999_v29 = vmul.f32 1.442695, %v4140_v9 }
0x4ce8   :  { %v3997_v31 = vmul.f32 1.442695, %v4139_v45 }
0x4ce9   :  { %5273 = vpow2.f32 %v3999_v29 }
0x4cea   :  { %5275 = vpow2.f32 %v3997_v31 }
0x4ceb   :  { %v5262_v34 = vpop.eup %5261 }
0x4cec   :  { %v5264_v37 = vpop.eup %5263  ;;  %v4006_v16 = vsel %vm6233_vm11, %v5262_v34, %v3937_v55 }
0x4ced   :  { %v5266_v40 = vpop.eup %5265  ;;  %4014 = vst [vmem:[%s6313_s16 + $0x8] sm:$0xff] %v4006_v16  ;;  %v4005_v41 = vsel %vm6233_vm11, %v5264_v37, %v3932_v14 }
0x4cee   :  { %v5268_v44 = vpop.eup %5267  ;;  %4013 = vst [vmem:[%s6313_s16] sm:$0xff] %v4005_v41 }
0x4cef   :  { %v5270_v36 = vpop.eup %5269  ;;  %v3730_v47 = vsel %vm5509_vm5, %v5266_v40, %v5268_v44 }
0x4cf0   :  { %v5272_v35 = vpop.eup %5271  ;;  %v4008_v15 = vsel %vm6233_vm11, %v5270_v36, %v3947_v8  ;;  %3733 = vrot.lane.b32.xlu0 %v3730_v47, %s5319_s4  ;;  %v3731_v51 = vmul.f32 %v3730_v47, %v6193_v11 }
0x4cf1   :  { %4016 = vst [vmem:[%s6313_s16 + $0x18] sm:$0xff] %v4008_v15  ;;  %v4007_v10 = vsel %vm6233_vm11, %v5272_v35, %v3942_v30 }
0x4cf2   :  { %4015 = vst [vmem:[%s6313_s16 + $0x10] sm:$0xff] %v4007_v10 }
0x4cf3   :  { %v5274_v46 = vpop.eup %5273 }
0x4cf4   :  { %v5276_v1 = vpop.eup %5275  ;;  %v4010_v0 = vsel %vm6233_vm11, %v5274_v46, %v3957_v62 }
0x4cf5   :  { %4018 = vst [vmem:[%s6313_s16 + $0x28] sm:$0xff] %v4010_v0  ;;  %v4009_v12 = vsel %vm6233_vm11, %v5276_v1, %v3952_v27 }
0x4cf6   :  { %4017 = vst [vmem:[%s6313_s16 + $0x20] sm:$0xff] %v4009_v12 }
0x4d62   :  { %v3734_v6 = vpop.permute.xlu0 %3733 }
0x4d63   :  { %v3736_v49 = vmul.f32 %v3734_v6, %v3730_v47 }
0x4d65   :  { %3738 = vrot.lane.b32.xlu1 %v3736_v49, %s5319_s4 }
0x4dd7   :  { %v3739_v54 = vpop.permute.xlu1 %3738 }
0x4dd8   :  { %v3741_v32 = vadd.f32 %v3739_v54, %v3731_v51 }
0x4dda   :  { %5277 = vtanh.f32 %v3741_v32 }
0x4de4   :  { %v5278_v7 = vpop.eup %5277 }
0x4de5   :  { %3744 = vrot.lane.b32.xlu0 %v5278_v7, %s5319_s4 }
0x4e57   :  { %v3745_v48 = vpop.permute.xlu0 %3744 }
0x4e58   :  { %v3747_v4 = vmul.f32 %v3745_v48, %v3730_v47 }
0x4e5a   :  { %3749 = vrot.lane.b32.xlu1 %v3747_v4, %s5320_s2 }
0x4ecc   :  { %v3750_v56 = vpop.permute.xlu1 %3749 }
0x4ecd   :  { %4775 = vmatmul.mubr.msk.f32.vlgmr.msra.gmra.mrb[54].mxu0 %vm219_vm6, %v3750_v56  ;;  %4794 = vmatprep.mubr.msk.f32.mxu1 %vm219_vm6, %v3750_v56 }
0x4fa0   :  { %v3819_v57 = vpop.f32.mrb[54].mxu0 }
0x4fa1   :  { %v3823_v11 = vadd.f32 %v3819_v57, %v3038_v53  ;;  %v4776_v63 = vpop.f32.mrb[55].mxu0 }
0x4fa3   :  { %v4125_v28 = vmul.f32 -1.442695, %v3823_v11 }
0x4fa5   :  { %5279 = vpow2.f32 %v4125_v28 }
0x4fa6   :  { %5281 = vtanh.f32 %v3823_v11 }
0x4faf   :  { %v5280_v43 = vpop.eup %5279 }
0x4fb0   :  { %v3828_v60 = vadd.f32 1.0, %v5280_v43  ;;  %v5282_v39 = vpop.eup %5281 }
0x4fb2   :  { %5283 = vrcp.f32 %v3828_v60 }
0x4fbc   :  { %v5284_v13 = vpop.eup %5283 }
0x4fbd   :  { %v3831_v24 = vsel %vm5509_vm5, %v5282_v39, %v5284_v13 }
0x4fbe   :  { %3834 = vrot.lane.b32.xlu0 %v3831_v24, %s5319_s4  ;;  %v3832_v22 = vmul.f32 %v3831_v24, %v3741_v32 }
0x5030   :  { %v3835_v55 = vpop.permute.xlu0 %3834 }
0x5031   :  { %v3837_v52 = vmul.f32 %v3835_v55, %v3831_v24 }
0x5033   :  { %3839 = vrot.lane.b32.xlu1 %v3837_v52, %s5319_s4 }
0x50a5   :  { %v3840_v5 = vpop.permute.xlu1 %3839 }
0x50a6   :  { %v3842_v14 = vadd.f32 %v3840_v5, %v3832_v22 }
0x50a8   :  { %5285 = vtanh.f32 %v3842_v14 }
0x50b2   :  { %v5286_v61 = vpop.eup %5285 }
0x50b3   :  { %3845 = vrot.lane.b32.xlu0 %v5286_v61, %s5319_s4 }
0x5125   :  { %v3846_v17 = vpop.permute.xlu0 %3845 }
0x5126   :  { %v3848_v18 = vmul.f32 %v3846_v17, %v3831_v24 }
0x5128   :  { %3861 = vrot.lane.b32.xlu1 %v3848_v18, %s5320_s2 }
0x519a   :  { %v3862_v19 = vpop.permute.xlu1 %3861 }
0x519b   :  { %4795 = vmatmul.mubr.msk.f32.gmra.mrb[46].mxu1 %vm219_vm6, %v3862_v19 }
0x526e   :  { %v4796_v42 = vpop.f32.mrb[46].mxu1 }
0x526f   :  { %v3967_v8 = vadd.f32 %v4796_v42, %v6223_v50  ;;  %v3961_v25 = vpop.f32.mrb[47].mxu1 }
0x5270   :  { %v3962_v20 = vadd.f32 %v6223_v50, %v3961_v25 }
0x5271   :  { %v4142_v30 = vclamps-f32 %v3967_v8, 2.9957323 }
0x5272   :  { %v4141_v21 = vclamps-f32 %v3962_v20, 2.9957323 }
0x5273   :  { %v4003_v2 = vmul.f32 1.442695, %v4142_v30 }
0x5274   :  { %v4001_v59 = vmul.f32 1.442695, %v4141_v21 }
0x5275   :  { %5287 = vpow2.f32 %v4003_v2 }
0x5276   :  { %5289 = vpow2.f32 %v4001_v59 }
0x527f   :  { %v5288_v58 = vpop.eup %5287 }
0x5280   :  { %v5290_v23 = vpop.eup %5289  ;;  %v4012_v38 = vsel %vm6233_vm11, %v5288_v58, %v3967_v8 }
0x5281   :  { %4020 = vst [vmem:[%s6313_s16 + $0x38] sm:$0xff] %v4012_v38  ;;  %v4011_v62 = vsel %vm6233_vm11, %v5290_v23, %v3962_v20 }
0x5282   :  { %4019 = vst [vmem:[%s6313_s16 + $0x30] sm:$0xff] %v4011_v62 }
0x5283   :  { %4025 = vsyncpa [#allocation3], 1 }

</bundles_post_ra>
